<compile_context>
chip_gen: v5e
topology: v5e:2x2
jax: 0.10.0
libtpu: 0.0.40
codegen_flags: <defaults>
</compile_context>

<pallas_src>
import functools

import jax
import jax.numpy as jnp
from jax.experimental import pallas as pl
from jax.experimental.pallas import tpu as pltpu


def _round_up(x, m):
    return (x + m - 1) // m * m


def _tpu_vmem_bytes():
    try:
        return int(pltpu.get_tpu_info().vmem_capacity_bytes)
    except Exception:
        return 64 * 1024 * 1024      # conservative fallback: v7x per-TensorCore VMEM


def _pick_chunk(B, Hp, vmem_bytes, t_cap):
    """Largest time-chunk whose double-buffered streams fit a conservative VMEM budget."""
    G = 4 * Hp
    budget = vmem_bytes // 2
    chunk = 8
    for cand in (64, 32, 16, 8):
        use = (2 * cand * B * G * 2        # bf16 gates chunk, double-buffered
               + 2 * cand * B * Hp * 2     # bf16 output chunk, double-buffered
               + 2 * Hp * G * 2            # resident W_hh (pipeline double-buffers it)
               + B * Hp * (2 + 4))         # h (bf16) + c (f32) state scratch
        if use <= budget:
            chunk = cand
            break
    return max(8, min(chunk, t_cap))


# ---------------------------------------------------------------------------
# Weight padding helpers: hidden H -> lane-aligned Hp (padded lanes stay exactly 0).
# ---------------------------------------------------------------------------
def _pad_gate_rows(w, H, Hp):
    """(4H, ...) -> (4Hp, ...): each of the 4 gate blocks zero-padded from H to Hp rows."""
    w4 = w.reshape(4, H, *w.shape[1:])
    w4 = jnp.pad(w4, ((0, 0), (0, Hp - H)) + ((0, 0),) * (w.ndim - 1))
    return w4.reshape(4 * Hp, *w.shape[1:])


def _pad_last(w, H, Hp):
    """Zero-pad last axis H -> Hp."""
    return jnp.pad(w, [(0, 0)] * (w.ndim - 1) + [(0, Hp - H)])


def _pad_bidir_cols(w, H, Hp):
    """(..., 2H) -> (..., 2Hp): [fwd | bwd] halves each zero-padded H -> Hp."""
    return jnp.concatenate([_pad_last(w[..., :H], H, Hp),
                            _pad_last(w[..., H:], H, Hp)], axis=-1)


# ---------------------------------------------------------------------------
# Pallas kernel: sequential recurrence of one bidirectional LSTM layer.
# grid = (2 directions [parallel], Tp//chunk time-chunks [arbitrary]).
# h/c carried across time-chunks in VMEM scratch (per-TensorCore, so the 'parallel'
# direction axis on megacore parts keeps each direction's state private).
# ---------------------------------------------------------------------------
def _bilstm_recurrence_kernel(gates_ref, whh_ref, len_ref, out_ref, h_scr, c_scr,
                              *, chunk, hidden):
    d = pl.program_id(0)          # 0 = forward, 1 = backward
    c = pl.program_id(1)          # time-chunk iteration index
    nc = pl.num_programs(1)

    @pl.when(c == 0)
    def _():
        h_scr[...] = jnp.zeros_like(h_scr)
        c_scr[...] = jnp.zeros_like(c_scr)

    whh = whh_ref[...]                               # (Hp, 4Hp) bf16, resident
    B = len_ref.shape[0]
    # lengths lane-broadcast once per chunk (hoisted out of the per-timestep chain)
    len_b = jnp.broadcast_to(len_ref[...], (B, hidden))          # (B, Hp) int32
    t_base = ((1 - d) * c + d * (nc - 1 - c)) * chunk            # global t of chunk start

    def body(i, carry):
        h, c_state = carry                           # h bf16, c f32
        li = (1 - d) * i + d * (chunk - 1 - i)       # in-chunk step (reversed for bwd)
        gx = gates_ref[li]                           # (B, 4Hp) bf16 — precomputed x-proj+bias
        valid = (t_base + li) < len_b                # (B, Hp) bool, t < length

        # recurrent matmul only; accumulate in f32 (gx upcast happens in the add)
        gates = gx + jnp.dot(h, whh, preferred_element_type=jnp.float32)

        # PyTorch gate order: i, f, g, o — nonlinearities in f32 (EUP path)
        i_g = jax.nn.sigmoid(gates[:, 0 * hidden:1 * hidden])
        f_g = jax.nn.sigmoid(gates[:, 1 * hidden:2 * hidden])
        g_g = jnp.tanh(gates[:, 2 * hidden:3 * hidden])
        o_g = jax.nn.sigmoid(gates[:, 3 * hidden:4 * hidden])

        c_new = f_g * c_state + i_g * g_g
        h_new = (o_g * jnp.tanh(c_new)).astype(jnp.bfloat16)

        out_ref[li] = jnp.where(valid, h_new, jnp.zeros_like(h_new))   # zero past length
        h_next = jnp.where(valid, h_new, h)                            # freeze state
        c_next = jnp.where(valid, c_new, c_state)
        return (h_next, c_next)

    h_f, c_f = jax.lax.fori_loop(0, chunk, body, (h_scr[...], c_scr[...]),
                                 unroll=min(chunk, 8))
    h_scr[...] = h_f
    c_scr[...] = c_f


def _bilstm_recurrence_pallas(gates_x, whh_s, len_col, chunk):
    """gates_x: (2, Tp, B, 4Hp) bf16; whh_s: (2, Hp, 4Hp) bf16; len_col: (B, 1) int32.
    Returns per-direction hidden states (2, Tp, B, Hp) bf16."""
    _, Tp, B, G = gates_x.shape
    Hp = G // 4
    nc = Tp // chunk

    def chunk_sel(d, c):
        # forward walks chunks 0..nc-1, backward walks nc-1..0
        return (1 - d) * c + d * (nc - 1 - c)

    vmem_cap = _tpu_vmem_bytes()
    vmem_limit = min(int(0.85 * vmem_cap), 96 * 1024 * 1024)

    cost = pl.CostEstimate(
        flops=2 * Tp * 2 * B * Hp * G,                   # recurrent matmuls
        transcendentals=2 * Tp * B * 8 * Hp,             # sigmoid ~= exp+recip, tanh
        bytes_accessed=(gates_x.size * 2 + whh_s.size * 2 + len_col.size * 4
                        + 2 * Tp * B * Hp * 2),
    )

    kernel = functools.partial(_bilstm_recurrence_kernel, chunk=chunk, hidden=Hp)
    return pl.pallas_call(
        kernel,
        out_shape=jax.ShapeDtypeStruct((2, Tp, B, Hp), jnp.bfloat16),
        grid_spec=pltpu.PrefetchScalarGridSpec(
            num_scalar_prefetch=0,
            grid=(2, nc),
            in_specs=[
                pl.BlockSpec((None, chunk, B, G),
                             lambda d, c: (d, chunk_sel(d, c), 0, 0)),   # bf16 gates chunk
                pl.BlockSpec((None, Hp, G), lambda d, c: (d, 0, 0)),     # W_hh^T (resident)
                pl.BlockSpec((B, 1), lambda d, c: (0, 0)),               # lengths (fetched once)
            ],
            out_specs=pl.BlockSpec((None, chunk, B, Hp),
                                   lambda d, c: (d, chunk_sel(d, c), 0, 0)),
            scratch_shapes=[
                pltpu.VMEM((B, Hp), jnp.bfloat16),   # h state (MXU consumes bf16)
                pltpu.VMEM((B, Hp), jnp.float32),    # c state stays f32
            ],
        ),
        compiler_params=pltpu.CompilerParams(
            dimension_semantics=("parallel", "arbitrary"),
            vmem_limit_bytes=vmem_limit),
        cost_estimate=cost,
    )(gates_x, whh_s, len_col)


# ---------------------------------------------------------------------------
# Pure-JAX reference recurrence (lax.scan), mirrors the kernel's dtypes exactly.
# ---------------------------------------------------------------------------
def _bilstm_recurrence_ref(gates_x, whh_s, len_col, chunk=None):
    del chunk
    _, Tp, B, G = gates_x.shape
    Hp = G // 4
    t_idx = jnp.arange(Tp, dtype=jnp.int32)

    def one_direction(gx, whh, reverse):
        def step(carry, inp):
            h, c_state = carry
            g_x, t = inp
            valid = t < len_col                       # (B, 1) bool
            gates = g_x + jnp.dot(h, whh, preferred_element_type=jnp.float32)
            i_g = jax.nn.sigmoid(gates[:, 0 * Hp:1 * Hp])
            f_g = jax.nn.sigmoid(gates[:, 1 * Hp:2 * Hp])
            g_g = jnp.tanh(gates[:, 2 * Hp:3 * Hp])
            o_g = jax.nn.sigmoid(gates[:, 3 * Hp:4 * Hp])
            c_new = f_g * c_state + i_g * g_g
            h_new = (o_g * jnp.tanh(c_new)).astype(jnp.bfloat16)
            out = jnp.where(valid, h_new, jnp.zeros_like(h_new))
            return (jnp.where(valid, h_new, h),
                    jnp.where(valid, c_new, c_state)), out

        init = (jnp.zeros((B, Hp), jnp.bfloat16), jnp.zeros((B, Hp), jnp.float32))
        _, outs = jax.lax.scan(step, init, (gx, t_idx), reverse=reverse)
        return outs

    out_f = one_direction(gates_x[0], whh_s[0], reverse=False)
    out_b = one_direction(gates_x[1], whh_s[1], reverse=True)
    return jnp.stack([out_f, out_b], axis=0)


# ---------------------------------------------------------------------------
# Encoder orchestration (time-major between layers; transposes only at boundary).
# ---------------------------------------------------------------------------
def rnn_encoder_forward(x, lengths, params, num_layers, chunk=None, use_pallas=True):
    """x: (B, T, input_size) f32, lengths: (B,) int.
    Returns (B, T, 2*hidden_size) f32, zero past each sequence's length."""
    B0, T0, _ = x.shape
    H = params[(0, 0)][1].shape[1]          # W_hh: (4H, H)
    Hp = _round_up(H, 128)                  # lane-align hidden (gate slices / stores dense)
    B = _round_up(B0, 16)                   # bf16 sublane packing

    if chunk is None:
        chunk = _pick_chunk(B, Hp, _tpu_vmem_bytes(), _round_up(T0, 8))
    Tp = _round_up(T0, chunk)

    lengths = lengths.astype(jnp.int32)
    x_p = jnp.zeros((B, Tp, x.shape[2]), jnp.float32).at[:B0, :T0].set(
        x.astype(jnp.float32))
    len_col = jnp.zeros((B,), jnp.int32).at[:B0].set(lengths).reshape(B, 1)

    # one transpose at entry; everything stays time-major + bf16 until exit
    h_tm = jnp.transpose(x_p, (1, 0, 2)).astype(jnp.bfloat16)    # (Tp, B, Din)

    run = _bilstm_recurrence_pallas if use_pallas else _bilstm_recurrence_ref

    # TODO(synk): sort/unsort by length and pack/pad are functional no-ops here (masking
    # reproduces their semantics) and are omitted.
    for layer in range(num_layers):
        wih_l, whh_l, bias_l = [], [], []
        for d in range(2):
            wih, whh, bih, bhh = params[(layer, d)]
            wih = _pad_gate_rows(wih, H, Hp)
            if layer > 0:
                wih = _pad_bidir_cols(wih, H, Hp)        # input cols follow padded layout
            whh = _pad_last(_pad_gate_rows(whh, H, Hp), H, Hp)
            bias = _pad_gate_rows(bih + bhh, H, Hp)
            wih_l.append(wih)
            whh_l.append(whh)
            bias_l.append(bias)
        wih_s = jnp.stack(wih_l)      # (2, 4Hp, Din_layer)
        whh_s = jnp.stack(whh_l)      # (2, 4Hp, Hp)
        bias_s = jnp.stack(bias_l)    # (2, 4Hp)

        # Hoisted time-parallel input projection for BOTH directions: one big bf16 MXU
        # matmul over all (Tp*B) rows; result streamed to the kernel in bf16.
        gates_x = (jnp.einsum("tbd,kdg->ktbg", h_tm,
                              jnp.transpose(wih_s, (0, 2, 1)).astype(jnp.bfloat16),
                              preferred_element_type=jnp.float32)
                   + bias_s[:, None, None, :]).astype(jnp.bfloat16)   # (2, Tp, B, 4Hp)

        whh_k = jnp.transpose(whh_s, (0, 2, 1)).astype(jnp.bfloat16)  # (2, Hp, 4Hp)

        outs = run(gates_x, whh_k, len_col, chunk)                    # (2, Tp, B, Hp) bf16
        h_tm = jnp.concatenate([outs[0], outs[1]], axis=-1)           # (Tp, B, 2Hp) bf16
        # TODO(synk): inter-layer dropout omitted (drop_prob=0.0 / eval mode -> identity).

    out = jnp.transpose(h_tm, (1, 0, 2))[:B0, :T0]                    # (B0, T0, 2Hp)
    out = jnp.concatenate([out[..., :H], out[..., Hp:Hp + H]], axis=-1)
    return out.astype(jnp.float32)


# ---------------------------------------------------------------------------
# Deterministic parameter init (matches nn.LSTM shapes; U(-1/sqrt(H), 1/sqrt(H))).
# ---------------------------------------------------------------------------
def init_lstm_params(key, input_size, hidden_size, num_layers):
    params = {}
    k = 1.0 / jnp.sqrt(hidden_size)
    for layer in range(num_layers):
        d_in = input_size if layer == 0 else 2 * hidden_size
        for d in range(2):
            key, k1, k2, k3, k4 = jax.random.split(key, 5)
            wih = jax.random.uniform(k1, (4 * hidden_size, d_in), jnp.float32, -k, k)
            whh = jax.random.uniform(k2, (4 * hidden_size, hidden_size), jnp.float32, -k, k)
            bih = jax.random.uniform(k3, (4 * hidden_size,), jnp.float32, -k, k)
            bhh = jax.random.uniform(k4, (4 * hidden_size,), jnp.float32, -k, k)
            params[(layer, d)] = (wih, whh, bih, bhh)
    return params


if __name__ == "__main__":
    batch, seq_len = 4, 8
    input_size, hidden_size, num_layers = 16, 32, 2

    key = jax.random.PRNGKey(0)
    kx, kp = jax.random.split(key)
    x = jax.random.normal(kx, (batch, seq_len, input_size), jnp.float32)
    lengths = jnp.array([8, 5, 3, 7], dtype=jnp.int32)
    params = init_lstm_params(kp, input_size, hidden_size, num_layers)

    fwd = functools.partial(rnn_encoder_forward, params=params, num_layers=num_layers)

    out = jax.jit(lambda a, b: fwd(a, b, use_pallas=True))(x, lengths)
    out = jax.block_until_ready(out)

    ref = jax.jit(lambda a, b: fwd(a, b, use_pallas=False))(x, lengths)
    ref = jax.block_until_ready(ref)

    assert out.shape == (batch, seq_len, 2 * hidden_size), out.shape
    err = float(jnp.max(jnp.abs(out - ref)))
    assert err < 2e-2, err
    # padded positions must be exactly zero (pad_packed_sequence semantics)
    pad_mask = (jnp.arange(seq_len)[None, :] >= lengths[:, None])[:, :, None]
    assert float(jnp.max(jnp.abs(jnp.where(pad_mask, out, 0.0)))) == 0.0

    print("KERNEL_OK")
</pallas_src>

<mosaic_0001>
module attributes {stable_mosaic.version = 11 : i64} {
  func.func @_bilstm_recurrence_kernel(%arg0: i32, %arg1: i32, %arg2: memref<1x8x16x512xbf16, #tpu.memory_space<vmem>>, %arg3: memref<1x128x512xbf16, #tpu.memory_space<vmem>>, %arg4: memref<16x1xi32, #tpu.memory_space<vmem>>, %arg5: memref<1x8x16x128xbf16, #tpu.memory_space<vmem>>, %arg6: memref<16x128xbf16, #tpu.memory_space<vmem>>, %arg7: memref<16x128xf32, #tpu.memory_space<vmem>>) attributes {dimension_semantics = [#tpu.dimension_semantics<parallel>, #tpu.dimension_semantics<arbitrary>], iteration_bounds = array<i64: 2, 1>, scalar_prefetch = 0 : i64, scratch_operands = 2 : i64, tpu.core_type = #tpu.core_type<tc>, window_params = [{transform_indices = @transform_0, window_bounds = array<i64: 1, 8, 16, 512>}, {transform_indices = @transform_1, window_bounds = array<i64: 1, 128, 512>}, {pipeline_mode = #tpu.pipeline_mode<synchronous>, transform_indices = @transform_2, window_bounds = array<i64: 16, 1>}, {transform_indices = @transform_3, window_bounds = array<i64: 1, 8, 16, 128>}]} {
    %c0_i32 = arith.constant 0 : i32
    %0 = arith.cmpi eq, %arg1, %c0_i32 : i32
    %1 = arith.extui %0 : i1 to i32
    %c0_i32_0 = arith.constant 0 : i32
    %2 = arith.cmpi ne, %1, %c0_i32_0 : i32
    scf.if %2 {
      %cst_120 = arith.constant 0.000000e+00 : bf16
      %402 = vector.broadcast %cst_120 : bf16 to vector<16x128xbf16>
      %c0_121 = arith.constant 0 : index
      %c0_122 = arith.constant 0 : index
      %403 = vector.load %arg6[%c0_121, %c0_122] : memref<16x128xbf16, #tpu.memory_space<vmem>>, vector<16x128xbf16>
      tpu.vector_store %arg6[%c0_121, %c0_122], %402 {strides = array<i32>} : memref<16x128xbf16, #tpu.memory_space<vmem>>, vector<16x128xbf16>,
      %cst_123 = arith.constant 0.000000e+00 : f32
      %404 = vector.broadcast %cst_123 : f32 to vector<16x128xf32>
      %c0_124 = arith.constant 0 : index
      %c0_125 = arith.constant 0 : index
      %405 = vector.load %arg7[%c0_124, %c0_125] : memref<16x128xf32, #tpu.memory_space<vmem>>, vector<16x128xf32>
      tpu.vector_store %arg7[%c0_124, %c0_125], %404 {strides = array<i32>} : memref<16x128xf32, #tpu.memory_space<vmem>>, vector<16x128xf32>,
    } else {
    }
    %c0 = arith.constant 0 : index
    %c0_1 = arith.constant 0 : index
    %c0_2 = arith.constant 0 : index
    %3 = vector.load %arg3[%c0, %c0_1, %c0_2] : memref<1x128x512xbf16, #tpu.memory_space<vmem>>, vector<1x128x512xbf16>
    %4 = vector.shape_cast %3 : vector<1x128x512xbf16> to vector<128x512xbf16>
    %c0_3 = arith.constant 0 : index
    %c0_4 = arith.constant 0 : index
    %5 = vector.load %arg4[%c0_3, %c0_4] : memref<16x1xi32, #tpu.memory_space<vmem>>, vector<16x1xi32>
    %6 = vector.shape_cast %5 : vector<16x1xi32> to vector<16x1xi32>
    %7 = vector.broadcast %6 : vector<16x1xi32> to vector<16x128xi32>
    %c1_i32 = arith.constant 1 : i32
    %8 = arith.subi %c1_i32, %arg0 : i32
    %9 = arith.muli %8, %arg1 : i32
    %c0_i32_5 = arith.constant 0 : i32
    %10 = arith.subi %c0_i32_5, %arg1 : i32
    %11 = arith.muli %arg0, %10 : i32
    %12 = arith.addi %9, %11 : i32
    %c8_i32 = arith.constant 8 : i32
    %13 = arith.muli %12, %c8_i32 : i32
    %c0_6 = arith.constant 0 : index
    %c0_7 = arith.constant 0 : index
    %14 = vector.load %arg6[%c0_6, %c0_7] : memref<16x128xbf16, #tpu.memory_space<vmem>>, vector<16x128xbf16>
    %c0_8 = arith.constant 0 : index
    %c0_9 = arith.constant 0 : index
    %15 = vector.load %arg7[%c0_8, %c0_9] : memref<16x128xf32, #tpu.memory_space<vmem>>, vector<16x128xf32>
    %c0_i32_10 = arith.constant 0 : i32
    %c1_i32_11 = arith.constant 1 : i32
    %16 = arith.subi %c1_i32_11, %arg0 : i32
    %17 = arith.muli %16, %c0_i32_10 : i32
    %c7_i32 = arith.constant 7 : i32
    %18 = arith.subi %c7_i32, %c0_i32_10 : i32
    %19 = arith.muli %arg0, %18 : i32
    %20 = arith.addi %17, %19 : i32
    %c0_12 = arith.constant 0 : index
    %21 = arith.index_cast %20 : i32 to index
    %c0_13 = arith.constant 0 : index
    %c0_14 = arith.constant 0 : index
    %22 = vector.load %arg2[%c0_12, %21, %c0_13, %c0_14] : memref<1x8x16x512xbf16, #tpu.memory_space<vmem>>, vector<1x1x16x512xbf16>
    %23 = vector.shape_cast %22 : vector<1x1x16x512xbf16> to vector<16x512xbf16>
    %24 = arith.addi %13, %20 : i32
    %25 = vector.broadcast %24 : i32 to vector<16x128xi32>
    %26 = arith.cmpi slt, %25, %7 : vector<16x128xi32>
    %cst = arith.constant dense<0.000000e+00> : vector<16x512xf32>
    %27 = tpu.matmul %14, %4, %cst {dimension_numbers = #tpu.dot_dimension_numbers<[1], [0], [0], [1], [0, 0, 1, 1], [], []>} : vector<16x128xbf16>, vector<128x512xbf16>, vector<16x512xf32> -> vector<16x512xf32>
    %28 = arith.extf %23 : vector<16x512xbf16> to vector<16x512xf32>
    %29 = arith.addf %28, %27 : vector<16x512xf32>
    %30 = vector.extract_strided_slice %29 {offsets = [0, 0], sizes = [16, 128], strides = [1, 1]} : vector<16x512xf32> to vector<16x128xf32>
    %31 = arith.negf %30 : vector<16x128xf32>
    %32 = math.exp %31 : vector<16x128xf32>
    %cst_15 = arith.constant 1.000000e+00 : f32
    %33 = vector.broadcast %cst_15 : f32 to vector<16x128xf32>
    %34 = arith.addf %33, %32 : vector<16x128xf32>
    %35 = arith.divf %33, %34 : vector<16x128xf32>
    %36 = vector.extract_strided_slice %29 {offsets = [0, 128], sizes = [16, 128], strides = [1, 1]} : vector<16x512xf32> to vector<16x128xf32>
    %37 = arith.negf %36 : vector<16x128xf32>
    %38 = math.exp %37 : vector<16x128xf32>
    %cst_16 = arith.constant 1.000000e+00 : f32
    %39 = vector.broadcast %cst_16 : f32 to vector<16x128xf32>
    %40 = arith.addf %39, %38 : vector<16x128xf32>
    %41 = arith.divf %39, %40 : vector<16x128xf32>
    %42 = vector.extract_strided_slice %29 {offsets = [0, 256], sizes = [16, 128], strides = [1, 1]} : vector<16x512xf32> to vector<16x128xf32>
    %43 = math.tanh %42 : vector<16x128xf32>
    %44 = vector.extract_strided_slice %29 {offsets = [0, 384], sizes = [16, 128], strides = [1, 1]} : vector<16x512xf32> to vector<16x128xf32>
    %45 = arith.negf %44 : vector<16x128xf32>
    %46 = math.exp %45 : vector<16x128xf32>
    %cst_17 = arith.constant 1.000000e+00 : f32
    %47 = vector.broadcast %cst_17 : f32 to vector<16x128xf32>
    %48 = arith.addf %47, %46 : vector<16x128xf32>
    %49 = arith.divf %47, %48 : vector<16x128xf32>
    %50 = arith.mulf %41, %15 : vector<16x128xf32>
    %51 = arith.mulf %35, %43 : vector<16x128xf32>
    %52 = arith.addf %50, %51 : vector<16x128xf32>
    %53 = math.tanh %52 : vector<16x128xf32>
    %54 = arith.mulf %49, %53 : vector<16x128xf32>
    %55 = arith.truncf %54 : vector<16x128xf32> to vector<16x128xbf16>
    %cst_18 = arith.constant 0.000000e+00 : bf16
    %56 = vector.broadcast %cst_18 : bf16 to vector<16x128xbf16>
    %57 = arith.select %26, %55, %56 : vector<16x128xi1>, vector<16x128xbf16>
    %c0_19 = arith.constant 0 : index
    %58 = arith.index_cast %20 : i32 to index
    %c0_20 = arith.constant 0 : index
    %c0_21 = arith.constant 0 : index
    %59 = vector.load %arg5[%c0_19, %58, %c0_20, %c0_21] : memref<1x8x16x128xbf16, #tpu.memory_space<vmem>>, vector<1x1x16x128xbf16>
    %60 = vector.shape_cast %59 : vector<1x1x16x128xbf16> to vector<16x128xbf16>
    %61 = vector.shape_cast %57 : vector<16x128xbf16> to vector<1x1x16x128xbf16>
    tpu.vector_store %arg5[%c0_19, %58, %c0_20, %c0_21], %61 {strides = array<i32>} : memref<1x8x16x128xbf16, #tpu.memory_space<vmem>>, vector<1x1x16x128xbf16>,
    %62 = arith.select %26, %55, %14 : vector<16x128xi1>, vector<16x128xbf16>
    %63 = arith.select %26, %52, %15 : vector<16x128xi1>, vector<16x128xf32>
    %c1_i32_22 = arith.constant 1 : i32
    %c1_i32_23 = arith.constant 1 : i32
    %64 = arith.subi %c1_i32_23, %arg0 : i32
    %65 = arith.muli %64, %c1_i32_22 : i32
    %c7_i32_24 = arith.constant 7 : i32
    %66 = arith.subi %c7_i32_24, %c1_i32_22 : i32
    %67 = arith.muli %arg0, %66 : i32
    %68 = arith.addi %65, %67 : i32
    %c0_25 = arith.constant 0 : index
    %69 = arith.index_cast %68 : i32 to index
    %c0_26 = arith.constant 0 : index
    %c0_27 = arith.constant 0 : index
    %70 = vector.load %arg2[%c0_25, %69, %c0_26, %c0_27] : memref<1x8x16x512xbf16, #tpu.memory_space<vmem>>, vector<1x1x16x512xbf16>
    %71 = vector.shape_cast %70 : vector<1x1x16x512xbf16> to vector<16x512xbf16>
    %72 = arith.addi %13, %68 : i32
    %73 = vector.broadcast %72 : i32 to vector<16x128xi32>
    %74 = arith.cmpi slt, %73, %7 : vector<16x128xi32>
    %cst_28 = arith.constant dense<0.000000e+00> : vector<16x512xf32>
    %75 = tpu.matmul %62, %4, %cst_28 {dimension_numbers = #tpu.dot_dimension_numbers<[1], [0], [0], [1], [0, 0, 1, 1], [], []>} : vector<16x128xbf16>, vector<128x512xbf16>, vector<16x512xf32> -> vector<16x512xf32>
    %76 = arith.extf %71 : vector<16x512xbf16> to vector<16x512xf32>
    %77 = arith.addf %76, %75 : vector<16x512xf32>
    %78 = vector.extract_strided_slice %77 {offsets = [0, 0], sizes = [16, 128], strides = [1, 1]} : vector<16x512xf32> to vector<16x128xf32>
    %79 = arith.negf %78 : vector<16x128xf32>
    %80 = math.exp %79 : vector<16x128xf32>
    %cst_29 = arith.constant 1.000000e+00 : f32
    %81 = vector.broadcast %cst_29 : f32 to vector<16x128xf32>
    %82 = arith.addf %81, %80 : vector<16x128xf32>
    %83 = arith.divf %81, %82 : vector<16x128xf32>
    %84 = vector.extract_strided_slice %77 {offsets = [0, 128], sizes = [16, 128], strides = [1, 1]} : vector<16x512xf32> to vector<16x128xf32>
    %85 = arith.negf %84 : vector<16x128xf32>
    %86 = math.exp %85 : vector<16x128xf32>
    %cst_30 = arith.constant 1.000000e+00 : f32
    %87 = vector.broadcast %cst_30 : f32 to vector<16x128xf32>
    %88 = arith.addf %87, %86 : vector<16x128xf32>
    %89 = arith.divf %87, %88 : vector<16x128xf32>
    %90 = vector.extract_strided_slice %77 {offsets = [0, 256], sizes = [16, 128], strides = [1, 1]} : vector<16x512xf32> to vector<16x128xf32>
    %91 = math.tanh %90 : vector<16x128xf32>
    %92 = vector.extract_strided_slice %77 {offsets = [0, 384], sizes = [16, 128], strides = [1, 1]} : vector<16x512xf32> to vector<16x128xf32>
    %93 = arith.negf %92 : vector<16x128xf32>
    %94 = math.exp %93 : vector<16x128xf32>
    %cst_31 = arith.constant 1.000000e+00 : f32
    %95 = vector.broadcast %cst_31 : f32 to vector<16x128xf32>
    %96 = arith.addf %95, %94 : vector<16x128xf32>
    %97 = arith.divf %95, %96 : vector<16x128xf32>
    %98 = arith.mulf %89, %63 : vector<16x128xf32>
    %99 = arith.mulf %83, %91 : vector<16x128xf32>
    %100 = arith.addf %98, %99 : vector<16x128xf32>
    %101 = math.tanh %100 : vector<16x128xf32>
    %102 = arith.mulf %97, %101 : vector<16x128xf32>
    %103 = arith.truncf %102 : vector<16x128xf32> to vector<16x128xbf16>
    %cst_32 = arith.constant 0.000000e+00 : bf16
    %104 = vector.broadcast %cst_32 : bf16 to vector<16x128xbf16>
    %105 = arith.select %74, %103, %104 : vector<16x128xi1>, vector<16x128xbf16>
    %c0_33 = arith.constant 0 : index
    %106 = arith.index_cast %68 : i32 to index
    %c0_34 = arith.constant 0 : index
    %c0_35 = arith.constant 0 : index
    %107 = vector.load %arg5[%c0_33, %106, %c0_34, %c0_35] : memref<1x8x16x128xbf16, #tpu.memory_space<vmem>>, vector<1x1x16x128xbf16>
    %108 = vector.shape_cast %107 : vector<1x1x16x128xbf16> to vector<16x128xbf16>
    %109 = vector.shape_cast %105 : vector<16x128xbf16> to vector<1x1x16x128xbf16>
    tpu.vector_store %arg5[%c0_33, %106, %c0_34, %c0_35], %109 {strides = array<i32>} : memref<1x8x16x128xbf16, #tpu.memory_space<vmem>>, vector<1x1x16x128xbf16>,
    %110 = arith.select %74, %103, %62 : vector<16x128xi1>, vector<16x128xbf16>
    %111 = arith.select %74, %100, %63 : vector<16x128xi1>, vector<16x128xf32>
    %c2_i32 = arith.constant 2 : i32
    %c1_i32_36 = arith.constant 1 : i32
    %112 = arith.subi %c1_i32_36, %arg0 : i32
    %113 = arith.muli %112, %c2_i32 : i32
    %c7_i32_37 = arith.constant 7 : i32
    %114 = arith.subi %c7_i32_37, %c2_i32 : i32
    %115 = arith.muli %arg0, %114 : i32
    %116 = arith.addi %113, %115 : i32
    %c0_38 = arith.constant 0 : index
    %117 = arith.index_cast %116 : i32 to index
    %c0_39 = arith.constant 0 : index
    %c0_40 = arith.constant 0 : index
    %118 = vector.load %arg2[%c0_38, %117, %c0_39, %c0_40] : memref<1x8x16x512xbf16, #tpu.memory_space<vmem>>, vector<1x1x16x512xbf16>
    %119 = vector.shape_cast %118 : vector<1x1x16x512xbf16> to vector<16x512xbf16>
    %120 = arith.addi %13, %116 : i32
    %121 = vector.broadcast %120 : i32 to vector<16x128xi32>
    %122 = arith.cmpi slt, %121, %7 : vector<16x128xi32>
    %cst_41 = arith.constant dense<0.000000e+00> : vector<16x512xf32>
    %123 = tpu.matmul %110, %4, %cst_41 {dimension_numbers = #tpu.dot_dimension_numbers<[1], [0], [0], [1], [0, 0, 1, 1], [], []>} : vector<16x128xbf16>, vector<128x512xbf16>, vector<16x512xf32> -> vector<16x512xf32>
    %124 = arith.extf %119 : vector<16x512xbf16> to vector<16x512xf32>
    %125 = arith.addf %124, %123 : vector<16x512xf32>
    %126 = vector.extract_strided_slice %125 {offsets = [0, 0], sizes = [16, 128], strides = [1, 1]} : vector<16x512xf32> to vector<16x128xf32>
    %127 = arith.negf %126 : vector<16x128xf32>
    %128 = math.exp %127 : vector<16x128xf32>
    %cst_42 = arith.constant 1.000000e+00 : f32
    %129 = vector.broadcast %cst_42 : f32 to vector<16x128xf32>
    %130 = arith.addf %129, %128 : vector<16x128xf32>
    %131 = arith.divf %129, %130 : vector<16x128xf32>
    %132 = vector.extract_strided_slice %125 {offsets = [0, 128], sizes = [16, 128], strides = [1, 1]} : vector<16x512xf32> to vector<16x128xf32>
    %133 = arith.negf %132 : vector<16x128xf32>
    %134 = math.exp %133 : vector<16x128xf32>
    %cst_43 = arith.constant 1.000000e+00 : f32
    %135 = vector.broadcast %cst_43 : f32 to vector<16x128xf32>
    %136 = arith.addf %135, %134 : vector<16x128xf32>
    %137 = arith.divf %135, %136 : vector<16x128xf32>
    %138 = vector.extract_strided_slice %125 {offsets = [0, 256], sizes = [16, 128], strides = [1, 1]} : vector<16x512xf32> to vector<16x128xf32>
    %139 = math.tanh %138 : vector<16x128xf32>
    %140 = vector.extract_strided_slice %125 {offsets = [0, 384], sizes = [16, 128], strides = [1, 1]} : vector<16x512xf32> to vector<16x128xf32>
    %141 = arith.negf %140 : vector<16x128xf32>
    %142 = math.exp %141 : vector<16x128xf32>
    %cst_44 = arith.constant 1.000000e+00 : f32
    %143 = vector.broadcast %cst_44 : f32 to vector<16x128xf32>
    %144 = arith.addf %143, %142 : vector<16x128xf32>
    %145 = arith.divf %143, %144 : vector<16x128xf32>
    %146 = arith.mulf %137, %111 : vector<16x128xf32>
    %147 = arith.mulf %131, %139 : vector<16x128xf32>
    %148 = arith.addf %146, %147 : vector<16x128xf32>
    %149 = math.tanh %148 : vector<16x128xf32>
    %150 = arith.mulf %145, %149 : vector<16x128xf32>
    %151 = arith.truncf %150 : vector<16x128xf32> to vector<16x128xbf16>
    %cst_45 = arith.constant 0.000000e+00 : bf16
    %152 = vector.broadcast %cst_45 : bf16 to vector<16x128xbf16>
    %153 = arith.select %122, %151, %152 : vector<16x128xi1>, vector<16x128xbf16>
    %c0_46 = arith.constant 0 : index
    %154 = arith.index_cast %116 : i32 to index
    %c0_47 = arith.constant 0 : index
    %c0_48 = arith.constant 0 : index
    %155 = vector.load %arg5[%c0_46, %154, %c0_47, %c0_48] : memref<1x8x16x128xbf16, #tpu.memory_space<vmem>>, vector<1x1x16x128xbf16>
    %156 = vector.shape_cast %155 : vector<1x1x16x128xbf16> to vector<16x128xbf16>
    %157 = vector.shape_cast %153 : vector<16x128xbf16> to vector<1x1x16x128xbf16>
    tpu.vector_store %arg5[%c0_46, %154, %c0_47, %c0_48], %157 {strides = array<i32>} : memref<1x8x16x128xbf16, #tpu.memory_space<vmem>>, vector<1x1x16x128xbf16>,
    %158 = arith.select %122, %151, %110 : vector<16x128xi1>, vector<16x128xbf16>
    %159 = arith.select %122, %148, %111 : vector<16x128xi1>, vector<16x128xf32>
    %c3_i32 = arith.constant 3 : i32
    %c1_i32_49 = arith.constant 1 : i32
    %160 = arith.subi %c1_i32_49, %arg0 : i32
    %161 = arith.muli %160, %c3_i32 : i32
    %c7_i32_50 = arith.constant 7 : i32
    %162 = arith.subi %c7_i32_50, %c3_i32 : i32
    %163 = arith.muli %arg0, %162 : i32
    %164 = arith.addi %161, %163 : i32
    %c0_51 = arith.constant 0 : index
    %165 = arith.index_cast %164 : i32 to index
    %c0_52 = arith.constant 0 : index
    %c0_53 = arith.constant 0 : index
    %166 = vector.load %arg2[%c0_51, %165, %c0_52, %c0_53] : memref<1x8x16x512xbf16, #tpu.memory_space<vmem>>, vector<1x1x16x512xbf16>
    %167 = vector.shape_cast %166 : vector<1x1x16x512xbf16> to vector<16x512xbf16>
    %168 = arith.addi %13, %164 : i32
    %169 = vector.broadcast %168 : i32 to vector<16x128xi32>
    %170 = arith.cmpi slt, %169, %7 : vector<16x128xi32>
    %cst_54 = arith.constant dense<0.000000e+00> : vector<16x512xf32>
    %171 = tpu.matmul %158, %4, %cst_54 {dimension_numbers = #tpu.dot_dimension_numbers<[1], [0], [0], [1], [0, 0, 1, 1], [], []>} : vector<16x128xbf16>, vector<128x512xbf16>, vector<16x512xf32> -> vector<16x512xf32>
    %172 = arith.extf %167 : vector<16x512xbf16> to vector<16x512xf32>
    %173 = arith.addf %172, %171 : vector<16x512xf32>
    %174 = vector.extract_strided_slice %173 {offsets = [0, 0], sizes = [16, 128], strides = [1, 1]} : vector<16x512xf32> to vector<16x128xf32>
    %175 = arith.negf %174 : vector<16x128xf32>
    %176 = math.exp %175 : vector<16x128xf32>
    %cst_55 = arith.constant 1.000000e+00 : f32
    %177 = vector.broadcast %cst_55 : f32 to vector<16x128xf32>
    %178 = arith.addf %177, %176 : vector<16x128xf32>
    %179 = arith.divf %177, %178 : vector<16x128xf32>
    %180 = vector.extract_strided_slice %173 {offsets = [0, 128], sizes = [16, 128], strides = [1, 1]} : vector<16x512xf32> to vector<16x128xf32>
    %181 = arith.negf %180 : vector<16x128xf32>
    %182 = math.exp %181 : vector<16x128xf32>
    %cst_56 = arith.constant 1.000000e+00 : f32
    %183 = vector.broadcast %cst_56 : f32 to vector<16x128xf32>
    %184 = arith.addf %183, %182 : vector<16x128xf32>
    %185 = arith.divf %183, %184 : vector<16x128xf32>
    %186 = vector.extract_strided_slice %173 {offsets = [0, 256], sizes = [16, 128], strides = [1, 1]} : vector<16x512xf32> to vector<16x128xf32>
    %187 = math.tanh %186 : vector<16x128xf32>
    %188 = vector.extract_strided_slice %173 {offsets = [0, 384], sizes = [16, 128], strides = [1, 1]} : vector<16x512xf32> to vector<16x128xf32>
    %189 = arith.negf %188 : vector<16x128xf32>
    %190 = math.exp %189 : vector<16x128xf32>
    %cst_57 = arith.constant 1.000000e+00 : f32
    %191 = vector.broadcast %cst_57 : f32 to vector<16x128xf32>
    %192 = arith.addf %191, %190 : vector<16x128xf32>
    %193 = arith.divf %191, %192 : vector<16x128xf32>
    %194 = arith.mulf %185, %159 : vector<16x128xf32>
    %195 = arith.mulf %179, %187 : vector<16x128xf32>
    %196 = arith.addf %194, %195 : vector<16x128xf32>
    %197 = math.tanh %196 : vector<16x128xf32>
    %198 = arith.mulf %193, %197 : vector<16x128xf32>
    %199 = arith.truncf %198 : vector<16x128xf32> to vector<16x128xbf16>
    %cst_58 = arith.constant 0.000000e+00 : bf16
    %200 = vector.broadcast %cst_58 : bf16 to vector<16x128xbf16>
    %201 = arith.select %170, %199, %200 : vector<16x128xi1>, vector<16x128xbf16>
    %c0_59 = arith.constant 0 : index
    %202 = arith.index_cast %164 : i32 to index
    %c0_60 = arith.constant 0 : index
    %c0_61 = arith.constant 0 : index
    %203 = vector.load %arg5[%c0_59, %202, %c0_60, %c0_61] : memref<1x8x16x128xbf16, #tpu.memory_space<vmem>>, vector<1x1x16x128xbf16>
    %204 = vector.shape_cast %203 : vector<1x1x16x128xbf16> to vector<16x128xbf16>
    %205 = vector.shape_cast %201 : vector<16x128xbf16> to vector<1x1x16x128xbf16>
    tpu.vector_store %arg5[%c0_59, %202, %c0_60, %c0_61], %205 {strides = array<i32>} : memref<1x8x16x128xbf16, #tpu.memory_space<vmem>>, vector<1x1x16x128xbf16>,
    %206 = arith.select %170, %199, %158 : vector<16x128xi1>, vector<16x128xbf16>
    %207 = arith.select %170, %196, %159 : vector<16x128xi1>, vector<16x128xf32>
    %c4_i32 = arith.constant 4 : i32
    %c1_i32_62 = arith.constant 1 : i32
    %208 = arith.subi %c1_i32_62, %arg0 : i32
    %209 = arith.muli %208, %c4_i32 : i32
    %c7_i32_63 = arith.constant 7 : i32
    %210 = arith.subi %c7_i32_63, %c4_i32 : i32
    %211 = arith.muli %arg0, %210 : i32
    %212 = arith.addi %209, %211 : i32
    %c0_64 = arith.constant 0 : index
    %213 = arith.index_cast %212 : i32 to index
    %c0_65 = arith.constant 0 : index
    %c0_66 = arith.constant 0 : index
    %214 = vector.load %arg2[%c0_64, %213, %c0_65, %c0_66] : memref<1x8x16x512xbf16, #tpu.memory_space<vmem>>, vector<1x1x16x512xbf16>
    %215 = vector.shape_cast %214 : vector<1x1x16x512xbf16> to vector<16x512xbf16>
    %216 = arith.addi %13, %212 : i32
    %217 = vector.broadcast %216 : i32 to vector<16x128xi32>
    %218 = arith.cmpi slt, %217, %7 : vector<16x128xi32>
    %cst_67 = arith.constant dense<0.000000e+00> : vector<16x512xf32>
    %219 = tpu.matmul %206, %4, %cst_67 {dimension_numbers = #tpu.dot_dimension_numbers<[1], [0], [0], [1], [0, 0, 1, 1], [], []>} : vector<16x128xbf16>, vector<128x512xbf16>, vector<16x512xf32> -> vector<16x512xf32>
    %220 = arith.extf %215 : vector<16x512xbf16> to vector<16x512xf32>
    %221 = arith.addf %220, %219 : vector<16x512xf32>
    %222 = vector.extract_strided_slice %221 {offsets = [0, 0], sizes = [16, 128], strides = [1, 1]} : vector<16x512xf32> to vector<16x128xf32>
    %223 = arith.negf %222 : vector<16x128xf32>
    %224 = math.exp %223 : vector<16x128xf32>
    %cst_68 = arith.constant 1.000000e+00 : f32
    %225 = vector.broadcast %cst_68 : f32 to vector<16x128xf32>
    %226 = arith.addf %225, %224 : vector<16x128xf32>
    %227 = arith.divf %225, %226 : vector<16x128xf32>
    %228 = vector.extract_strided_slice %221 {offsets = [0, 128], sizes = [16, 128], strides = [1, 1]} : vector<16x512xf32> to vector<16x128xf32>
    %229 = arith.negf %228 : vector<16x128xf32>
    %230 = math.exp %229 : vector<16x128xf32>
    %cst_69 = arith.constant 1.000000e+00 : f32
    %231 = vector.broadcast %cst_69 : f32 to vector<16x128xf32>
    %232 = arith.addf %231, %230 : vector<16x128xf32>
    %233 = arith.divf %231, %232 : vector<16x128xf32>
    %234 = vector.extract_strided_slice %221 {offsets = [0, 256], sizes = [16, 128], strides = [1, 1]} : vector<16x512xf32> to vector<16x128xf32>
    %235 = math.tanh %234 : vector<16x128xf32>
    %236 = vector.extract_strided_slice %221 {offsets = [0, 384], sizes = [16, 128], strides = [1, 1]} : vector<16x512xf32> to vector<16x128xf32>
    %237 = arith.negf %236 : vector<16x128xf32>
    %238 = math.exp %237 : vector<16x128xf32>
    %cst_70 = arith.constant 1.000000e+00 : f32
    %239 = vector.broadcast %cst_70 : f32 to vector<16x128xf32>
    %240 = arith.addf %239, %238 : vector<16x128xf32>
    %241 = arith.divf %239, %240 : vector<16x128xf32>
    %242 = arith.mulf %233, %207 : vector<16x128xf32>
    %243 = arith.mulf %227, %235 : vector<16x128xf32>
    %244 = arith.addf %242, %243 : vector<16x128xf32>
    %245 = math.tanh %244 : vector<16x128xf32>
    %246 = arith.mulf %241, %245 : vector<16x128xf32>
    %247 = arith.truncf %246 : vector<16x128xf32> to vector<16x128xbf16>
    %cst_71 = arith.constant 0.000000e+00 : bf16
    %248 = vector.broadcast %cst_71 : bf16 to vector<16x128xbf16>
    %249 = arith.select %218, %247, %248 : vector<16x128xi1>, vector<16x128xbf16>
    %c0_72 = arith.constant 0 : index
    %250 = arith.index_cast %212 : i32 to index
    %c0_73 = arith.constant 0 : index
    %c0_74 = arith.constant 0 : index
    %251 = vector.load %arg5[%c0_72, %250, %c0_73, %c0_74] : memref<1x8x16x128xbf16, #tpu.memory_space<vmem>>, vector<1x1x16x128xbf16>
    %252 = vector.shape_cast %251 : vector<1x1x16x128xbf16> to vector<16x128xbf16>
    %253 = vector.shape_cast %249 : vector<16x128xbf16> to vector<1x1x16x128xbf16>
    tpu.vector_store %arg5[%c0_72, %250, %c0_73, %c0_74], %253 {strides = array<i32>} : memref<1x8x16x128xbf16, #tpu.memory_space<vmem>>, vector<1x1x16x128xbf16>,
    %254 = arith.select %218, %247, %206 : vector<16x128xi1>, vector<16x128xbf16>
    %255 = arith.select %218, %244, %207 : vector<16x128xi1>, vector<16x128xf32>
    %c5_i32 = arith.constant 5 : i32
    %c1_i32_75 = arith.constant 1 : i32
    %256 = arith.subi %c1_i32_75, %arg0 : i32
    %257 = arith.muli %256, %c5_i32 : i32
    %c7_i32_76 = arith.constant 7 : i32
    %258 = arith.subi %c7_i32_76, %c5_i32 : i32
    %259 = arith.muli %arg0, %258 : i32
    %260 = arith.addi %257, %259 : i32
    %c0_77 = arith.constant 0 : index
    %261 = arith.index_cast %260 : i32 to index
    %c0_78 = arith.constant 0 : index
    %c0_79 = arith.constant 0 : index
    %262 = vector.load %arg2[%c0_77, %261, %c0_78, %c0_79] : memref<1x8x16x512xbf16, #tpu.memory_space<vmem>>, vector<1x1x16x512xbf16>
    %263 = vector.shape_cast %262 : vector<1x1x16x512xbf16> to vector<16x512xbf16>
    %264 = arith.addi %13, %260 : i32
    %265 = vector.broadcast %264 : i32 to vector<16x128xi32>
    %266 = arith.cmpi slt, %265, %7 : vector<16x128xi32>
    %cst_80 = arith.constant dense<0.000000e+00> : vector<16x512xf32>
    %267 = tpu.matmul %254, %4, %cst_80 {dimension_numbers = #tpu.dot_dimension_numbers<[1], [0], [0], [1], [0, 0, 1, 1], [], []>} : vector<16x128xbf16>, vector<128x512xbf16>, vector<16x512xf32> -> vector<16x512xf32>
    %268 = arith.extf %263 : vector<16x512xbf16> to vector<16x512xf32>
    %269 = arith.addf %268, %267 : vector<16x512xf32>
    %270 = vector.extract_strided_slice %269 {offsets = [0, 0], sizes = [16, 128], strides = [1, 1]} : vector<16x512xf32> to vector<16x128xf32>
    %271 = arith.negf %270 : vector<16x128xf32>
    %272 = math.exp %271 : vector<16x128xf32>
    %cst_81 = arith.constant 1.000000e+00 : f32
    %273 = vector.broadcast %cst_81 : f32 to vector<16x128xf32>
    %274 = arith.addf %273, %272 : vector<16x128xf32>
    %275 = arith.divf %273, %274 : vector<16x128xf32>
    %276 = vector.extract_strided_slice %269 {offsets = [0, 128], sizes = [16, 128], strides = [1, 1]} : vector<16x512xf32> to vector<16x128xf32>
    %277 = arith.negf %276 : vector<16x128xf32>
    %278 = math.exp %277 : vector<16x128xf32>
    %cst_82 = arith.constant 1.000000e+00 : f32
    %279 = vector.broadcast %cst_82 : f32 to vector<16x128xf32>
    %280 = arith.addf %279, %278 : vector<16x128xf32>
    %281 = arith.divf %279, %280 : vector<16x128xf32>
    %282 = vector.extract_strided_slice %269 {offsets = [0, 256], sizes = [16, 128], strides = [1, 1]} : vector<16x512xf32> to vector<16x128xf32>
    %283 = math.tanh %282 : vector<16x128xf32>
    %284 = vector.extract_strided_slice %269 {offsets = [0, 384], sizes = [16, 128], strides = [1, 1]} : vector<16x512xf32> to vector<16x128xf32>
    %285 = arith.negf %284 : vector<16x128xf32>
    %286 = math.exp %285 : vector<16x128xf32>
    %cst_83 = arith.constant 1.000000e+00 : f32
    %287 = vector.broadcast %cst_83 : f32 to vector<16x128xf32>
    %288 = arith.addf %287, %286 : vector<16x128xf32>
    %289 = arith.divf %287, %288 : vector<16x128xf32>
    %290 = arith.mulf %281, %255 : vector<16x128xf32>
    %291 = arith.mulf %275, %283 : vector<16x128xf32>
    %292 = arith.addf %290, %291 : vector<16x128xf32>
    %293 = math.tanh %292 : vector<16x128xf32>
    %294 = arith.mulf %289, %293 : vector<16x128xf32>
    %295 = arith.truncf %294 : vector<16x128xf32> to vector<16x128xbf16>
    %cst_84 = arith.constant 0.000000e+00 : bf16
    %296 = vector.broadcast %cst_84 : bf16 to vector<16x128xbf16>
    %297 = arith.select %266, %295, %296 : vector<16x128xi1>, vector<16x128xbf16>
    %c0_85 = arith.constant 0 : index
    %298 = arith.index_cast %260 : i32 to index
    %c0_86 = arith.constant 0 : index
    %c0_87 = arith.constant 0 : index
    %299 = vector.load %arg5[%c0_85, %298, %c0_86, %c0_87] : memref<1x8x16x128xbf16, #tpu.memory_space<vmem>>, vector<1x1x16x128xbf16>
    %300 = vector.shape_cast %299 : vector<1x1x16x128xbf16> to vector<16x128xbf16>
    %301 = vector.shape_cast %297 : vector<16x128xbf16> to vector<1x1x16x128xbf16>
    tpu.vector_store %arg5[%c0_85, %298, %c0_86, %c0_87], %301 {strides = array<i32>} : memref<1x8x16x128xbf16, #tpu.memory_space<vmem>>, vector<1x1x16x128xbf16>,
    %302 = arith.select %266, %295, %254 : vector<16x128xi1>, vector<16x128xbf16>
    %303 = arith.select %266, %292, %255 : vector<16x128xi1>, vector<16x128xf32>
    %c6_i32 = arith.constant 6 : i32
    %c1_i32_88 = arith.constant 1 : i32
    %304 = arith.subi %c1_i32_88, %arg0 : i32
    %305 = arith.muli %304, %c6_i32 : i32
    %c7_i32_89 = arith.constant 7 : i32
    %306 = arith.subi %c7_i32_89, %c6_i32 : i32
    %307 = arith.muli %arg0, %306 : i32
    %308 = arith.addi %305, %307 : i32
    %c0_90 = arith.constant 0 : index
    %309 = arith.index_cast %308 : i32 to index
    %c0_91 = arith.constant 0 : index
    %c0_92 = arith.constant 0 : index
    %310 = vector.load %arg2[%c0_90, %309, %c0_91, %c0_92] : memref<1x8x16x512xbf16, #tpu.memory_space<vmem>>, vector<1x1x16x512xbf16>
    %311 = vector.shape_cast %310 : vector<1x1x16x512xbf16> to vector<16x512xbf16>
    %312 = arith.addi %13, %308 : i32
    %313 = vector.broadcast %312 : i32 to vector<16x128xi32>
    %314 = arith.cmpi slt, %313, %7 : vector<16x128xi32>
    %cst_93 = arith.constant dense<0.000000e+00> : vector<16x512xf32>
    %315 = tpu.matmul %302, %4, %cst_93 {dimension_numbers = #tpu.dot_dimension_numbers<[1], [0], [0], [1], [0, 0, 1, 1], [], []>} : vector<16x128xbf16>, vector<128x512xbf16>, vector<16x512xf32> -> vector<16x512xf32>
    %316 = arith.extf %311 : vector<16x512xbf16> to vector<16x512xf32>
    %317 = arith.addf %316, %315 : vector<16x512xf32>
    %318 = vector.extract_strided_slice %317 {offsets = [0, 0], sizes = [16, 128], strides = [1, 1]} : vector<16x512xf32> to vector<16x128xf32>
    %319 = arith.negf %318 : vector<16x128xf32>
    %320 = math.exp %319 : vector<16x128xf32>
    %cst_94 = arith.constant 1.000000e+00 : f32
    %321 = vector.broadcast %cst_94 : f32 to vector<16x128xf32>
    %322 = arith.addf %321, %320 : vector<16x128xf32>
    %323 = arith.divf %321, %322 : vector<16x128xf32>
    %324 = vector.extract_strided_slice %317 {offsets = [0, 128], sizes = [16, 128], strides = [1, 1]} : vector<16x512xf32> to vector<16x128xf32>
    %325 = arith.negf %324 : vector<16x128xf32>
    %326 = math.exp %325 : vector<16x128xf32>
    %cst_95 = arith.constant 1.000000e+00 : f32
    %327 = vector.broadcast %cst_95 : f32 to vector<16x128xf32>
    %328 = arith.addf %327, %326 : vector<16x128xf32>
    %329 = arith.divf %327, %328 : vector<16x128xf32>
    %330 = vector.extract_strided_slice %317 {offsets = [0, 256], sizes = [16, 128], strides = [1, 1]} : vector<16x512xf32> to vector<16x128xf32>
    %331 = math.tanh %330 : vector<16x128xf32>
    %332 = vector.extract_strided_slice %317 {offsets = [0, 384], sizes = [16, 128], strides = [1, 1]} : vector<16x512xf32> to vector<16x128xf32>
    %333 = arith.negf %332 : vector<16x128xf32>
    %334 = math.exp %333 : vector<16x128xf32>
    %cst_96 = arith.constant 1.000000e+00 : f32
    %335 = vector.broadcast %cst_96 : f32 to vector<16x128xf32>
    %336 = arith.addf %335, %334 : vector<16x128xf32>
    %337 = arith.divf %335, %336 : vector<16x128xf32>
    %338 = arith.mulf %329, %303 : vector<16x128xf32>
    %339 = arith.mulf %323, %331 : vector<16x128xf32>
    %340 = arith.addf %338, %339 : vector<16x128xf32>
    %341 = math.tanh %340 : vector<16x128xf32>
    %342 = arith.mulf %337, %341 : vector<16x128xf32>
    %343 = arith.truncf %342 : vector<16x128xf32> to vector<16x128xbf16>
    %cst_97 = arith.constant 0.000000e+00 : bf16
    %344 = vector.broadcast %cst_97 : bf16 to vector<16x128xbf16>
    %345 = arith.select %314, %343, %344 : vector<16x128xi1>, vector<16x128xbf16>
    %c0_98 = arith.constant 0 : index
    %346 = arith.index_cast %308 : i32 to index
    %c0_99 = arith.constant 0 : index
    %c0_100 = arith.constant 0 : index
    %347 = vector.load %arg5[%c0_98, %346, %c0_99, %c0_100] : memref<1x8x16x128xbf16, #tpu.memory_space<vmem>>, vector<1x1x16x128xbf16>
    %348 = vector.shape_cast %347 : vector<1x1x16x128xbf16> to vector<16x128xbf16>
    %349 = vector.shape_cast %345 : vector<16x128xbf16> to vector<1x1x16x128xbf16>
    tpu.vector_store %arg5[%c0_98, %346, %c0_99, %c0_100], %349 {strides = array<i32>} : memref<1x8x16x128xbf16, #tpu.memory_space<vmem>>, vector<1x1x16x128xbf16>,
    %350 = arith.select %314, %343, %302 : vector<16x128xi1>, vector<16x128xbf16>
    %351 = arith.select %314, %340, %303 : vector<16x128xi1>, vector<16x128xf32>
    %c7_i32_101 = arith.constant 7 : i32
    %c1_i32_102 = arith.constant 1 : i32
    %352 = arith.subi %c1_i32_102, %arg0 : i32
    %353 = arith.muli %352, %c7_i32_101 : i32
    %c7_i32_103 = arith.constant 7 : i32
    %354 = arith.subi %c7_i32_103, %c7_i32_101 : i32
    %355 = arith.muli %arg0, %354 : i32
    %356 = arith.addi %353, %355 : i32
    %c0_104 = arith.constant 0 : index
    %357 = arith.index_cast %356 : i32 to index
    %c0_105 = arith.constant 0 : index
    %c0_106 = arith.constant 0 : index
    %358 = vector.load %arg2[%c0_104, %357, %c0_105, %c0_106] : memref<1x8x16x512xbf16, #tpu.memory_space<vmem>>, vector<1x1x16x512xbf16>
    %359 = vector.shape_cast %358 : vector<1x1x16x512xbf16> to vector<16x512xbf16>
    %360 = arith.addi %13, %356 : i32
    %361 = vector.broadcast %360 : i32 to vector<16x128xi32>
    %362 = arith.cmpi slt, %361, %7 : vector<16x128xi32>
    %cst_107 = arith.constant dense<0.000000e+00> : vector<16x512xf32>
    %363 = tpu.matmul %350, %4, %cst_107 {dimension_numbers = #tpu.dot_dimension_numbers<[1], [0], [0], [1], [0, 0, 1, 1], [], []>} : vector<16x128xbf16>, vector<128x512xbf16>, vector<16x512xf32> -> vector<16x512xf32>
    %364 = arith.extf %359 : vector<16x512xbf16> to vector<16x512xf32>
    %365 = arith.addf %364, %363 : vector<16x512xf32>
    %366 = vector.extract_strided_slice %365 {offsets = [0, 0], sizes = [16, 128], strides = [1, 1]} : vector<16x512xf32> to vector<16x128xf32>
    %367 = arith.negf %366 : vector<16x128xf32>
    %368 = math.exp %367 : vector<16x128xf32>
    %cst_108 = arith.constant 1.000000e+00 : f32
    %369 = vector.broadcast %cst_108 : f32 to vector<16x128xf32>
    %370 = arith.addf %369, %368 : vector<16x128xf32>
    %371 = arith.divf %369, %370 : vector<16x128xf32>
    %372 = vector.extract_strided_slice %365 {offsets = [0, 128], sizes = [16, 128], strides = [1, 1]} : vector<16x512xf32> to vector<16x128xf32>
    %373 = arith.negf %372 : vector<16x128xf32>
    %374 = math.exp %373 : vector<16x128xf32>
    %cst_109 = arith.constant 1.000000e+00 : f32
    %375 = vector.broadcast %cst_109 : f32 to vector<16x128xf32>
    %376 = arith.addf %375, %374 : vector<16x128xf32>
    %377 = arith.divf %375, %376 : vector<16x128xf32>
    %378 = vector.extract_strided_slice %365 {offsets = [0, 256], sizes = [16, 128], strides = [1, 1]} : vector<16x512xf32> to vector<16x128xf32>
    %379 = math.tanh %378 : vector<16x128xf32>
    %380 = vector.extract_strided_slice %365 {offsets = [0, 384], sizes = [16, 128], strides = [1, 1]} : vector<16x512xf32> to vector<16x128xf32>
    %381 = arith.negf %380 : vector<16x128xf32>
    %382 = math.exp %381 : vector<16x128xf32>
    %cst_110 = arith.constant 1.000000e+00 : f32
    %383 = vector.broadcast %cst_110 : f32 to vector<16x128xf32>
    %384 = arith.addf %383, %382 : vector<16x128xf32>
    %385 = arith.divf %383, %384 : vector<16x128xf32>
    %386 = arith.mulf %377, %351 : vector<16x128xf32>
    %387 = arith.mulf %371, %379 : vector<16x128xf32>
    %388 = arith.addf %386, %387 : vector<16x128xf32>
    %389 = math.tanh %388 : vector<16x128xf32>
    %390 = arith.mulf %385, %389 : vector<16x128xf32>
    %391 = arith.truncf %390 : vector<16x128xf32> to vector<16x128xbf16>
    %cst_111 = arith.constant 0.000000e+00 : bf16
    %392 = vector.broadcast %cst_111 : bf16 to vector<16x128xbf16>
    %393 = arith.select %362, %391, %392 : vector<16x128xi1>, vector<16x128xbf16>
    %c0_112 = arith.constant 0 : index
    %394 = arith.index_cast %356 : i32 to index
    %c0_113 = arith.constant 0 : index
    %c0_114 = arith.constant 0 : index
    %395 = vector.load %arg5[%c0_112, %394, %c0_113, %c0_114] : memref<1x8x16x128xbf16, #tpu.memory_space<vmem>>, vector<1x1x16x128xbf16>
    %396 = vector.shape_cast %395 : vector<1x1x16x128xbf16> to vector<16x128xbf16>
    %397 = vector.shape_cast %393 : vector<16x128xbf16> to vector<1x1x16x128xbf16>
    tpu.vector_store %arg5[%c0_112, %394, %c0_113, %c0_114], %397 {strides = array<i32>} : memref<1x8x16x128xbf16, #tpu.memory_space<vmem>>, vector<1x1x16x128xbf16>,
    %398 = arith.select %362, %391, %350 : vector<16x128xi1>, vector<16x128xbf16>
    %399 = arith.select %362, %388, %351 : vector<16x128xi1>, vector<16x128xf32>
    %c8_i32_115 = arith.constant 8 : i32
    %c0_116 = arith.constant 0 : index
    %c0_117 = arith.constant 0 : index
    %400 = vector.load %arg6[%c0_116, %c0_117] : memref<16x128xbf16, #tpu.memory_space<vmem>>, vector<16x128xbf16>
    tpu.vector_store %arg6[%c0_116, %c0_117], %398 {strides = array<i32>} : memref<16x128xbf16, #tpu.memory_space<vmem>>, vector<16x128xbf16>,
    %c0_118 = arith.constant 0 : index
    %c0_119 = arith.constant 0 : index
    %401 = vector.load %arg7[%c0_118, %c0_119] : memref<16x128xf32, #tpu.memory_space<vmem>>, vector<16x128xf32>
    tpu.vector_store %arg7[%c0_118, %c0_119], %399 {strides = array<i32>} : memref<16x128xf32, #tpu.memory_space<vmem>>, vector<16x128xf32>,
    return
  }
  func.func @transform_0(%arg0: i32, %arg1: i32) -> (i32, i32, i32, i32) {
    %c1_i32 = arith.constant 1 : i32
    %0 = arith.subi %c1_i32, %arg0 : i32
    %1 = arith.muli %0, %arg1 : i32
    %c0_i32 = arith.constant 0 : i32
    %2 = arith.subi %c0_i32, %arg1 : i32
    %3 = arith.muli %arg0, %2 : i32
    %4 = arith.addi %1, %3 : i32
    %c0_i32_0 = arith.constant 0 : i32
    %c0_i32_1 = arith.constant 0 : i32
    %c0_i32_2 = arith.constant 0 : i32
    return %arg0, %4, %c0_i32_0, %c0_i32_1 : i32, i32, i32, i32
  }
  func.func @transform_1(%arg0: i32, %arg1: i32) -> (i32, i32, i32) {
    %c0_i32 = arith.constant 0 : i32
    %c0_i32_0 = arith.constant 0 : i32
    %c0_i32_1 = arith.constant 0 : i32
    return %arg0, %c0_i32, %c0_i32_0 : i32, i32, i32
  }
  func.func @transform_2(%arg0: i32, %arg1: i32) -> (i32, i32) {
    %c0_i32 = arith.constant 0 : i32
    %c0_i32_0 = arith.constant 0 : i32
    %c0_i32_1 = arith.constant 0 : i32
    return %c0_i32, %c0_i32_0 : i32, i32
  }
  func.func @transform_3(%arg0: i32, %arg1: i32) -> (i32, i32, i32, i32) {
    %c1_i32 = arith.constant 1 : i32
    %0 = arith.subi %c1_i32, %arg0 : i32
    %1 = arith.muli %0, %arg1 : i32
    %c0_i32 = arith.constant 0 : i32
    %2 = arith.subi %c0_i32, %arg1 : i32
    %3 = arith.muli %arg0, %2 : i32
    %4 = arith.addi %1, %3 : i32
    %c0_i32_0 = arith.constant 0 : i32
    %c0_i32_1 = arith.constant 0 : i32
    %c0_i32_2 = arith.constant 0 : i32
    return %arg0, %4, %c0_i32_0, %c0_i32_1 : i32, i32, i32, i32
  }
}

</mosaic_0001>

<bundles_post_ra>
// kernel: _lambda_.2
= control target key start
LH: loop header
LB: loop body
LE: loop exit
PB: predicated region body
PF: predicated region fallthrough
CT: control target
= control target key end

     0   :  { %s3171_s12 = smov 0   ;;  %s3173_s13 = smov 0   ;;  %s4403_s0 = inlined_call_operand.vmem [shape: bf16[2,8,16,512], index: 0, kind: input, shape index: {}]   ;;  %s4404_s1 = inlined_call_operand.vmem [shape: bf16[2,128,512], index: 1, kind: input, shape index: {}]   ;;  %s4405_s2 = inlined_call_operand.vmem [shape: s32[16,1], index: 2, kind: input, shape index: {}]   ;;  %s4406_s3 = inlined_call_operand.vmem [shape: bf16[2,8,16,128], index: 3, kind: output, shape index: {}]  }
   0x1   :  { %s3175_s14 = smov 0  }
   0x2 LB: > { %s25_s15 = sadd.s32 1, %s3144_s13  ;;  %p2567_p0 = scmp.ge.s32.totalorder %s3148_s14, 1  ;;  %s3148_s14 = sphi %s3175_s14, %s13_s14   ;;  %s3144_s13 = sphi %s3173_s13, %s4467_s13   ;;  %s3140_s12 = sphi %s3171_s12, %s4466_s12  }
   0x3   : > { %p27_p1 = scmp.ge.s32.totalorder %s25_s15, 2  ;;  %p199_p2 = scmp.lt.s32.totalorder %s3148_s14, 3 }
   0x5   : > { %s4469_s15 = smov (%p27_p1, %s25_s15), 0  ;;  %p200_p3 = pnand %p2567_p0, %p199_p2 }
   0x7   : > { %203 = sbr.rel (%p200_p3) target bundleno = 1555 (0x613), region = 32 }
   0xc   : > { %p254_p4 = scmp.lt.s32.totalorder %s3140_s12, 1  ;;  %v3150_v0 = vmov 0   ;;  %s2828_s25 = smul.u32 224, %s3140_s12 }
   0xd   : > { %300 = vst [vmem:[#allocation2] sm:$0xf] %v3150_v0  ;;  %2869 = vset.pattern.permute.xlu0 %v3150_v0  ;;  %s354_s30 = smul.u32 7, %s3140_s12  ;;  %s3587_s11 = ssub.s32 1, %s3140_s12 }
   0xe   : > { %s3193_s16 = scalar_select %p254_p4, %s3140_s12, 1  ;;  %301 = vst [vmem:[#allocation2 + $0x4] sm:$0xf] %v3150_v0 }
   0xf   : > { %s2829_s5 = smul.u32 56, %s3140_s12  ;;  %s2726_s22 = sshll.u32 %s3587_s11, 1 }
  0x10   : > { %s2792_s17 = sshll.u32 %s3193_s16, 8  ;;  %s2794_s4 = sshll.u32 %s3193_s16, 6 }
  0x11   : > { %s3201_s20 = scalar_lea.vmem %s4404_s1, %s2792_s17  ;;  %s3439_s28 = scalar_lea.vmem %s4403_s0, %s2792_s17 }
  0x12   : > { %v2694_v1 = vld [vmem:[%s3201_s20 + $0xe0] sm:$0xf]  ;;  %v2825_v2 = vld [vmem:[%s3201_s20 + $0xec] sm:$0xf0]  ;;  %v2823_v3 = vld [vmem:[%s3201_s20 + $0xe4] sm:$0xf]  ;;  %s357_s29 = scalar_lea.vmem %s3439_s28, %s2828_s25  ;;  %s3518_s8 = scalar_lea.vmem %s4406_s3, %s2794_s4 }
  0x13   : > { %v3206_v4 = vor.u32 %v2825_v2, %v2694_v1  ;;  %v2696_v5 = vld [vmem:[%s3201_s20 + $0xf0] sm:$0xf0]  ;;  %v2824_v6 = vld [vmem:[%s3201_s20 + $0xec] sm:$0xf]  ;;  %v2704_v7 = vld [vmem:[%s3201_s20 + $0xf8] sm:$0xf0]  ;;  %s738_s9 = scalar_lea.vmem %s3518_s8, %s2829_s5 }
  0x14   : > { %v3211_v8 = vor.u32 %v2823_v3, %v2696_v5  ;;  %v3213_v9 = vor.u32 %v2824_v6, %v2704_v7  ;;  %v2678_v10 = vld [vmem:[%s3201_s20 + $0xc0] sm:$0xf]  ;;  %v2821_v11 = vld [vmem:[%s3201_s20 + $0xcc] sm:$0xf0]  ;;  %v2819_v12 = vld [vmem:[%s3201_s20 + $0xc4] sm:$0xf] }
  0x15   : > { %532 = vmatpush.bf16.msra.mxu0 %v3206_v4  ;;  %v3219_v13 = vor.u32 %v2821_v11, %v2678_v10  ;;  %v2680_v14 = vld [vmem:[%s3201_s20 + $0xd0] sm:$0xf0]  ;;  %v2820_v15 = vld [vmem:[%s3201_s20 + $0xcc] sm:$0xf]  ;;  %v2688_v16 = vld [vmem:[%s3201_s20 + $0xd8] sm:$0xf0] }
  0x16   : > { %546 = vmatpush.bf16.msra.mxu1 %v3211_v8  ;;  %574 = vmatpush.bf16.msra.mxu3 %v3213_v9  ;;  %v3226_v17 = vor.u32 %v2819_v12, %v2680_v14  ;;  %v3228_v18 = vor.u32 %v2820_v15, %v2688_v16  ;;  %v2702_v19 = vld [vmem:[%s3201_s20 + $0xe8] sm:$0xf]  ;;  %v2826_v20 = vld [vmem:[%s3201_s20 + $0xf4] sm:$0xf0]  ;;  %v2662_v21 = vld [vmem:[%s3201_s20 + $0xa0] sm:$0xf] }
  0x17   : > { %v3233_v22 = vor.u32 %v2826_v20, %v2702_v19  ;;  %v2817_v23 = vld [vmem:[%s3201_s20 + $0xac] sm:$0xf0]  ;;  %v2815_v24 = vld [vmem:[%s3201_s20 + $0xa4] sm:$0xf]  ;;  %v2664_v25 = vld [vmem:[%s3201_s20 + $0xb0] sm:$0xf0] }
  0x18   : > { %v2816_v26 = vld [vmem:[%s3201_s20 + $0xac] sm:$0xf]  ;;  %v2672_v27 = vld [vmem:[%s3201_s20 + $0xb8] sm:$0xf0]  ;;  %v2686_v28 = vld [vmem:[%s3201_s20 + $0xc8] sm:$0xf]  ;;  %v3243_v29 = vor.u32 %v2817_v23, %v2662_v21  ;;  %v3250_v33 = vor.u32 %v2815_v24, %v2664_v25 }
  0x19   : > { %533 = vmatpush.bf16.msra.mxu0 %v3219_v13  ;;  %560 = vmatpush.bf16.msra.mxu2 %v3233_v22  ;;  %v2822_v30 = vld [vmem:[%s3201_s20 + $0xd4] sm:$0xf0]  ;;  %v2646_v31 = vld [vmem:[%s3201_s20 + $0x80] sm:$0xf]  ;;  %v2813_v32 = vld [vmem:[%s3201_s20 + $0x8c] sm:$0xf0]  ;;  %v3252_v34 = vor.u32 %v2816_v26, %v2672_v27 }
  0x1a   : > { %547 = vmatpush.bf16.msra.mxu1 %v3226_v17  ;;  %575 = vmatpush.bf16.msra.mxu3 %v3228_v18  ;;  %v3254_v35 = vor.u32 %v2822_v30, %v2686_v28  ;;  %v2811_v36 = vld [vmem:[%s3201_s20 + $0x84] sm:$0xf]  ;;  %v2648_v37 = vld [vmem:[%s3201_s20 + $0x90] sm:$0xf0]  ;;  %v2812_v38 = vld [vmem:[%s3201_s20 + $0x8c] sm:$0xf]  ;;  %v3264_v42 = vor.u32 %v2813_v32, %v2646_v31 }
  0x1b   : > { %v2656_v39 = vld [vmem:[%s3201_s20 + $0x98] sm:$0xf0]  ;;  %v2670_v40 = vld [vmem:[%s3201_s20 + $0xa8] sm:$0xf]  ;;  %v2818_v41 = vld [vmem:[%s3201_s20 + $0xb4] sm:$0xf0]  ;;  %v3272_v46 = vor.u32 %v2811_v36, %v2648_v37 }
  0x1c   : > { %v3266_v43 = vor.u32 %v2818_v41, %v2670_v40  ;;  %v2630_v44 = vld [vmem:[%s3201_s20 + $0x60] sm:$0xf]  ;;  %v2809_v45 = vld [vmem:[%s3201_s20 + $0x6c] sm:$0xf0]  ;;  %v3274_v47 = vor.u32 %v2812_v38, %v2656_v39  ;;  %v2807_v48 = vld [vmem:[%s3201_s20 + $0x64] sm:$0xf] }
  0x1d   : > { %534 = vmatpush.bf16.msra.mxu0 %v3243_v29  ;;  %561 = vmatpush.bf16.msra.mxu2 %v3254_v35  ;;  %v2654_v49 = vld [vmem:[%s3201_s20 + $0x88] sm:$0xf]  ;;  %v2814_v50 = vld [vmem:[%s3201_s20 + $0x94] sm:$0xf0]  ;;  %v2632_v51 = vld [vmem:[%s3201_s20 + $0x70] sm:$0xf0]  ;;  %v3284_v54 = vor.u32 %v2809_v45, %v2630_v44 }
  0x1e   : > { %548 = vmatpush.bf16.msra.mxu1 %v3250_v33  ;;  %576 = vmatpush.bf16.msra.mxu3 %v3252_v34  ;;  %v2808_v52 = vld [vmem:[%s3201_s20 + $0x6c] sm:$0xf]  ;;  %v2640_v53 = vld [vmem:[%s3201_s20 + $0x78] sm:$0xf0]  ;;  %v3286_v55 = vor.u32 %v2814_v50, %v2654_v49  ;;  %v2614_v56 = vld [vmem:[%s3201_s20 + $0x40] sm:$0xf]  ;;  %v3292_v58 = vor.u32 %v2807_v48, %v2632_v51 }
  0x1f   : > { %v2805_v57 = vld [vmem:[%s3201_s20 + $0x4c] sm:$0xf0]  ;;  %v3294_v59 = vor.u32 %v2808_v52, %v2640_v53  ;;  %v2803_v60 = vld [vmem:[%s3201_s20 + $0x44] sm:$0xf]  ;;  %v2638_v61 = vld [vmem:[%s3201_s20 + $0x68] sm:$0xf] }
  0x20   : > { %v2810_v62 = vld [vmem:[%s3201_s20 + $0x74] sm:$0xf0]  ;;  %v2616_v63 = vld [vmem:[%s3201_s20 + $0x50] sm:$0xf0]  ;;  %v2804_v0 = vld [vmem:[%s3201_s20 + $0x4c] sm:$0xf]  ;;  %v3304_v2 = vor.u32 %v2805_v57, %v2614_v56 }
  0x21   : > { %535 = vmatpush.bf16.msra.mxu0 %v3264_v42  ;;  %562 = vmatpush.bf16.msra.mxu2 %v3266_v43  ;;  %v2624_v1 = vld [vmem:[%s3201_s20 + $0x58] sm:$0xf0]  ;;  %v3306_v3 = vor.u32 %v2810_v62, %v2638_v61  ;;  %v2598_v5 = vld [vmem:[%s3201_s20 + $0x20] sm:$0xf]  ;;  %v2801_v6 = vld [vmem:[%s3201_s20 + $0x2c] sm:$0xf0]  ;;  %v3313_v10 = vor.u32 %v2803_v60, %v2616_v63 }
  0x22   : > { %549 = vmatpush.bf16.msra.mxu1 %v3272_v46  ;;  %577 = vmatpush.bf16.msra.mxu3 %v3274_v47  ;;  %v2799_v7 = vld [vmem:[%s3201_s20 + $0x24] sm:$0xf]  ;;  %v3315_v11 = vor.u32 %v2804_v0, %v2624_v1  ;;  %v2600_v12 = vld [vmem:[%s3201_s20 + $0x30] sm:$0xf0]  ;;  %v2622_v14 = vld [vmem:[%s3201_s20 + $0x48] sm:$0xf]  ;;  %v3327_v21 = vor.u32 %v2801_v6, %v2598_v5 }
  0x23   : > { %v2806_v15 = vld [vmem:[%s3201_s20 + $0x54] sm:$0xf0]  ;;  %v2800_v16 = vld [vmem:[%s3201_s20 + $0x2c] sm:$0xf]  ;;  %v2608_v19 = vld [vmem:[%s3201_s20 + $0x38] sm:$0xf0]  ;;  %v3335_v26 = vor.u32 %v2799_v7, %v2600_v12 }
  0x24   : > { %v336_v20 = vld [vmem:[%s4405_s2] sm:$0xff]  ;;  %v3329_v23 = vor.u32 %v2806_v15, %v2622_v14  ;;  %v2797_v25 = vld [vmem:[%s3201_s20 + $0xc] sm:$0xf0]  ;;  %v3337_v27 = vor.u32 %v2800_v16, %v2608_v19  ;;  %v2606_v30 = vld [vmem:[%s3201_s20 + $0x28] sm:$0xf]  ;;  %s745_s10 = smul.u32 6, %s3140_s12 }
  0x25   : > { %536 = vmatpush.bf16.msra.mxu0 %v3284_v54  ;;  %563 = vmatpush.bf16.msra.mxu2 %v3286_v55  ;;  %v2582_v24 = vld [vmem:[%s3201_s20] sm:$0xf]  ;;  %v2795_v28 = vld [vmem:[%s3201_s20 + $0x4] sm:$0xf]  ;;  %v2802_v31 = vld [vmem:[%s3201_s20 + $0x34] sm:$0xf0] }
  0x26   : > { %550 = vmatpush.bf16.msra.mxu1 %v3292_v58  ;;  %578 = vmatpush.bf16.msra.mxu3 %v3294_v59  ;;  %v2584_v32 = vld [vmem:[%s3201_s20 + $0x10] sm:$0xf0]  ;;  %v2796_v36 = vld [vmem:[%s3201_s20 + $0xc] sm:$0xf]  ;;  %v2592_v37 = vld [vmem:[%s3201_s20 + $0x18] sm:$0xf0]  ;;  %v3347_v38 = vor.u32 %v2797_v25, %v2582_v24  ;;  %v3349_v39 = vor.u32 %v2802_v31, %v2606_v30  ;;  %s3590_s16 = sadd.s32 %s745_s10, %s3587_s11 }
  0x27   : > { %339 = vperm.xlu0 %2869, %v336_v20   ;;  %v337_v40 = vld [vmem:[%s4405_s2 + $0x8] sm:$0xff]  ;;  %v3356_v41 = vor.u32 %v2795_v28, %v2584_v32  ;;  %v3358_v44 = vor.u32 %v2796_v36, %v2592_v37  ;;  %v2798_v48 = vld [vmem:[%s3201_s20 + $0x14] sm:$0xf0]  ;;  %v2827_v49 = vld [vmem:[#allocation2] sm:$0xff]  ;;  %s2830_s17 = sshll.u32 %s3590_s16, 5  ;;  %s2831_s19 = sshll.u32 %s3590_s16, 3 }
  0x28   : > { %v2590_v45 = vld [vmem:[%s3201_s20 + $0x8] sm:$0xf]  ;;  %v358_v51 = vld [vmem:[%s357_s29] sm:$0xff]  ;;  %v360_v63 = vld [vmem:[%s357_s29 + $0x10] sm:$0xff]  ;;  %s3594_s18 = scalar_lea.vmem %s3439_s28, %s2830_s17  ;;  %s970_s20 = scalar_lea.vmem %s3518_s8, %s2831_s19 }
  0x29   : > { %537 = vmatpush.bf16.msra.mxu0 %v3304_v2  ;;  %564 = vmatpush.bf16.msra.mxu2 %v3306_v3  ;;  %v3366_v50 = vor.u32 %v2798_v48, %v2590_v45  ;;  %v588_v52 = vunpack.c.l.bf16 %v358_v51  ;;  %v589_v53 = vunpack.c.h.bf16 %v358_v51  ;;  %v359_v61 = vld [vmem:[%s357_s29 + $0x8] sm:$0xff]  ;;  %v592_v6 = vunpack.c.l.bf16 %v360_v63  ;;  %v3442_v20 = vld [vmem:[%s357_s29 + $0x18] sm:$0xff]  ;;  %s978_s21 = smul.u32 5, %s3140_s12 }
  0x2a   : > { %551 = vmatpush.bf16.msra.mxu1 %v3313_v10  ;;  %579 = vmatpush.bf16.msra.mxu3 %v3315_v11  ;;  %v591_v5 = vunpack.c.h.bf16 %v359_v61  ;;  %v593_v7 = vunpack.c.h.bf16 %v360_v63  ;;  %v590_v31 = vunpack.c.l.bf16 %v359_v61  ;;  %s1210_s29 = smul.u32 3, %s3587_s11 }
  0x2b   : > { %s3725_s23 = sadd.s32 %s2726_s22, %s978_s21  ;;  %s1444_s10 = smul.u32 3, %s3140_s12 }
  0x2c   : > { %s2832_s24 = sshll.u32 %s3725_s23, 5  ;;  %s2833_s26 = sshll.u32 %s3725_s23, 3 }
  0x2d   : > { %538 = vmatpush.bf16.msra.mxu0 %v3327_v21  ;;  %565 = vmatpush.bf16.msra.mxu2 %v3329_v23  ;;  %s3729_s25 = scalar_lea.vmem %s3439_s28, %s2832_s24  ;;  %s1203_s27 = scalar_lea.vmem %s3518_s8, %s2833_s26 }
  0x2e   : > { %552 = vmatpush.bf16.msra.mxu1 %v3335_v26  ;;  %580 = vmatpush.bf16.msra.mxu3 %v3337_v27  ;;  %s1676_s22 = smul.u32 5, %s3587_s11 }
  0x2f   : > { %342 = vperm.xlu0 %2869, %v337_v40   ;;  %v595_v40 = vunpack.c.h.bf16 %v3442_v20 }
  0x31   : > { %539 = vmatpush.bf16.msra.mxu0 %v3347_v38  ;;  %566 = vmatpush.bf16.msra.mxu2 %v3349_v39 }
  0x32   : > { %553 = vmatpush.bf16.msra.mxu1 %v3356_v41  ;;  %581 = vmatpush.bf16.msra.mxu3 %v3358_v44 }
  0x34   : > { %540 = vmatmul.bf16.vlgmr.msra.gmra.mxu0 %v2827_v49 }
  0x35   : > { %764 = vmatpush.bf16.msrb.mxu0 %v3206_v4  ;;  %554 = vmatmul.bf16.vlgmr.msra.gmra.mxu1 %v2827_v49 }
  0x36   : > { %778 = vmatpush.bf16.msrb.mxu1 %v3211_v8  ;;  %806 = vmatpush.bf16.msrb.mxu3 %v3213_v9 }
  0x37   : > { %582 = vmatmul.bf16.vlgmr.msra.gmra.mxu3 %v2827_v49  ;;  %567 = vmatpush.bf16.msra.mxu2 %v3366_v50 }
  0x39   : > { %765 = vmatpush.bf16.msrb.mxu0 %v3219_v13 }
  0x3a   : > { %779 = vmatpush.bf16.msrb.mxu1 %v3226_v17  ;;  %807 = vmatpush.bf16.msrb.mxu3 %v3228_v18 }
  0x3b   : > { %792 = vmatpush.bf16.msrb.mxu2 %v3233_v22 }
  0x3c   : > { %568 = vmatmul.bf16.vlgmr.msra.gmra.mxu2 %v2827_v49 }
  0x3d   : > { %766 = vmatpush.bf16.msrb.mxu0 %v3243_v29 }
  0x3e   : > { %780 = vmatpush.bf16.msrb.mxu1 %v3250_v33  ;;  %808 = vmatpush.bf16.msrb.mxu3 %v3252_v34 }
  0x3f   : > { %793 = vmatpush.bf16.msrb.mxu2 %v3254_v35 }
  0x41   : > { %767 = vmatpush.bf16.msrb.mxu0 %v3264_v42 }
  0x42   : > { %781 = vmatpush.bf16.msrb.mxu1 %v3272_v46  ;;  %809 = vmatpush.bf16.msrb.mxu3 %v3274_v47 }
  0x43   : > { %794 = vmatpush.bf16.msrb.mxu2 %v3266_v43 }
  0x45   : > { %768 = vmatpush.bf16.msrb.mxu0 %v3284_v54 }
  0x46   : > { %782 = vmatpush.bf16.msrb.mxu1 %v3292_v58  ;;  %810 = vmatpush.bf16.msrb.mxu3 %v3294_v59 }
  0x47   : > { %795 = vmatpush.bf16.msrb.mxu2 %v3286_v55 }
  0x49   : > { %769 = vmatpush.bf16.msrb.mxu0 %v3304_v2 }
  0x4a   : > { %783 = vmatpush.bf16.msrb.mxu1 %v3313_v10  ;;  %811 = vmatpush.bf16.msrb.mxu3 %v3315_v11 }
  0x4b   : > { %796 = vmatpush.bf16.msrb.mxu2 %v3306_v3 }
  0x4d   : > { %770 = vmatpush.bf16.msrb.mxu0 %v3327_v21 }
  0x4e   : > { %784 = vmatpush.bf16.msrb.mxu1 %v3335_v26  ;;  %812 = vmatpush.bf16.msrb.mxu3 %v3337_v27 }
  0x4f   : > { %797 = vmatpush.bf16.msrb.mxu2 %v3329_v23 }
  0x51   : > { %771 = vmatpush.bf16.msrb.mxu0 %v3347_v38 }
  0x52   : > { %785 = vmatpush.bf16.msrb.mxu1 %v3356_v41  ;;  %813 = vmatpush.bf16.msrb.mxu3 %v3358_v44 }
  0x53   : > { %798 = vmatpush.bf16.msrb.mxu2 %v3349_v39 }
  0x55   : > { %997 = vmatpush.bf16.msra.mxu0 %v3206_v4 }
  0x56   : > { %1011 = vmatpush.bf16.msra.mxu1 %v3211_v8  ;;  %1039 = vmatpush.bf16.msra.mxu3 %v3213_v9 }
  0x57   : > { %799 = vmatpush.bf16.msrb.mxu2 %v3366_v50 }
  0x59   : > { %998 = vmatpush.bf16.msra.mxu0 %v3219_v13 }
  0x5a   : > { %1012 = vmatpush.bf16.msra.mxu1 %v3226_v17  ;;  %1040 = vmatpush.bf16.msra.mxu3 %v3228_v18 }
  0x5b   : > { %1025 = vmatpush.bf16.msra.mxu2 %v3233_v22 }
  0x5d   : > { %999 = vmatpush.bf16.msra.mxu0 %v3243_v29 }
  0x5e   : > { %1013 = vmatpush.bf16.msra.mxu1 %v3250_v33  ;;  %1041 = vmatpush.bf16.msra.mxu3 %v3252_v34 }
  0x5f   : > { %1026 = vmatpush.bf16.msra.mxu2 %v3254_v35 }
  0x61   : > { %1000 = vmatpush.bf16.msra.mxu0 %v3264_v42 }
  0x62   : > { %1014 = vmatpush.bf16.msra.mxu1 %v3272_v46  ;;  %1042 = vmatpush.bf16.msra.mxu3 %v3274_v47 }
  0x63   : > { %1027 = vmatpush.bf16.msra.mxu2 %v3266_v43 }
  0x65   : > { %1001 = vmatpush.bf16.msra.mxu0 %v3284_v54 }
  0x66   : > { %1015 = vmatpush.bf16.msra.mxu1 %v3292_v58  ;;  %1043 = vmatpush.bf16.msra.mxu3 %v3294_v59 }
  0x67   : > { %1028 = vmatpush.bf16.msra.mxu2 %v3286_v55 }
  0x69   : > { %1002 = vmatpush.bf16.msra.mxu0 %v3304_v2 }
  0x6a   : > { %1016 = vmatpush.bf16.msra.mxu1 %v3313_v10  ;;  %1044 = vmatpush.bf16.msra.mxu3 %v3315_v11 }
  0x6b   : > { %1029 = vmatpush.bf16.msra.mxu2 %v3306_v3 }
  0x6d   : > { %1003 = vmatpush.bf16.msra.mxu0 %v3327_v21 }
  0x6e   : > { %1017 = vmatpush.bf16.msra.mxu1 %v3335_v26  ;;  %1045 = vmatpush.bf16.msra.mxu3 %v3337_v27 }
  0x6f   : > { %1030 = vmatpush.bf16.msra.mxu2 %v3329_v23 }
  0x71   : > { %1004 = vmatpush.bf16.msra.mxu0 %v3347_v38 }
  0x72   : > { %1018 = vmatpush.bf16.msra.mxu1 %v3356_v41  ;;  %1046 = vmatpush.bf16.msra.mxu3 %v3358_v44 }
  0x73   : > { %1031 = vmatpush.bf16.msra.mxu2 %v3349_v39 }
  0x77   : > { %1032 = vmatpush.bf16.msra.mxu2 %v3366_v50 }
  0xb1   : > { %v541_v56 = vpop.f32.mrf.mxu0 }
  0xb2   : > { %v596_v57 = vadd.f32 %v588_v52, %v541_v56  ;;  %v555_v60 = vpop.f32.mrf.mxu1 }
  0xb3   : > { %v597_v62 = vadd.f32 %v589_v53, %v555_v60 }
  0xb4   : > { %v2708_v0 = vmul.f32 -1.442695, %v596_v57 }
  0xb5   : > { %v2710_v1 = vmul.f32 -1.442695, %v597_v62 }
  0xb6   : > { %2870 = vpow2.f32 %v2708_v0 }
  0xb7   : > { %2872 = vpow2.f32 %v2710_v1 }
  0xb9   : > { %v543_v15 = vpop.f32.mrf.mxu0 }
  0xba   : > { %v583_v12 = vpop.f32.mrf.mxu3  ;;  %v600_v16 = vadd.f32 %v592_v6, %v543_v15  ;;  %v557_v19 = vpop.f32.mrf.mxu1 }
  0xbb   : > { %v599_v14 = vadd.f32 %v591_v5, %v583_v12  ;;  %v601_v25 = vadd.f32 %v593_v7, %v557_v19  ;;  %v3452_v7 = vstv %s354_s30  ;;  %v3456_v19 = vpop.permute.xlu0 %339  ;;  %s2737_s30 = sshll.u32 %s3140_s12, 2 }
  0xbc   : > { %v2871_v28 = vpop.eup %2870  ;;  %v2709_v30 = vmul.f32 -1.442695, %v600_v16  ;;  %4413 = vst [vmem:[#allocation4_spill] sm:$0xff] %v3456_v19  ;;  %vm364_vm5 = vcmp.lt.s32.totalorder %v3452_v7, %v3456_v19  ;;  %s3860_s4 = sadd.s32 %s2737_s30, %s1210_s29  ;;  %s1909_s30 = smul.u32 6, %s3587_s11 }
  0xbd   : > { %v2712_v24 = vmul.f32 -1.442695, %v599_v14  ;;  %v2873_v32 = vpop.eup %2872  ;;  %v610_v36 = vadd.f32 1.0, %v2871_v28  ;;  %v2711_v37 = vmul.f32 -1.442695, %v601_v25  ;;  %v594_v28 = vunpack.c.l.bf16 %v3442_v20  ;;  %s2834_s5 = sshll.u32 %s3860_s4, 5 }
  0xbe   : > { %v648_v45 = vadd.f32 1.0, %v2873_v32  ;;  %s3864_s6 = scalar_lea.vmem %s3439_s28, %s2834_s5  ;;  %s2835_s7 = sshll.u32 %s3860_s4, 3 }
  0xbf   : > { %2874 = vpow2.f32 %v2712_v24  ;;  %v569_v48 = vpop.f32.mrf.mxu2  ;;  %v621_v6 = vand.u32 2147483647, %v610_v36  ;;  %v623_v16 = vand.u32 2147483648, %v610_v36  ;;  %vm617_vm0 = vweird.f32 %v610_v36 }
  0xc0   : > { %2876 = vpow2.f32 %v2709_v30  ;;  %v598_v49 = vadd.f32 %v590_v31, %v569_v48  ;;  %v661_v14 = vand.u32 2147483648, %v648_v45  ;;  %v659_v25 = vand.u32 2147483647, %v648_v45 }
  0xc1   : > { %2878 = vrcp.f32 %v610_v36  ;;  %vm655_vm2 = vweird.f32 %v648_v45  ;;  %vm3460_vm3 = vcmp.eq.f32.partialorder %v621_v6, 8.507059e+37 }
  0xc2   : > { %2880 = vrcp.f32 %v648_v45  ;;  %v585_v51 = vpop.f32.mrf.mxu3  ;;  %v662_v20 = vor.u32 1.1754944e-38, %v661_v14  ;;  %vm660_vm7 = vcmp.eq.f32.partialorder %v659_v25, 8.507059e+37 }
  0xc3   : > { %2882 = vpow2.f32 %v2711_v37  ;;  %v603_v52 = vadd.f32 %v595_v40, %v585_v51 }
  0xc4   : > { %2884 = vtanh.f32 %v598_v49 }
  0xc5   : > { %v2875_v53 = vpop.eup %2874  ;;  %v2713_v56 = vmul.f32 -1.442695, %v603_v52  ;;  %v624_v52 = vor.u32 1.1754944e-38, %v623_v16 }
  0xc6   : > { %v2877_v57 = vpop.eup %2876  ;;  %v3446_v60 = vadd.f32 1.0, %v2875_v53 }
  0xc7   : > { %v2879_v61 = vpop.eup %2878  ;;  %v3448_v62 = vadd.f32 1.0, %v2877_v57  ;;  %2886 = vpow2.f32 %v2713_v56  ;;  %v571_v32 = vpop.f32.mrf.mxu2 }
  0xc8   : > { %v2881_v63 = vpop.eup %2880  ;;  %v613_v0 = vmul.f32 %v2879_v61, %v610_v36  ;;  %2888 = vrcp.f32 %v3446_v60  ;;  %vm618_vm1 = vweird.f32 %v2879_v61  ;;  %vm695_vm8 = vweird.f32 %v3446_v60 }
  0xc9   : > { %v2883_v1 = vpop.eup %2882  ;;  %v651_v5 = vmul.f32 %v2881_v63, %v648_v45  ;;  %2890 = vrcp.f32 %v3448_v62  ;;  %vm656_vm4 = vweird.f32 %v2881_v63  ;;  %vm619_vm6 = vmor %vm617_vm0, %vm618_vm1  ;;  %v701_v14 = vand.u32 2147483648, %v3446_v60 }
  0xca   : > { %v614_v12 = vsub.f32 1.0, %v613_v0  ;;  %v3454_v15 = vadd.f32 1.0, %v2883_v1  ;;  %v2885_v30 = vpop.eup %2884  ;;  %v602_v1 = vadd.f32 %v594_v28, %v571_v32  ;;  %vm657_vm9 = vmor %vm655_vm2, %vm656_vm4  ;;  %v638_v32 = vand.u32 2147483648, %v3448_v62 }
  0xcb   : > { %v652_v24 = vsub.f32 1.0, %v651_v5  ;;  %vm632_vm10 = vweird.f32 %v3448_v62 }
  0xcc   : > { %2892 = vrcp.f32 %v3454_v15  ;;  %v615_v31 = vmul.f32 %v2879_v61, %v614_v12  ;;  %vm670_vm1 = vweird.f32 %v3454_v15 }
  0xcd   : > { %v2887_v37 = vpop.eup %2886  ;;  %v653_v40 = vmul.f32 %v2881_v63, %v652_v24 }
  0xce   : > { %v3466_v49 = vpop.eup %2888  ;;  %v616_v51 = vadd.f32 %v2879_v61, %v615_v31  ;;  %v3468_v53 = vadd.f32 1.0, %v2887_v37 }
  0xcf   : > { %v2891_v56 = vpop.eup %2890  ;;  %v691_v57 = vmul.f32 %v3466_v49, %v3446_v60  ;;  %v654_v0 = vadd.f32 %v2881_v63, %v653_v40  ;;  %vm696_vm12 = vweird.f32 %v3466_v49 }
  0xd0   : > { %v628_v5 = vmul.f32 %v2891_v56, %v3448_v62  ;;  %v620_v6 = vsel %vm619_vm6, %v2879_v61, %v616_v51  ;;  %2894 = vrcp.f32 %v3468_v53  ;;  %vm633_vm11 = vweird.f32 %v2891_v56  ;;  %vm3503_vm0 = vmor %vm695_vm8, %vm696_vm12 }
  0xd1   : > { %v692_v12 = vsub.f32 1.0, %v691_v57  ;;  %v625_v36 = vsel %vm3460_vm3, %v624_v52, %v620_v6  ;;  %v658_v16 = vsel %vm657_vm9, %v2881_v63, %v654_v0  ;;  %v636_v51 = vand.u32 2147483647, %v3448_v62  ;;  %vm634_vm13 = vmor %vm632_vm10, %vm633_vm11 }
  0xd2   : > { %v2893_v24 = vpop.eup %2892  ;;  %v629_v25 = vsub.f32 1.0, %v628_v5  ;;  %v663_v28 = vsel %vm660_vm7, %v662_v20, %v658_v16  ;;  %v722_v31 = vmul.f32 %v2885_v30, %v625_v36  ;;  %2896 = vtanh.f32 %v602_v1  ;;  %vm3526_vm7 = vmpackc.low %vm364_vm5, %vm364_vm5 }
  0xd3   : > { %v693_v61 = vmul.f32 %v3466_v49, %v692_v12  ;;  %v666_v45 = vmul.f32 %v2893_v24, %v3454_v15  ;;  %v720_v37 = vmul.f32 0.0, %v663_v28  ;;  %v676_v63 = vand.u32 2147483648, %v3454_v15 }
  0xd4   : > { %v630_v40 = vmul.f32 %v2891_v56, %v629_v25  ;;  %v674_v30 = vand.u32 2147483647, %v3454_v15  ;;  %v639_v5 = vor.u32 1.1754944e-38, %v638_v32  ;;  %vm671_vm14 = vweird.f32 %v2893_v24 }
  0xd5   : > { %v667_v48 = vsub.f32 1.0, %v666_v45  ;;  %v724_v52 = vadd.f32 %v722_v31, %v720_v37  ;;  %v694_v57 = vadd.f32 %v3466_v49, %v693_v61  ;;  %v699_v1 = vand.u32 2147483647, %v3446_v60  ;;  %vm672_vm2 = vmor %vm670_vm1, %vm671_vm14 }
  0xd6   : > { %v2895_v20 = vpop.eup %2894  ;;  %v631_v0 = vadd.f32 %v2891_v56, %v630_v40  ;;  %vm637_vm15 = vcmp.eq.f32.partialorder %v636_v51, 8.507059e+37  ;;  %v702_v45 = vor.u32 1.1754944e-38, %v701_v14  ;;  %vm675_vm3 = vcmp.eq.f32.partialorder %v674_v30, 8.507059e+37  ;;  %v3512_v40 = vpop.permute.xlu0 %342 }
  0xd7   : > { %v668_v6 = vmul.f32 %v2893_v24, %v667_v48  ;;  %2898 = vtanh.f32 %v724_v52  ;;  %v706_v12 = vmul.f32 %v2895_v20, %v3468_v53  ;;  %v3499_v16 = vsel %vm364_vm5, %v724_v52, 0.0 }
  0xd8   : > { %v635_v36 = vsel %vm634_vm13, %v2891_v56, %v631_v0  ;;  %v2897_v32 = vpop.eup %2896  ;;  %v677_v56 = vor.u32 1.1754944e-38, %v676_v63  ;;  %v698_v61 = vsel %vm3503_vm0, %v3466_v49, %v694_v57  ;;  %vm700_vm4 = vcmp.eq.f32.partialorder %v699_v1, 8.507059e+37 }
  0xd9   : > { %v707_v62 = vsub.f32 1.0, %v706_v12  ;;  %v640_v28 = vsel %vm637_vm15, %v639_v5, %v635_v36  ;;  %v669_v31 = vadd.f32 %v2893_v24, %v668_v6  ;;  %v703_v63 = vsel %vm700_vm4, %v702_v45, %v698_v61 }
  0xda   : > { %v723_v37 = vmul.f32 %v2897_v32, %v640_v28  ;;  %vm365_vm6 = vcmp.lt.s32.totalorder %v3452_v7, %v3512_v40  ;;  %vm711_vm8 = vweird.f32 %v2895_v20  ;;  %v716_v0 = vand.u32 2147483648, %v3468_v53  ;;  %v351_v32 = vld [vmem:[#allocation2 + $0x4] sm:$0xf] }
  0xdb   : > { %v673_v60 = vsel %vm672_vm2, %v2893_v24, %v669_v31  ;;  %v708_v15 = vmul.f32 %v2895_v20, %v707_v62  ;;  %vm710_vm9 = vweird.f32 %v3468_v53  ;;  %v714_v6 = vand.u32 2147483647, %v3468_v53  ;;  %v350_v62 = vld [vmem:[#allocation2] sm:$0xf]  ;;  %vm733_vm11 = vmpackc.low %vm365_vm6, %vm365_vm6  ;;  %v752_v24 = vld [vmem:[%s3594_s18 + $0x10] sm:$0xff] }
  0xdc   : > { %v678_v51 = vsel %vm675_vm3, %v677_v56, %v673_v60  ;;  %vm712_vm5 = vmor %vm710_vm9, %vm711_vm8  ;;  %v717_v36 = vor.u32 1.1754944e-38, %v716_v0  ;;  %v750_v7 = vld [vmem:[%s3594_s18] sm:$0xff] }
  0xdd   : > { %v2899_v48 = vpop.eup %2898  ;;  %v721_v52 = vmul.f32 0.0, %v678_v51  ;;  %v709_v30 = vadd.f32 %v2895_v20, %v708_v15  ;;  %vm715_vm10 = vcmp.eq.f32.partialorder %v714_v6, 8.507059e+37  ;;  %v820_v15 = vunpack.c.l.bf16 %v750_v7 }
  0xde   : > { %v728_v49 = vmul.f32 %v2899_v48, %v703_v63  ;;  %v821_v51 = vunpack.c.h.bf16 %v750_v7  ;;  %v824_v6 = vunpack.c.l.bf16 %v752_v24 }
  0xdf   : > { %v725_v14 = vadd.f32 %v723_v37, %v721_v52  ;;  %v713_v1 = vsel %vm712_vm5, %v2895_v20, %v709_v30 }
  0xe0   : > { %v730_v57 = vpack.c.bf16 %v728_v49, %v728_v49  ;;  %v718_v28 = vsel %vm715_vm10, %v717_v36, %v713_v1 }
  0xe1   : > { %2900 = vtanh.f32 %v725_v14  ;;  %v3535_v5 = vsel %vm365_vm6, %v725_v14, 0.0  ;;  %v751_v14 = vld [vmem:[%s3594_s18 + $0x8] sm:$0xff] }
  0xe2   : > { %v734_v12 = vsel %vm3526_vm7, %v730_v57, 0  ;;  %v3543_v61 = vsel %vm3526_vm7, %v730_v57, %v350_v62  ;;  %v823_v0 = vunpack.c.h.bf16 %v751_v14 }
  0xe3   : > { %739 = vst [vmem:[%s738_s9] sm:$0xf] %v734_v12  ;;  %v760_v20 = vunpack.c.l.b16 %v3543_v61  ;;  %v825_v12 = vunpack.c.h.bf16 %v752_v24 }
  0xe7   : > { %v2901_v25 = vpop.eup %2900 }
  0xe8   : > { %v729_v31 = vmul.f32 %v2901_v25, %v718_v28 }
  0xea   : > { %v731_v56 = vpack.c.bf16 %v729_v31, %v729_v31 }
  0xec   : > { %v735_v53 = vsel %vm733_vm11, %v731_v56, 0  ;;  %v3549_v45 = vsel %vm733_vm11, %v731_v56, %v351_v32 }
  0xed   : > { %740 = vst [vmem:[%s738_s9 + $0x4] sm:$0xf] %v735_v53  ;;  %v761_v60 = vunpack.c.l.b16 %v3549_v45  ;;  %s1436_s9 = scalar_lea.vmem %s3518_s8, %s2835_s7 }
  0xef   : > { %v762_v37 = vpack.c.b16 %v761_v60, %v760_v20 }
  0xf1   : > { %772 = vmatmul.bf16.vlgmr.msrb.gmra.mxu0 %v762_v37  ;;  %786 = vmatmul.bf16.vlgmr.msrb.gmra.mxu1 %v762_v37 }
  0xf2   : > { %800 = vmatmul.bf16.vlgmr.msrb.gmra.mxu2 %v762_v37  ;;  %814 = vmatmul.bf16.vlgmr.msrb.gmra.mxu3 %v762_v37 }
  0xf3   : > { %1230 = vmatpush.bf16.msrb.mxu0 %v3206_v4  ;;  %1244 = vmatpush.bf16.msrb.mxu1 %v3211_v8 }
  0xf4   : > { %1258 = vmatpush.bf16.msrb.mxu2 %v3233_v22  ;;  %1272 = vmatpush.bf16.msrb.mxu3 %v3213_v9 }
  0xf7   : > { %1231 = vmatpush.bf16.msrb.mxu0 %v3219_v13  ;;  %1245 = vmatpush.bf16.msrb.mxu1 %v3226_v17 }
  0xf8   : > { %1259 = vmatpush.bf16.msrb.mxu2 %v3254_v35  ;;  %1273 = vmatpush.bf16.msrb.mxu3 %v3228_v18 }
  0xfb   : > { %1232 = vmatpush.bf16.msrb.mxu0 %v3243_v29  ;;  %1246 = vmatpush.bf16.msrb.mxu1 %v3250_v33 }
  0xfc   : > { %1260 = vmatpush.bf16.msrb.mxu2 %v3266_v43  ;;  %1274 = vmatpush.bf16.msrb.mxu3 %v3252_v34 }
  0xff   : > { %1233 = vmatpush.bf16.msrb.mxu0 %v3264_v42  ;;  %1247 = vmatpush.bf16.msrb.mxu1 %v3272_v46 }
 0x100   : > { %1261 = vmatpush.bf16.msrb.mxu2 %v3286_v55  ;;  %1275 = vmatpush.bf16.msrb.mxu3 %v3274_v47 }
 0x103   : > { %1234 = vmatpush.bf16.msrb.mxu0 %v3284_v54  ;;  %1248 = vmatpush.bf16.msrb.mxu1 %v3292_v58 }
 0x104   : > { %1262 = vmatpush.bf16.msrb.mxu2 %v3306_v3  ;;  %1276 = vmatpush.bf16.msrb.mxu3 %v3294_v59 }
 0x107   : > { %1235 = vmatpush.bf16.msrb.mxu0 %v3304_v2  ;;  %1249 = vmatpush.bf16.msrb.mxu1 %v3313_v10 }
 0x108   : > { %1263 = vmatpush.bf16.msrb.mxu2 %v3329_v23  ;;  %1277 = vmatpush.bf16.msrb.mxu3 %v3315_v11 }
 0x10b   : > { %1236 = vmatpush.bf16.msrb.mxu0 %v3327_v21  ;;  %1250 = vmatpush.bf16.msrb.mxu1 %v3335_v26 }
 0x10c   : > { %1264 = vmatpush.bf16.msrb.mxu2 %v3349_v39  ;;  %1278 = vmatpush.bf16.msrb.mxu3 %v3337_v27 }
 0x10f   : > { %1237 = vmatpush.bf16.msrb.mxu0 %v3347_v38  ;;  %1251 = vmatpush.bf16.msrb.mxu1 %v3356_v41 }
 0x110   : > { %1265 = vmatpush.bf16.msrb.mxu2 %v3366_v50  ;;  %1279 = vmatpush.bf16.msrb.mxu3 %v3358_v44 }
 0x16e   : > { %v773_v48 = vpop.f32.mrf.mxu0  ;;  %v787_v52 = vpop.f32.mrf.mxu1 }
 0x16f   : > { %v828_v63 = vadd.f32 %v820_v15, %v773_v48  ;;  %v829_v49 = vadd.f32 %v821_v51, %v787_v52  ;;  %v753_v15 = vld [vmem:[%s3594_s18 + $0x18] sm:$0xff]  ;;  %v822_v48 = vunpack.c.l.bf16 %v751_v14 }
 0x170   : > { %v827_v52 = vunpack.c.h.bf16 %v753_v15 }
 0x171   : > { %v2718_v30 = vmul.f32 -1.442695, %v828_v63  ;;  %v2720_v57 = vmul.f32 -1.442695, %v829_v49 }
 0x173   : > { %2902 = vpow2.f32 %v2718_v30 }
 0x174   : > { %2904 = vpow2.f32 %v2720_v57 }
 0x175   : > { %v815_v1 = vpop.f32.mrf.mxu3  ;;  %v801_v37 = vpop.f32.mrf.mxu2 }
 0x176   : > { %v831_v36 = vadd.f32 %v823_v0, %v815_v1  ;;  %v775_v25 = vpop.f32.mrf.mxu0  ;;  %v789_v62 = vpop.f32.mrf.mxu1  ;;  %v830_v24 = vadd.f32 %v822_v48, %v801_v37 }
 0x177   : > { %v832_v28 = vadd.f32 %v824_v6, %v775_v25  ;;  %v833_v31 = vadd.f32 %v825_v12, %v789_v62  ;;  %v826_v25 = vunpack.c.l.bf16 %v753_v15 }
 0x178   : > { %v2722_v32 = vmul.f32 -1.442695, %v831_v36 }
 0x179   : > { %v2903_v56 = vpop.eup %2902  ;;  %v2719_v53 = vmul.f32 -1.442695, %v832_v28  ;;  %v2721_v7 = vmul.f32 -1.442695, %v833_v31 }
 0x17a   : > { %v2905_v20 = vpop.eup %2904  ;;  %v842_v60 = vadd.f32 1.0, %v2903_v56  ;;  %2906 = vpow2.f32 %v2722_v32 }
 0x17b   : > { %v880_v51 = vadd.f32 1.0, %v2905_v20  ;;  %2908 = vpow2.f32 %v2719_v53 }
 0x17c   : > { %2910 = vrcp.f32 %v842_v60  ;;  %v853_v28 = vand.u32 2147483647, %v842_v60  ;;  %vm849_vm15 = vweird.f32 %v842_v60 }
 0x17d   : > { %2912 = vrcp.f32 %v880_v51  ;;  %v817_v63 = vpop.f32.mrf.mxu3  ;;  %v803_v31 = vpop.f32.mrf.mxu2  ;;  %v893_v37 = vand.u32 2147483648, %v880_v51  ;;  %v891_v48 = vand.u32 2147483647, %v880_v51  ;;  %vm887_vm14 = vweird.f32 %v880_v51 }
 0x17e   : > { %2914 = vpow2.f32 %v2721_v7  ;;  %v835_v0 = vadd.f32 %v827_v52, %v817_v63  ;;  %v855_v7 = vand.u32 2147483648, %v842_v60  ;;  %v834_v15 = vadd.f32 %v826_v25, %v803_v31 }
 0x17f   : > { %v4407_v63 = vstv %s3590_s16  ;;  %vm854_vm1 = vcmp.eq.f32.partialorder %v853_v28, 8.507059e+37  ;;  %v894_v25 = vor.u32 1.1754944e-38, %v893_v37  ;;  %vm892_vm3 = vcmp.eq.f32.partialorder %v891_v48, 8.507059e+37 }
 0x180   : > { %v2907_v49 = vpop.eup %2906  ;;  %v2723_v53 = vmul.f32 -1.442695, %v835_v0  ;;  %vm3617_vm4 = vcmp.lt.s32.totalorder %v4407_v63, %v3456_v19 }
 0x181   : > { %v2909_v30 = vpop.eup %2908  ;;  %v3600_v57 = vadd.f32 1.0, %v2907_v49 }
 0x182   : > { %v2911_v6 = vpop.eup %2910  ;;  %v3602_v12 = vadd.f32 1.0, %v2909_v30 }
 0x183   : > { %v2913_v1 = vpop.eup %2912  ;;  %v845_v36 = vmul.f32 %v2911_v6, %v842_v60  ;;  %2916 = vrcp.f32 %v3600_v57  ;;  %vm850_vm12 = vweird.f32 %v2911_v6  ;;  %vm927_vm6 = vweird.f32 %v3600_v57 }
 0x184   : > { %v2915_v62 = vpop.eup %2914  ;;  %v883_v14 = vmul.f32 %v2913_v1, %v880_v51  ;;  %2918 = vtanh.f32 %v830_v24  ;;  %vm888_vm13 = vweird.f32 %v2913_v1  ;;  %vm851_vm0 = vmor %vm849_vm15, %vm850_vm12  ;;  %vm864_vm7 = vweird.f32 %v3602_v12 }
 0x185   : > { %v846_v32 = vsub.f32 1.0, %v845_v36  ;;  %2920 = vrcp.f32 %v3602_v12  ;;  %v3606_v56 = vadd.f32 1.0, %v2915_v62  ;;  %v856_v36 = vor.u32 1.1754944e-38, %v855_v7  ;;  %vm889_vm2 = vmor %vm887_vm14, %vm888_vm13 }
 0x186   : > { %v884_v20 = vsub.f32 1.0, %v883_v14  ;;  %v931_v19 = vand.u32 2147483647, %v3600_v57 }
 0x187   : > { %v847_v52 = vmul.f32 %v2911_v6, %v846_v32  ;;  %2922 = vrcp.f32 %v3606_v56  ;;  %vm902_vm10 = vweird.f32 %v3606_v56 }
 0x188   : > { %v885_v49 = vmul.f32 %v2913_v1, %v884_v20  ;;  %2924 = vpow2.f32 %v2723_v53 }
 0x189   : > { %v3610_v24 = vpop.eup %2916  ;;  %v848_v30 = vadd.f32 %v2911_v6, %v847_v52  ;;  %2926 = vtanh.f32 %v834_v15 }
 0x18a   : > { %v2919_v0 = vpop.eup %2918  ;;  %v886_v62 = vadd.f32 %v2913_v1, %v885_v49  ;;  %v923_v14 = vmul.f32 %v3610_v24, %v3600_v57  ;;  %vm928_vm9 = vweird.f32 %v3610_v24 }
 0x18b   : > { %v2921_v32 = vpop.eup %2920  ;;  %v852_v31 = vsel %vm851_vm0, %v2911_v6, %v848_v30  ;;  %v933_v6 = vand.u32 2147483648, %v3600_v57  ;;  %vm3640_vm12 = vmor %vm927_vm6, %vm928_vm9  ;;  %vm932_vm0 = vcmp.eq.f32.partialorder %v931_v19, 8.507059e+37 }
 0x18c   : > { %v857_v60 = vsel %vm854_vm1, %v856_v36, %v852_v31  ;;  %v890_v53 = vsel %vm889_vm2, %v2913_v1, %v886_v62  ;;  %v924_v28 = vsub.f32 1.0, %v923_v14  ;;  %v860_v20 = vmul.f32 %v2921_v32, %v3602_v12  ;;  %vm964_vm2 = vmpackc.low %vm3617_vm4, %vm3617_vm4 }
 0x18d   : > { %v2923_v7 = vpop.eup %2922  ;;  %v895_v52 = vsel %vm892_vm3, %v894_v25, %v890_v53  ;;  %v954_v49 = vmul.f32 %v2919_v0, %v857_v60  ;;  %v908_v1 = vand.u32 2147483648, %v3606_v56  ;;  %v868_v36 = vand.u32 2147483647, %v3602_v12 }
 0x18e   : > { %v952_v37 = vmul.f32 %v895_v52, %v3499_v16  ;;  %v925_v48 = vmul.f32 %v3610_v24, %v924_v28  ;;  %v861_v15 = vsub.f32 1.0, %v860_v20  ;;  %v898_v30 = vmul.f32 %v2923_v7, %v3606_v56  ;;  %v2925_v63 = vpop.eup %2924 }
 0x18f   : > { %v870_v0 = vand.u32 2147483648, %v3602_v12  ;;  %vm865_vm8 = vweird.f32 %v2921_v32  ;;  %v2927_v31 = vpop.eup %2926  ;;  %v906_v53 = vand.u32 2147483647, %v3606_v56  ;;  %v921_v28 = vadd.f32 1.0, %v2925_v63 }
 0x190   : > { %v956_v62 = vadd.f32 %v954_v49, %v952_v37  ;;  %v899_v14 = vsub.f32 1.0, %v898_v30  ;;  %v862_v25 = vmul.f32 %v2921_v32, %v861_v15  ;;  %v926_v60 = vadd.f32 %v3610_v24, %v925_v48  ;;  %vm866_vm11 = vmor %vm864_vm7, %vm865_vm8 }
 0x191   : > { %vm903_vm5 = vweird.f32 %v2923_v7  ;;  %v871_v49 = vor.u32 1.1754944e-38, %v870_v0  ;;  %vm869_vm13 = vcmp.eq.f32.partialorder %v868_v36, 8.507059e+37  ;;  %v909_v12 = vor.u32 1.1754944e-38, %v908_v1 }
 0x192   : > { %2928 = vtanh.f32 %v956_v62  ;;  %v900_v20 = vmul.f32 %v2923_v7, %v899_v14  ;;  %v863_v52 = vadd.f32 %v2921_v32, %v862_v25  ;;  %v3647_v15 = vsel %vm3617_vm4, %v956_v62, %v3499_v16  ;;  %vm904_vm14 = vmor %vm902_vm10, %vm903_vm5 }
 0x193   : > { %2930 = vrcp.f32 %v921_v28  ;;  %v930_v57 = vsel %vm3640_vm12, %v3610_v24, %v926_v60  ;;  %v934_v30 = vor.u32 1.1754944e-38, %v933_v6  ;;  %vm907_vm15 = vcmp.eq.f32.partialorder %v906_v53, 8.507059e+37 }
 0x194   : > { %v867_v63 = vsel %vm866_vm11, %v2921_v32, %v863_v52  ;;  %v901_v48 = vadd.f32 %v2923_v7, %v900_v20  ;;  %v946_v37 = vand.u32 2147483647, %v921_v28  ;;  %vm942_vm6 = vweird.f32 %v921_v28 }
 0x195   : > { %v872_v56 = vsel %vm869_vm13, %v871_v49, %v867_v63  ;;  %v935_v62 = vsel %vm932_vm0, %v934_v30, %v930_v57  ;;  %v4424_v49 = vstv %s3590_s16  ;;  %s2748_s16 = sshll.u32 %s3587_s11, 2 }
 0x196   : > { %v905_v0 = vsel %vm904_vm14, %v2923_v7, %v901_v48  ;;  %v955_v32 = vmul.f32 %v2927_v31, %v872_v56  ;;  %vm3658_vm1 = vcmp.lt.s32.totalorder %v4424_v49, %v3512_v40  ;;  %v948_v31 = vand.u32 2147483648, %v921_v28  ;;  %v985_v49 = vld [vmem:[%s3729_s25 + $0x10] sm:$0xff]  ;;  %s3995_s17 = sadd.s32 %s2748_s16, %s1444_s10  ;;  %s2843_s16 = smul.u32 56, %s3587_s11 }
 0x197   : > { %v910_v36 = vsel %vm907_vm15, %v909_v12, %v905_v0  ;;  %vm947_vm8 = vcmp.eq.f32.partialorder %v946_v37, 8.507059e+37  ;;  %vm965_vm9 = vmpackc.low %vm3658_vm1, %vm3658_vm1  ;;  %s2836_s18 = sshll.u32 %s3995_s17, 5 }
 0x198   : > { %v2929_v14 = vpop.eup %2928  ;;  %v953_v16 = vmul.f32 %v910_v36, %v3535_v5  ;;  %v949_v48 = vor.u32 1.1754944e-38, %v948_v31  ;;  %v1057_v31 = vunpack.c.l.bf16 %v985_v49  ;;  %s3999_s19 = scalar_lea.vmem %s3439_s28, %s2836_s18 }
 0x199   : > { %v2931_v25 = vpop.eup %2930  ;;  %v960_v1 = vmul.f32 %v2929_v14, %v935_v62 }
 0x19a   : > { %v957_v20 = vadd.f32 %v955_v32, %v953_v16  ;;  %v938_v52 = vmul.f32 %v2931_v25, %v921_v28  ;;  %vm943_vm3 = vweird.f32 %v2931_v25 }
 0x19b   : > { %v962_v7 = vpack.c.bf16 %v960_v1, %v960_v1  ;;  %vm944_vm7 = vmor %vm942_vm6, %vm943_vm3 }
 0x19c   : > { %2932 = vtanh.f32 %v957_v20  ;;  %v939_v19 = vsub.f32 1.0, %v938_v52  ;;  %v3668_v6 = vsel %vm3658_vm1, %v957_v20, %v3535_v5  ;;  %v984_v52 = vld [vmem:[%s3729_s25 + $0x8] sm:$0xff] }
 0x19d   : > { %v966_v60 = vsel %vm964_vm2, %v962_v7, 0  ;;  %v3681_v0 = vsel %vm964_vm2, %v962_v7, %v3543_v61  ;;  %v983_v61 = vld [vmem:[%s3729_s25] sm:$0xff] }
 0x19e   : > { %v940_v53 = vmul.f32 %v2931_v25, %v939_v19  ;;  %971 = vst [vmem:[%s970_s20] sm:$0xf] %v966_v60  ;;  %v993_v36 = vunpack.c.l.b16 %v3681_v0  ;;  %v1054_v51 = vunpack.c.h.bf16 %v983_v61  ;;  %v1056_v19 = vunpack.c.h.bf16 %v984_v52 }
 0x19f   : > { %v1058_v60 = vunpack.c.h.bf16 %v985_v49 }
 0x1a0   : > { %v941_v63 = vadd.f32 %v2931_v25, %v940_v53 }
 0x1a2   : > { %v2933_v12 = vpop.eup %2932  ;;  %v945_v56 = vsel %vm944_vm7, %v2931_v25, %v941_v63 }
 0x1a3   : > { %v950_v5 = vsel %vm947_vm8, %v949_v48, %v945_v56 }
 0x1a4   : > { %v961_v57 = vmul.f32 %v2933_v12, %v950_v5 }
 0x1a6   : > { %v963_v30 = vpack.c.bf16 %v961_v57, %v961_v57 }
 0x1a8   : > { %v967_v28 = vsel %vm965_vm9, %v963_v30, 0  ;;  %v3687_v32 = vsel %vm965_vm9, %v963_v30, %v3549_v45  ;;  %v1053_v45 = vunpack.c.l.bf16 %v983_v61  ;;  %v986_v61 = vld [vmem:[%s3729_s25 + $0x18] sm:$0xff] }
 0x1a9   : > { %972 = vst [vmem:[%s970_s20 + $0x4] sm:$0xf] %v967_v28  ;;  %v994_v14 = vunpack.c.l.b16 %v3687_v32  ;;  %s2837_s20 = sshll.u32 %s3995_s17, 3 }
 0x1aa   : > { %s1669_s21 = scalar_lea.vmem %s3518_s8, %s2837_s20 }
 0x1ab   : > { %v995_v16 = vpack.c.b16 %v994_v14, %v993_v36 }
 0x1ad   : > { %1005 = vmatmul.bf16.vlgmr.msra.gmra.mxu0 %v995_v16  ;;  %1019 = vmatmul.bf16.vlgmr.msra.gmra.mxu1 %v995_v16 }
 0x1ae   : > { %1033 = vmatmul.bf16.vlgmr.msra.gmra.mxu2 %v995_v16  ;;  %1047 = vmatmul.bf16.vlgmr.msra.gmra.mxu3 %v995_v16 }
 0x1af   : > { %1463 = vmatpush.bf16.msra.mxu0 %v3206_v4  ;;  %1477 = vmatpush.bf16.msra.mxu1 %v3211_v8 }
 0x1b0   : > { %1491 = vmatpush.bf16.msra.mxu2 %v3233_v22  ;;  %1505 = vmatpush.bf16.msra.mxu3 %v3213_v9 }
 0x1b3   : > { %1464 = vmatpush.bf16.msra.mxu0 %v3219_v13  ;;  %1478 = vmatpush.bf16.msra.mxu1 %v3226_v17 }
 0x1b4   : > { %1492 = vmatpush.bf16.msra.mxu2 %v3254_v35  ;;  %1506 = vmatpush.bf16.msra.mxu3 %v3228_v18 }
 0x1b7   : > { %1465 = vmatpush.bf16.msra.mxu0 %v3243_v29  ;;  %1479 = vmatpush.bf16.msra.mxu1 %v3250_v33 }
 0x1b8   : > { %1493 = vmatpush.bf16.msra.mxu2 %v3266_v43  ;;  %1507 = vmatpush.bf16.msra.mxu3 %v3252_v34 }
 0x1bb   : > { %1466 = vmatpush.bf16.msra.mxu0 %v3264_v42  ;;  %1480 = vmatpush.bf16.msra.mxu1 %v3272_v46 }
 0x1bc   : > { %1494 = vmatpush.bf16.msra.mxu2 %v3286_v55  ;;  %1508 = vmatpush.bf16.msra.mxu3 %v3274_v47 }
 0x1bf   : > { %1467 = vmatpush.bf16.msra.mxu0 %v3284_v54  ;;  %1481 = vmatpush.bf16.msra.mxu1 %v3292_v58 }
 0x1c0   : > { %1495 = vmatpush.bf16.msra.mxu2 %v3306_v3  ;;  %1509 = vmatpush.bf16.msra.mxu3 %v3294_v59 }
 0x1c3   : > { %1468 = vmatpush.bf16.msra.mxu0 %v3304_v2  ;;  %1482 = vmatpush.bf16.msra.mxu1 %v3313_v10 }
 0x1c4   : > { %1496 = vmatpush.bf16.msra.mxu2 %v3329_v23  ;;  %1510 = vmatpush.bf16.msra.mxu3 %v3315_v11 }
 0x1c7   : > { %1469 = vmatpush.bf16.msra.mxu0 %v3327_v21  ;;  %1483 = vmatpush.bf16.msra.mxu1 %v3335_v26 }
 0x1c8   : > { %1497 = vmatpush.bf16.msra.mxu2 %v3349_v39  ;;  %1511 = vmatpush.bf16.msra.mxu3 %v3337_v27 }
 0x1cb   : > { %1470 = vmatpush.bf16.msra.mxu0 %v3347_v38  ;;  %1484 = vmatpush.bf16.msra.mxu1 %v3356_v41 }
 0x1cc   : > { %1498 = vmatpush.bf16.msra.mxu2 %v3366_v50  ;;  %1512 = vmatpush.bf16.msra.mxu3 %v3358_v44 }
 0x22a   : > { %v1006_v62 = vpop.f32.mrf.mxu0  ;;  %v1020_v25 = vpop.f32.mrf.mxu1 }
 0x22b   : > { %v1061_v1 = vadd.f32 %v1053_v45, %v1006_v62  ;;  %v1062_v20 = vadd.f32 %v1054_v51, %v1020_v25  ;;  %v1055_v51 = vunpack.c.l.bf16 %v984_v52  ;;  %v1060_v62 = vunpack.c.h.bf16 %v986_v61 }
 0x22d   : > { %v2729_v24 = vmul.f32 -1.442695, %v1061_v1  ;;  %v2731_v7 = vmul.f32 -1.442695, %v1062_v20 }
 0x22f   : > { %2934 = vpow2.f32 %v2729_v24 }
 0x230   : > { %2936 = vpow2.f32 %v2731_v7 }
 0x231   : > { %v1048_v53 = vpop.f32.mrf.mxu3  ;;  %v1034_v14 = vpop.f32.mrf.mxu2 }
 0x232   : > { %v1064_v37 = vadd.f32 %v1056_v19, %v1048_v53  ;;  %v1008_v63 = vpop.f32.mrf.mxu0  ;;  %v1022_v48 = vpop.f32.mrf.mxu1  ;;  %v1063_v20 = vadd.f32 %v1055_v51, %v1034_v14 }
 0x233   : > { %v1065_v12 = vadd.f32 %v1057_v31, %v1008_v63  ;;  %v1066_v56 = vadd.f32 %v1058_v60, %v1022_v48 }
 0x234   : > { %v2733_v5 = vmul.f32 -1.442695, %v1064_v37  ;;  %v1059_v37 = vunpack.c.l.bf16 %v986_v61 }
 0x235   : > { %v2935_v57 = vpop.eup %2934  ;;  %v2730_v30 = vmul.f32 -1.442695, %v1065_v12  ;;  %v2732_v16 = vmul.f32 -1.442695, %v1066_v56 }
 0x236   : > { %v2937_v28 = vpop.eup %2936  ;;  %v1075_v36 = vadd.f32 1.0, %v2935_v57  ;;  %2938 = vpow2.f32 %v2733_v5 }
 0x237   : > { %v1113_v45 = vadd.f32 1.0, %v2937_v28  ;;  %2940 = vpow2.f32 %v2730_v30 }
 0x238   : > { %2942 = vrcp.f32 %v1075_v36  ;;  %v1086_v48 = vand.u32 2147483647, %v1075_v36  ;;  %v1088_v14 = vand.u32 2147483648, %v1075_v36  ;;  %vm1082_vm11 = vweird.f32 %v1075_v36 }
 0x239   : > { %2944 = vrcp.f32 %v1113_v45  ;;  %v1050_v25 = vpop.f32.mrf.mxu3  ;;  %v1036_v12 = vpop.f32.mrf.mxu2  ;;  %v1126_v28 = vand.u32 2147483648, %v1113_v45  ;;  %vm1120_vm10 = vweird.f32 %v1113_v45 }
 0x23a   : > { %2946 = vpow2.f32 %v2732_v16  ;;  %v1068_v7 = vadd.f32 %v1060_v62, %v1050_v25  ;;  %v1124_v16 = vand.u32 2147483647, %v1113_v45  ;;  %v1067_v61 = vadd.f32 %v1059_v37, %v1036_v12 }
 0x23b   : > { %v4410_v62 = vstv %s3725_s23  ;;  %vm1087_vm13 = vcmp.eq.f32.partialorder %v1086_v48, 8.507059e+37  ;;  %v1127_v37 = vor.u32 1.1754944e-38, %v1126_v28 }
 0x23c   : > { %v2939_v1 = vpop.eup %2938  ;;  %v2734_v57 = vmul.f32 -1.442695, %v1068_v7  ;;  %v1089_v7 = vor.u32 1.1754944e-38, %v1088_v14  ;;  %vm1125_vm15 = vcmp.eq.f32.partialorder %v1124_v16, 8.507059e+37 }
 0x23d   : > { %v2941_v49 = vpop.eup %2940  ;;  %v3735_v24 = vadd.f32 1.0, %v2939_v1 }
 0x23e   : > { %v2943_v19 = vpop.eup %2942  ;;  %v3737_v31 = vadd.f32 1.0, %v2941_v49 }
 0x23f   : > { %v2945_v60 = vpop.eup %2944  ;;  %v1078_v53 = vmul.f32 %v2943_v19, %v1075_v36  ;;  %2948 = vrcp.f32 %v3735_v24  ;;  %vm1083_vm4 = vweird.f32 %v2943_v19  ;;  %vm1160_vm1 = vweird.f32 %v3735_v24 }
 0x240   : > { %v2947_v63 = vpop.eup %2946  ;;  %v1116_v52 = vmul.f32 %v2945_v60, %v1113_v45  ;;  %2950 = vtanh.f32 %v1063_v20  ;;  %vm1121_vm5 = vweird.f32 %v2945_v60  ;;  %vm1084_vm12 = vmor %vm1082_vm11, %vm1083_vm4  ;;  %vm1097_vm2 = vweird.f32 %v3737_v31 }
 0x241   : > { %v1079_v56 = vsub.f32 1.0, %v1078_v53  ;;  %2952 = vrcp.f32 %v3737_v31  ;;  %v3741_v5 = vadd.f32 1.0, %v2947_v63  ;;  %vm1122_vm14 = vmor %vm1120_vm10, %vm1121_vm5 }
 0x242   : > { %v1117_v30 = vsub.f32 1.0, %v1116_v52 }
 0x243   : > { %v1080_v51 = vmul.f32 %v2943_v19, %v1079_v56  ;;  %2954 = vrcp.f32 %v3741_v5  ;;  %v4427_v56 = vld [vmem:[#allocation4_spill] sm:$0xff]  ;;  %vm1135_vm8 = vweird.f32 %v3741_v5 }
 0x244   : > { %v1118_v25 = vmul.f32 %v2945_v60, %v1117_v30  ;;  %2956 = vpow2.f32 %v2734_v57  ;;  %vm3752_vm0 = vcmp.lt.s32.totalorder %v4410_v62, %v4427_v56  ;;  %v1164_v56 = vand.u32 2147483647, %v3735_v24 }
 0x245   : > { %v3745_v1 = vpop.eup %2948  ;;  %v1081_v20 = vadd.f32 %v2943_v19, %v1080_v51  ;;  %2958 = vtanh.f32 %v1067_v61 }
 0x246   : > { %v2951_v49 = vpop.eup %2950  ;;  %v1119_v53 = vadd.f32 %v2945_v60, %v1118_v25  ;;  %v1156_v63 = vmul.f32 %v3745_v1, %v3735_v24  ;;  %vm1161_vm6 = vweird.f32 %v3745_v1 }
 0x247   : > { %v2953_v52 = vpop.eup %2952  ;;  %v1085_v12 = vsel %vm1084_vm12, %v2943_v19, %v1081_v20  ;;  %v1166_v19 = vand.u32 2147483648, %v3735_v24  ;;  %vm3775_vm4 = vmor %vm1160_vm1, %vm1161_vm6  ;;  %vm1165_vm12 = vcmp.eq.f32.partialorder %v1164_v56, 8.507059e+37 }
 0x248   : > { %v1090_v36 = vsel %vm1087_vm13, %v1089_v7, %v1085_v12  ;;  %v1123_v57 = vsel %vm1122_vm14, %v2945_v60, %v1119_v53  ;;  %v1157_v48 = vsub.f32 1.0, %v1156_v63  ;;  %v1093_v30 = vmul.f32 %v2953_v52, %v3737_v31  ;;  %vm1197_vm14 = vmpackc.low %vm3752_vm0, %vm3752_vm0 }
 0x249   : > { %v2955_v14 = vpop.eup %2954  ;;  %v1128_v51 = vsel %vm1125_vm15, %v1127_v37, %v1123_v57  ;;  %v1187_v25 = vmul.f32 %v2951_v49, %v1090_v36  ;;  %v1141_v60 = vand.u32 2147483648, %v3741_v5  ;;  %v1101_v7 = vand.u32 2147483647, %v3737_v31 }
 0x24a   : > { %v1185_v28 = vmul.f32 %v1128_v51, %v3647_v15  ;;  %v1158_v16 = vmul.f32 %v3745_v1, %v1157_v48  ;;  %v1094_v61 = vsub.f32 1.0, %v1093_v30  ;;  %v1131_v20 = vmul.f32 %v2955_v14, %v3741_v5  ;;  %v2957_v62 = vpop.eup %2956 }
 0x24b   : > { %v1103_v49 = vand.u32 2147483648, %v3737_v31  ;;  %vm1098_vm3 = vweird.f32 %v2953_v52  ;;  %v2959_v12 = vpop.eup %2958  ;;  %v1139_v57 = vand.u32 2147483647, %v3741_v5  ;;  %v1154_v48 = vadd.f32 1.0, %v2957_v62 }
 0x24c   : > { %v1189_v53 = vadd.f32 %v1187_v25, %v1185_v28  ;;  %v1132_v63 = vsub.f32 1.0, %v1131_v20  ;;  %v1095_v37 = vmul.f32 %v2953_v52, %v1094_v61  ;;  %v1159_v36 = vadd.f32 %v3745_v1, %v1158_v16  ;;  %vm1099_vm9 = vmor %vm1097_vm2, %vm1098_vm3 }
 0x24d   : > { %vm1136_vm7 = vweird.f32 %v2955_v14  ;;  %v1104_v25 = vor.u32 1.1754944e-38, %v1103_v49  ;;  %vm1102_vm5 = vcmp.eq.f32.partialorder %v1101_v7, 8.507059e+37  ;;  %v1142_v31 = vor.u32 1.1754944e-38, %v1141_v60 }
 0x24e   : > { %2960 = vtanh.f32 %v1189_v53  ;;  %v1133_v30 = vmul.f32 %v2955_v14, %v1132_v63  ;;  %v1096_v51 = vadd.f32 %v2953_v52, %v1095_v37  ;;  %v3782_v61 = vsel %vm3752_vm0, %v1189_v53, %v3647_v15  ;;  %vm1137_vm10 = vmor %vm1135_vm8, %vm1136_vm7 }
 0x24f   : > { %2962 = vrcp.f32 %v1154_v48  ;;  %v1163_v24 = vsel %vm3775_vm4, %v3745_v1, %v1159_v36  ;;  %v1167_v20 = vor.u32 1.1754944e-38, %v1166_v19  ;;  %vm1140_vm11 = vcmp.eq.f32.partialorder %v1139_v57, 8.507059e+37 }
 0x250   : > { %v1100_v62 = vsel %vm1099_vm9, %v2953_v52, %v1096_v51  ;;  %v1134_v16 = vadd.f32 %v2955_v14, %v1133_v30  ;;  %v1179_v28 = vand.u32 2147483647, %v1154_v48  ;;  %vm1175_vm1 = vweird.f32 %v1154_v48 }
 0x251   : > { %v1105_v5 = vsel %vm1102_vm5, %v1104_v25, %v1100_v62  ;;  %v1168_v53 = vsel %vm1165_vm12, %v1167_v20, %v1163_v24  ;;  %v4432_v25 = vstv %s3725_s23  ;;  %s2759_s23 = sshll.u32 %s3140_s12, 1 }
 0x252   : > { %v1138_v49 = vsel %vm1137_vm10, %v2955_v14, %v1134_v16  ;;  %v1188_v52 = vmul.f32 %v2959_v12, %v1105_v5  ;;  %vm3793_vm13 = vcmp.lt.s32.totalorder %v4432_v25, %v3512_v40  ;;  %v1181_v12 = vand.u32 2147483648, %v1154_v48  ;;  %v1218_v25 = vld [vmem:[%s3864_s6 + $0x10] sm:$0xff]  ;;  %s4130_s24 = sadd.s32 %s2759_s23, %s1676_s22 }
 0x253   : > { %v1143_v7 = vsel %vm1140_vm11, %v1142_v31, %v1138_v49  ;;  %vm1180_vm3 = vcmp.eq.f32.partialorder %v1179_v28, 8.507059e+37  ;;  %vm1198_vm6 = vmpackc.low %vm3793_vm13, %vm3793_vm13  ;;  %s2838_s25 = sshll.u32 %s4130_s24, 5 }
 0x254   : > { %v2961_v63 = vpop.eup %2960  ;;  %v1186_v15 = vmul.f32 %v1143_v7, %v3668_v6  ;;  %v1182_v16 = vor.u32 1.1754944e-38, %v1181_v12  ;;  %v1290_v12 = vunpack.c.l.bf16 %v1218_v25  ;;  %s4134_s26 = scalar_lea.vmem %s3439_s28, %s2838_s25 }
 0x255   : > { %v2963_v37 = vpop.eup %2962  ;;  %v1193_v60 = vmul.f32 %v2961_v63, %v1168_v53 }
 0x256   : > { %v1190_v30 = vadd.f32 %v1188_v52, %v1186_v15  ;;  %v1171_v51 = vmul.f32 %v2963_v37, %v1154_v48  ;;  %vm1176_vm15 = vweird.f32 %v2963_v37 }
 0x257   : > { %v1195_v14 = vpack.c.bf16 %v1193_v60, %v1193_v60  ;;  %vm1177_vm2 = vmor %vm1175_vm1, %vm1176_vm15 }
 0x258   : > { %2964 = vtanh.f32 %v1190_v30  ;;  %v1172_v56 = vsub.f32 1.0, %v1171_v51  ;;  %v3803_v19 = vsel %vm3793_vm13, %v1190_v30, %v3668_v6  ;;  %v1217_v51 = vld [vmem:[%s3864_s6 + $0x8] sm:$0xff] }
 0x259   : > { %v1199_v36 = vsel %vm1197_vm14, %v1195_v14, 0  ;;  %v3816_v49 = vsel %vm1197_vm14, %v1195_v14, %v3681_v0  ;;  %v1216_v0 = vld [vmem:[%s3864_s6] sm:$0xff] }
 0x25a   : > { %v1173_v57 = vmul.f32 %v2963_v37, %v1172_v56  ;;  %1204 = vst [vmem:[%s1203_s27] sm:$0xf] %v1199_v36  ;;  %v1226_v7 = vunpack.c.l.b16 %v3816_v49  ;;  %v1287_v45 = vunpack.c.h.bf16 %v1216_v0  ;;  %v1289_v56 = vunpack.c.h.bf16 %v1217_v51 }
 0x25b   : > { %v1291_v36 = vunpack.c.h.bf16 %v1218_v25 }
 0x25c   : > { %v1174_v62 = vadd.f32 %v2963_v37, %v1173_v57 }
 0x25e   : > { %v2965_v31 = vpop.eup %2964  ;;  %v1178_v5 = vsel %vm1177_vm2, %v2963_v37, %v1174_v62 }
 0x25f   : > { %v1183_v6 = vsel %vm1180_vm3, %v1182_v16, %v1178_v5 }
 0x260   : > { %v1194_v24 = vmul.f32 %v2965_v31, %v1183_v6 }
 0x262   : > { %v1196_v20 = vpack.c.bf16 %v1194_v24, %v1194_v24 }
 0x264   : > { %v1200_v48 = vsel %vm1198_vm6, %v1196_v20, 0  ;;  %v3822_v52 = vsel %vm1198_vm6, %v1196_v20, %v3687_v32  ;;  %v1286_v32 = vunpack.c.l.bf16 %v1216_v0  ;;  %v1219_v0 = vld [vmem:[%s3864_s6 + $0x18] sm:$0xff] }
 0x265   : > { %1205 = vst [vmem:[%s1203_s27 + $0x4] sm:$0xf] %v1200_v48  ;;  %v1227_v63 = vunpack.c.l.b16 %v3822_v52  ;;  %s2839_s27 = sshll.u32 %s4130_s24, 3 }
 0x266   : > { %s1902_s29 = scalar_lea.vmem %s3518_s8, %s2839_s27 }
 0x267   : > { %v1228_v15 = vpack.c.b16 %v1227_v63, %v1226_v7 }
 0x269   : > { %1238 = vmatmul.bf16.vlgmr.msrb.gmra.mxu0 %v1228_v15  ;;  %1252 = vmatmul.bf16.vlgmr.msrb.gmra.mxu1 %v1228_v15 }
 0x26a   : > { %1266 = vmatmul.bf16.vlgmr.msrb.gmra.mxu2 %v1228_v15  ;;  %1280 = vmatmul.bf16.vlgmr.msrb.gmra.mxu3 %v1228_v15 }
 0x26b   : > { %1696 = vmatpush.bf16.msrb.mxu0 %v3206_v4  ;;  %1710 = vmatpush.bf16.msrb.mxu1 %v3211_v8 }
 0x26c   : > { %1724 = vmatpush.bf16.msrb.mxu2 %v3233_v22  ;;  %1738 = vmatpush.bf16.msrb.mxu3 %v3213_v9 }
 0x26f   : > { %1697 = vmatpush.bf16.msrb.mxu0 %v3219_v13  ;;  %1711 = vmatpush.bf16.msrb.mxu1 %v3226_v17 }
 0x270   : > { %1725 = vmatpush.bf16.msrb.mxu2 %v3254_v35  ;;  %1739 = vmatpush.bf16.msrb.mxu3 %v3228_v18 }
 0x273   : > { %1698 = vmatpush.bf16.msrb.mxu0 %v3243_v29  ;;  %1712 = vmatpush.bf16.msrb.mxu1 %v3250_v33 }
 0x274   : > { %1726 = vmatpush.bf16.msrb.mxu2 %v3266_v43  ;;  %1740 = vmatpush.bf16.msrb.mxu3 %v3252_v34 }
 0x277   : > { %1699 = vmatpush.bf16.msrb.mxu0 %v3264_v42  ;;  %1713 = vmatpush.bf16.msrb.mxu1 %v3272_v46 }
 0x278   : > { %1727 = vmatpush.bf16.msrb.mxu2 %v3286_v55  ;;  %1741 = vmatpush.bf16.msrb.mxu3 %v3274_v47 }
 0x27b   : > { %1700 = vmatpush.bf16.msrb.mxu0 %v3284_v54  ;;  %1714 = vmatpush.bf16.msrb.mxu1 %v3292_v58 }
 0x27c   : > { %1728 = vmatpush.bf16.msrb.mxu2 %v3306_v3  ;;  %1742 = vmatpush.bf16.msrb.mxu3 %v3294_v59 }
 0x27f   : > { %1701 = vmatpush.bf16.msrb.mxu0 %v3304_v2  ;;  %1715 = vmatpush.bf16.msrb.mxu1 %v3313_v10 }
 0x280   : > { %1729 = vmatpush.bf16.msrb.mxu2 %v3329_v23  ;;  %1743 = vmatpush.bf16.msrb.mxu3 %v3315_v11 }
 0x283   : > { %1702 = vmatpush.bf16.msrb.mxu0 %v3327_v21  ;;  %1716 = vmatpush.bf16.msrb.mxu1 %v3335_v26 }
 0x284   : > { %1730 = vmatpush.bf16.msrb.mxu2 %v3349_v39  ;;  %1744 = vmatpush.bf16.msrb.mxu3 %v3337_v27 }
 0x287   : > { %1703 = vmatpush.bf16.msrb.mxu0 %v3347_v38  ;;  %1717 = vmatpush.bf16.msrb.mxu1 %v3356_v41 }
 0x288   : > { %1731 = vmatpush.bf16.msrb.mxu2 %v3366_v50  ;;  %1745 = vmatpush.bf16.msrb.mxu3 %v3358_v44 }
 0x2e6   : > { %v1239_v53 = vpop.f32.mrf.mxu0  ;;  %v1253_v37 = vpop.f32.mrf.mxu1 }
 0x2e7   : > { %v1294_v60 = vadd.f32 %v1286_v32, %v1239_v53  ;;  %v1295_v30 = vadd.f32 %v1287_v45, %v1253_v37  ;;  %v1288_v45 = vunpack.c.l.bf16 %v1217_v51  ;;  %v1293_v53 = vunpack.c.h.bf16 %v1219_v0 }
 0x2e9   : > { %v2740_v1 = vmul.f32 -1.442695, %v1294_v60  ;;  %v2742_v14 = vmul.f32 -1.442695, %v1295_v30 }
 0x2eb   : > { %2966 = vpow2.f32 %v2740_v1 }
 0x2ec   : > { %2968 = vpow2.f32 %v2742_v14 }
 0x2ed   : > { %v1281_v57 = vpop.f32.mrf.mxu3  ;;  %v1267_v63 = vpop.f32.mrf.mxu2 }
 0x2ee   : > { %v1297_v28 = vadd.f32 %v1289_v56, %v1281_v57  ;;  %v1241_v62 = vpop.f32.mrf.mxu0  ;;  %v1255_v16 = vpop.f32.mrf.mxu1  ;;  %v1296_v30 = vadd.f32 %v1288_v45, %v1267_v63 }
 0x2ef   : > { %v1298_v31 = vadd.f32 %v1290_v12, %v1241_v62  ;;  %v1299_v5 = vadd.f32 %v1291_v36, %v1255_v16 }
 0x2f0   : > { %v2744_v6 = vmul.f32 -1.442695, %v1297_v28  ;;  %v1292_v28 = vunpack.c.l.bf16 %v1219_v0 }
 0x2f1   : > { %v2967_v24 = vpop.eup %2966  ;;  %v2741_v20 = vmul.f32 -1.442695, %v1298_v31  ;;  %v2743_v15 = vmul.f32 -1.442695, %v1299_v5 }
 0x2f2   : > { %v2969_v48 = vpop.eup %2968  ;;  %v1308_v7 = vadd.f32 1.0, %v2967_v24  ;;  %2970 = vpow2.f32 %v2744_v6 }
 0x2f3   : > { %v1346_v32 = vadd.f32 1.0, %v2969_v48  ;;  %2972 = vpow2.f32 %v2741_v20 }
 0x2f4   : > { %2974 = vrcp.f32 %v1308_v7  ;;  %v1319_v16 = vand.u32 2147483647, %v1308_v7  ;;  %v1321_v63 = vand.u32 2147483648, %v1308_v7  ;;  %vm1315_vm9 = vweird.f32 %v1308_v7 }
 0x2f5   : > { %2976 = vrcp.f32 %v1346_v32  ;;  %v1283_v37 = vpop.f32.mrf.mxu3  ;;  %v1269_v31 = vpop.f32.mrf.mxu2  ;;  %v1359_v48 = vand.u32 2147483648, %v1346_v32  ;;  %vm1353_vm8 = vweird.f32 %v1346_v32 }
 0x2f6   : > { %2978 = vpow2.f32 %v2743_v15  ;;  %v1301_v14 = vadd.f32 %v1293_v53, %v1283_v37  ;;  %v1357_v15 = vand.u32 2147483647, %v1346_v32  ;;  %v1300_v0 = vadd.f32 %v1292_v28, %v1269_v31 }
 0x2f7   : > { %v4411_v53 = vstv %s3860_s4  ;;  %vm1320_vm5 = vcmp.eq.f32.partialorder %v1319_v16, 8.507059e+37  ;;  %v1360_v28 = vor.u32 1.1754944e-38, %v1359_v48 }
 0x2f8   : > { %v2971_v60 = vpop.eup %2970  ;;  %v2745_v24 = vmul.f32 -1.442695, %v1301_v14  ;;  %v1322_v14 = vor.u32 1.1754944e-38, %v1321_v63  ;;  %vm1358_vm11 = vcmp.eq.f32.partialorder %v1357_v15, 8.507059e+37 }
 0x2f9   : > { %v2973_v25 = vpop.eup %2972  ;;  %v3870_v1 = vadd.f32 1.0, %v2971_v60 }
 0x2fa   : > { %v2975_v56 = vpop.eup %2974  ;;  %v3872_v12 = vadd.f32 1.0, %v2973_v25 }
 0x2fb   : > { %v2977_v36 = vpop.eup %2976  ;;  %v1311_v57 = vmul.f32 %v2975_v56, %v1308_v7  ;;  %2980 = vrcp.f32 %v3870_v1  ;;  %vm1316_vm0 = vweird.f32 %v2975_v56  ;;  %vm1393_vm13 = vweird.f32 %v3870_v1 }
 0x2fc   : > { %v2979_v62 = vpop.eup %2978  ;;  %v1349_v51 = vmul.f32 %v2977_v36, %v1346_v32  ;;  %2982 = vtanh.f32 %v1296_v30  ;;  %vm1354_vm7 = vweird.f32 %v2977_v36  ;;  %vm1317_vm4 = vmor %vm1315_vm9, %vm1316_vm0  ;;  %vm1330_vm14 = vweird.f32 %v3872_v12 }
 0x2fd   : > { %v1312_v5 = vsub.f32 1.0, %v1311_v57  ;;  %2984 = vrcp.f32 %v3872_v12  ;;  %v3876_v6 = vadd.f32 1.0, %v2979_v62  ;;  %vm1355_vm10 = vmor %vm1353_vm8, %vm1354_vm7 }
 0x2fe   : > { %v1350_v20 = vsub.f32 1.0, %v1349_v51 }
 0x2ff   : > { %v1313_v45 = vmul.f32 %v2975_v56, %v1312_v5  ;;  %2986 = vrcp.f32 %v3876_v6  ;;  %v4435_v5 = vld [vmem:[#allocation4_spill] sm:$0xff]  ;;  %vm1368_vm3 = vweird.f32 %v3876_v6 }
 0x300   : > { %v1351_v37 = vmul.f32 %v2977_v36, %v1350_v20  ;;  %2988 = vpow2.f32 %v2745_v24  ;;  %vm3887_vm12 = vcmp.lt.s32.totalorder %v4411_v53, %v4435_v5  ;;  %v1397_v5 = vand.u32 2147483647, %v3870_v1 }
 0x301   : > { %v3880_v60 = vpop.eup %2980  ;;  %v1314_v30 = vadd.f32 %v2975_v56, %v1313_v45  ;;  %2990 = vtanh.f32 %v1300_v0 }
 0x302   : > { %v2983_v25 = vpop.eup %2982  ;;  %v1352_v57 = vadd.f32 %v2977_v36, %v1351_v37  ;;  %v1389_v62 = vmul.f32 %v3880_v60, %v3870_v1  ;;  %vm1394_vm1 = vweird.f32 %v3880_v60 }
 0x303   : > { %v2985_v51 = vpop.eup %2984  ;;  %v1318_v31 = vsel %vm1317_vm4, %v2975_v56, %v1314_v30  ;;  %v1399_v56 = vand.u32 2147483648, %v3870_v1  ;;  %vm3910_vm0 = vmor %vm1393_vm13, %vm1394_vm1  ;;  %vm1398_vm4 = vcmp.eq.f32.partialorder %v1397_v5, 8.507059e+37 }
 0x304   : > { %v1323_v7 = vsel %vm1320_vm5, %v1322_v14, %v1318_v31  ;;  %v1356_v24 = vsel %vm1355_vm10, %v2977_v36, %v1352_v57  ;;  %v1390_v16 = vsub.f32 1.0, %v1389_v62  ;;  %v1326_v20 = vmul.f32 %v2985_v51, %v3872_v12  ;;  %vm1430_vm10 = vmpackc.low %vm3887_vm12, %vm3887_vm12 }
 0x305   : > { %v2987_v63 = vpop.eup %2986  ;;  %v1361_v45 = vsel %vm1358_vm11, %v1360_v28, %v1356_v24  ;;  %v1420_v37 = vmul.f32 %v2983_v25, %v1323_v7  ;;  %v1374_v36 = vand.u32 2147483648, %v3876_v6  ;;  %v1334_v14 = vand.u32 2147483647, %v3872_v12 }
 0x306   : > { %v1418_v48 = vmul.f32 %v1361_v45, %v3782_v61  ;;  %v1391_v15 = vmul.f32 %v3880_v60, %v1390_v16  ;;  %v1327_v0 = vsub.f32 1.0, %v1326_v20  ;;  %v1364_v30 = vmul.f32 %v2987_v63, %v3876_v6  ;;  %v2989_v53 = vpop.eup %2988 }
 0x307   : > { %v1336_v25 = vand.u32 2147483648, %v3872_v12  ;;  %vm1331_vm15 = vweird.f32 %v2985_v51  ;;  %v2991_v31 = vpop.eup %2990  ;;  %v1372_v24 = vand.u32 2147483647, %v3876_v6  ;;  %v1387_v16 = vadd.f32 1.0, %v2989_v53 }
 0x308   : > { %v1422_v57 = vadd.f32 %v1420_v37, %v1418_v48  ;;  %v1365_v62 = vsub.f32 1.0, %v1364_v30  ;;  %v1328_v28 = vmul.f32 %v2985_v51, %v1327_v0  ;;  %v1392_v7 = vadd.f32 %v3880_v60, %v1391_v15  ;;  %vm1332_vm6 = vmor %vm1330_vm14, %vm1331_vm15 }
 0x309   : > { %vm1369_vm2 = vweird.f32 %v2987_v63  ;;  %v1337_v37 = vor.u32 1.1754944e-38, %v1336_v25  ;;  %vm1335_vm7 = vcmp.eq.f32.partialorder %v1334_v14, 8.507059e+37  ;;  %v1375_v12 = vor.u32 1.1754944e-38, %v1374_v36 }
 0x30a   : > { %2992 = vtanh.f32 %v1422_v57  ;;  %v1366_v20 = vmul.f32 %v2987_v63, %v1365_v62  ;;  %v1329_v45 = vadd.f32 %v2985_v51, %v1328_v28  ;;  %v3917_v0 = vsel %vm3887_vm12, %v1422_v57, %v3782_v61  ;;  %vm1370_vm8 = vmor %vm1368_vm3, %vm1369_vm2 }
 0x30b   : > { %2994 = vrcp.f32 %v1387_v16  ;;  %v1396_v1 = vsel %vm3910_vm0, %v3880_v60, %v1392_v7  ;;  %v1400_v30 = vor.u32 1.1754944e-38, %v1399_v56  ;;  %vm1373_vm9 = vcmp.eq.f32.partialorder %v1372_v24, 8.507059e+37 }
 0x30c   : > { %v1333_v53 = vsel %vm1332_vm6, %v2985_v51, %v1329_v45  ;;  %v1367_v15 = vadd.f32 %v2987_v63, %v1366_v20  ;;  %v1412_v48 = vand.u32 2147483647, %v1387_v16  ;;  %vm1408_vm13 = vweird.f32 %v1387_v16 }
 0x30d   : > { %v1338_v6 = vsel %vm1335_vm7, %v1337_v37, %v1333_v53  ;;  %v1401_v57 = vsel %vm1398_vm4, %v1400_v30, %v1396_v1  ;;  %v4440_v37 = vstv %s3860_s4  ;;  %s4233_s4 = sadd.s32 %s3140_s12, %s1909_s30 }
 0x30e   : > { %v1371_v25 = vsel %vm1370_vm8, %v2987_v63, %v1367_v15  ;;  %v1421_v51 = vmul.f32 %v2991_v31, %v1338_v6  ;;  %vm3928_vm5 = vcmp.lt.s32.totalorder %v4440_v37, %v3512_v40  ;;  %v1414_v31 = vand.u32 2147483648, %v1387_v16  ;;  %v1451_v37 = vld [vmem:[%s3999_s19 + $0x10] sm:$0xff]  ;;  %s2840_s5 = sshll.u32 %s4233_s4, 5  ;;  %s2841_s12 = sshll.u32 %s4233_s4, 3 }
 0x30f   : > { %v1376_v14 = vsel %vm1373_vm9, %v1375_v12, %v1371_v25  ;;  %vm1413_vm15 = vcmp.eq.f32.partialorder %v1412_v48, 8.507059e+37  ;;  %vm1431_vm1 = vmpackc.low %vm3928_vm5, %vm3928_vm5  ;;  %s4237_s6 = scalar_lea.vmem %s3439_s28, %s2840_s5  ;;  %s2134_s7 = scalar_lea.vmem %s3518_s8, %s2841_s12 }
 0x310   : > { %v2993_v62 = vpop.eup %2992  ;;  %v1419_v61 = vmul.f32 %v1376_v14, %v3803_v19  ;;  %v1415_v15 = vor.u32 1.1754944e-38, %v1414_v31  ;;  %v1523_v31 = vunpack.c.l.bf16 %v1451_v37 }
 0x311   : > { %v2995_v28 = vpop.eup %2994  ;;  %v1426_v36 = vmul.f32 %v2993_v62, %v1401_v57 }
 0x312   : > { %v1423_v20 = vadd.f32 %v1421_v51, %v1419_v61  ;;  %v1404_v45 = vmul.f32 %v2995_v28, %v1387_v16  ;;  %vm1409_vm11 = vweird.f32 %v2995_v28 }
 0x313   : > { %v1428_v63 = vpack.c.bf16 %v1426_v36, %v1426_v36  ;;  %vm1410_vm14 = vmor %vm1408_vm13, %vm1409_vm11 }
 0x314   : > { %2996 = vtanh.f32 %v1423_v20  ;;  %v1405_v5 = vsub.f32 1.0, %v1404_v45  ;;  %v3938_v56 = vsel %vm3928_vm5, %v1423_v20, %v3803_v19  ;;  %v1450_v45 = vld [vmem:[%s3999_s19 + $0x8] sm:$0xff] }
 0x315   : > { %v1432_v7 = vsel %vm1430_vm10, %v1428_v63, 0  ;;  %v3951_v25 = vsel %vm1430_vm10, %v1428_v63, %v3816_v49  ;;  %v1449_v49 = vld [vmem:[%s3999_s19] sm:$0xff] }
 0x316   : > { %v1406_v24 = vmul.f32 %v2995_v28, %v1405_v5  ;;  %1437 = vst [vmem:[%s1436_s9] sm:$0xf] %v1432_v7  ;;  %v1459_v14 = vunpack.c.l.b16 %v3951_v25  ;;  %v1520_v32 = vunpack.c.h.bf16 %v1449_v49  ;;  %v1522_v5 = vunpack.c.h.bf16 %v1450_v45 }
 0x317   : > { %v1524_v7 = vunpack.c.h.bf16 %v1451_v37 }
 0x318   : > { %v1407_v53 = vadd.f32 %v2995_v28, %v1406_v24 }
 0x31a   : > { %v2997_v12 = vpop.eup %2996  ;;  %v1411_v6 = vsel %vm1410_vm14, %v2995_v28, %v1407_v53 }
 0x31b   : > { %v1416_v19 = vsel %vm1413_vm15, %v1415_v15, %v1411_v6 }
 0x31c   : > { %v1427_v1 = vmul.f32 %v2997_v12, %v1416_v19 }
 0x31e   : > { %v1429_v30 = vpack.c.bf16 %v1427_v1, %v1427_v1 }
 0x320   : > { %v1433_v16 = vsel %vm1431_vm1, %v1429_v30, 0  ;;  %v3957_v51 = vsel %vm1431_vm1, %v1429_v30, %v3822_v52  ;;  %v1519_v52 = vunpack.c.l.bf16 %v1449_v49  ;;  %v1452_v49 = vld [vmem:[%s3999_s19 + $0x18] sm:$0xff] }
 0x321   : > { %1438 = vst [vmem:[%s1436_s9 + $0x4] sm:$0xf] %v1433_v16  ;;  %v1460_v62 = vunpack.c.l.b16 %v3957_v51  ;;  %s2842_s9 = smul.u32 224, %s3587_s11 }
 0x323   : > { %v1461_v61 = vpack.c.b16 %v1460_v62, %v1459_v14  ;;  %s2144_s10 = scalar_lea.vmem %s3439_s28, %s2842_s9  ;;  %s2141_s28 = smul.u32 7, %s3587_s11 }
 0x325   : > { %1471 = vmatmul.bf16.vlgmr.msra.gmra.mxu0 %v1461_v61  ;;  %1485 = vmatmul.bf16.vlgmr.msra.gmra.mxu1 %v1461_v61 }
 0x326   : > { %1499 = vmatmul.bf16.vlgmr.msra.gmra.mxu2 %v1461_v61  ;;  %1513 = vmatmul.bf16.vlgmr.msra.gmra.mxu3 %v1461_v61 }
 0x327   : > { %1928 = vmatpush.bf16.msra.mxu0 %v3206_v4  ;;  %1942 = vmatpush.bf16.msra.mxu1 %v3211_v8 }
 0x328   : > { %1956 = vmatpush.bf16.msra.mxu2 %v3233_v22  ;;  %1970 = vmatpush.bf16.msra.mxu3 %v3213_v9 }
 0x32b   : > { %1929 = vmatpush.bf16.msra.mxu0 %v3219_v13  ;;  %1943 = vmatpush.bf16.msra.mxu1 %v3226_v17 }
 0x32c   : > { %1957 = vmatpush.bf16.msra.mxu2 %v3254_v35  ;;  %1971 = vmatpush.bf16.msra.mxu3 %v3228_v18 }
 0x32f   : > { %1930 = vmatpush.bf16.msra.mxu0 %v3243_v29  ;;  %1944 = vmatpush.bf16.msra.mxu1 %v3250_v33 }
 0x330   : > { %1958 = vmatpush.bf16.msra.mxu2 %v3266_v43  ;;  %1972 = vmatpush.bf16.msra.mxu3 %v3252_v34 }
 0x333   : > { %1931 = vmatpush.bf16.msra.mxu0 %v3264_v42  ;;  %1945 = vmatpush.bf16.msra.mxu1 %v3272_v46 }
 0x334   : > { %1959 = vmatpush.bf16.msra.mxu2 %v3286_v55  ;;  %1973 = vmatpush.bf16.msra.mxu3 %v3274_v47 }
 0x337   : > { %1932 = vmatpush.bf16.msra.mxu0 %v3284_v54  ;;  %1946 = vmatpush.bf16.msra.mxu1 %v3292_v58 }
 0x338   : > { %1960 = vmatpush.bf16.msra.mxu2 %v3306_v3  ;;  %1974 = vmatpush.bf16.msra.mxu3 %v3294_v59 }
 0x33b   : > { %1933 = vmatpush.bf16.msra.mxu0 %v3304_v2  ;;  %1947 = vmatpush.bf16.msra.mxu1 %v3313_v10 }
 0x33c   : > { %1961 = vmatpush.bf16.msra.mxu2 %v3329_v23  ;;  %1975 = vmatpush.bf16.msra.mxu3 %v3315_v11 }
 0x33f   : > { %1934 = vmatpush.bf16.msra.mxu0 %v3327_v21  ;;  %1948 = vmatpush.bf16.msra.mxu1 %v3335_v26 }
 0x340   : > { %1962 = vmatpush.bf16.msra.mxu2 %v3349_v39  ;;  %1976 = vmatpush.bf16.msra.mxu3 %v3337_v27 }
 0x343   : > { %1935 = vmatpush.bf16.msra.mxu0 %v3347_v38  ;;  %1949 = vmatpush.bf16.msra.mxu1 %v3356_v41 }
 0x344   : > { %1963 = vmatpush.bf16.msra.mxu2 %v3366_v50  ;;  %1977 = vmatpush.bf16.msra.mxu3 %v3358_v44 }
 0x3a2   : > { %v1472_v57 = vpop.f32.mrf.mxu0  ;;  %v1486_v28 = vpop.f32.mrf.mxu1 }
 0x3a3   : > { %v1527_v36 = vadd.f32 %v1519_v52, %v1472_v57  ;;  %v1528_v20 = vadd.f32 %v1520_v32, %v1486_v28  ;;  %v1521_v32 = vunpack.c.l.bf16 %v1450_v45  ;;  %v1526_v57 = vunpack.c.h.bf16 %v1452_v49 }
 0x3a5   : > { %v2751_v60 = vmul.f32 -1.442695, %v1527_v36  ;;  %v2753_v63 = vmul.f32 -1.442695, %v1528_v20 }
 0x3a7   : > { %2998 = vpow2.f32 %v2751_v60 }
 0x3a8   : > { %3000 = vpow2.f32 %v2753_v63 }
 0x3a9   : > { %v1514_v24 = vpop.f32.mrf.mxu3  ;;  %v1500_v62 = vpop.f32.mrf.mxu2 }
 0x3aa   : > { %v1530_v48 = vadd.f32 %v1522_v5, %v1514_v24  ;;  %v1474_v53 = vpop.f32.mrf.mxu0  ;;  %v1488_v15 = vpop.f32.mrf.mxu1  ;;  %v1529_v20 = vadd.f32 %v1521_v32, %v1500_v62 }
 0x3ab   : > { %v1531_v12 = vadd.f32 %v1523_v31, %v1474_v53  ;;  %v1532_v6 = vadd.f32 %v1524_v7, %v1488_v15 }
 0x3ac   : > { %v2755_v19 = vmul.f32 -1.442695, %v1530_v48  ;;  %v1525_v48 = vunpack.c.l.bf16 %v1452_v49 }
 0x3ad   : > { %v2999_v1 = vpop.eup %2998  ;;  %v2752_v30 = vmul.f32 -1.442695, %v1531_v12  ;;  %v2754_v61 = vmul.f32 -1.442695, %v1532_v6 }
 0x3ae   : > { %v3001_v16 = vpop.eup %3000  ;;  %v1541_v14 = vadd.f32 1.0, %v2999_v1  ;;  %3002 = vpow2.f32 %v2755_v19 }
 0x3af   : > { %v1579_v52 = vadd.f32 1.0, %v3001_v16  ;;  %3004 = vpow2.f32 %v2752_v30 }
 0x3b0   : > { %3006 = vrcp.f32 %v1541_v14  ;;  %v1552_v15 = vand.u32 2147483647, %v1541_v14  ;;  %v1554_v62 = vand.u32 2147483648, %v1541_v14  ;;  %vm1548_vm6 = vweird.f32 %v1541_v14 }
 0x3b1   : > { %3008 = vrcp.f32 %v1579_v52  ;;  %v1516_v28 = vpop.f32.mrf.mxu3  ;;  %v1502_v12 = vpop.f32.mrf.mxu2  ;;  %v1592_v16 = vand.u32 2147483648, %v1579_v52  ;;  %vm1586_vm3 = vweird.f32 %v1579_v52 }
 0x3b2   : > { %3010 = vpow2.f32 %v2754_v61  ;;  %v1534_v63 = vadd.f32 %v1526_v57, %v1516_v28  ;;  %v1590_v61 = vand.u32 2147483647, %v1579_v52  ;;  %v1533_v49 = vadd.f32 %v1525_v48, %v1502_v12 }
 0x3b3   : > { %v4412_v57 = vstv %s3995_s17  ;;  %vm1553_vm7 = vcmp.eq.f32.partialorder %v1552_v15, 8.507059e+37  ;;  %v1593_v48 = vor.u32 1.1754944e-38, %v1592_v16 }
 0x3b4   : > { %v3003_v36 = vpop.eup %3002  ;;  %v2756_v1 = vmul.f32 -1.442695, %v1534_v63  ;;  %v1555_v63 = vor.u32 1.1754944e-38, %v1554_v62  ;;  %vm1591_vm9 = vcmp.eq.f32.partialorder %v1590_v61, 8.507059e+37 }
 0x3b5   : > { %v3005_v37 = vpop.eup %3004  ;;  %v4005_v60 = vadd.f32 1.0, %v3003_v36 }
 0x3b6   : > { %v3007_v5 = vpop.eup %3006  ;;  %v4007_v31 = vadd.f32 1.0, %v3005_v37 }
 0x3b7   : > { %v3009_v7 = vpop.eup %3008  ;;  %v1544_v24 = vmul.f32 %v3007_v5, %v1541_v14  ;;  %3012 = vrcp.f32 %v4005_v60  ;;  %vm1549_vm12 = vweird.f32 %v3007_v5  ;;  %vm1626_vm5 = vweird.f32 %v4005_v60 }
 0x3b8   : > { %v3011_v53 = vpop.eup %3010  ;;  %v1582_v45 = vmul.f32 %v3009_v7, %v1579_v52  ;;  %3014 = vtanh.f32 %v1529_v20  ;;  %vm1587_vm2 = vweird.f32 %v3009_v7  ;;  %vm1550_vm0 = vmor %vm1548_vm6, %vm1549_vm12  ;;  %vm1563_vm10 = vweird.f32 %v4007_v31 }
 0x3b9   : > { %v1545_v6 = vsub.f32 1.0, %v1544_v24  ;;  %3016 = vrcp.f32 %v4007_v31  ;;  %v4011_v19 = vadd.f32 1.0, %v3011_v53  ;;  %vm1588_vm8 = vmor %vm1586_vm3, %vm1587_vm2 }
 0x3ba   : > { %v1583_v30 = vsub.f32 1.0, %v1582_v45 }
 0x3bb   : > { %v1546_v32 = vmul.f32 %v3007_v5, %v1545_v6  ;;  %3018 = vrcp.f32 %v4011_v19  ;;  %v4443_v6 = vld [vmem:[#allocation4_spill] sm:$0xff]  ;;  %vm1601_vm15 = vweird.f32 %v4011_v19 }
 0x3bc   : > { %v1584_v28 = vmul.f32 %v3009_v7, %v1583_v30  ;;  %3020 = vpow2.f32 %v2756_v1  ;;  %vm4022_vm4 = vcmp.lt.s32.totalorder %v4412_v57, %v4443_v6  ;;  %v1630_v6 = vand.u32 2147483647, %v4005_v60 }
 0x3bd   : > { %v4015_v36 = vpop.eup %3012  ;;  %v1547_v20 = vadd.f32 %v3007_v5, %v1546_v32  ;;  %3022 = vtanh.f32 %v1533_v49 }
 0x3be   : > { %v3015_v37 = vpop.eup %3014  ;;  %v1585_v24 = vadd.f32 %v3009_v7, %v1584_v28  ;;  %v1622_v53 = vmul.f32 %v4015_v36, %v4005_v60  ;;  %vm1627_vm13 = vweird.f32 %v4015_v36 }
 0x3bf   : > { %v3017_v45 = vpop.eup %3016  ;;  %v1551_v12 = vsel %vm1550_vm0, %v3007_v5, %v1547_v20  ;;  %v1632_v5 = vand.u32 2147483648, %v4005_v60  ;;  %vm4045_vm12 = vmor %vm1626_vm5, %vm1627_vm13  ;;  %vm1631_vm0 = vcmp.eq.f32.partialorder %v1630_v6, 8.507059e+37 }
 0x3c0   : > { %v1556_v14 = vsel %vm1553_vm7, %v1555_v63, %v1551_v12  ;;  %v1589_v1 = vsel %vm1588_vm8, %v3009_v7, %v1585_v24  ;;  %v1623_v15 = vsub.f32 1.0, %v1622_v53  ;;  %v1559_v30 = vmul.f32 %v3017_v45, %v4007_v31  ;;  %vm1663_vm8 = vmpackc.low %vm4022_vm4, %vm4022_vm4 }
 0x3c1   : > { %v3019_v62 = vpop.eup %3018  ;;  %v1594_v32 = vsel %vm1591_vm9, %v1593_v48, %v1589_v1  ;;  %v1653_v28 = vmul.f32 %v3015_v37, %v1556_v14  ;;  %v1607_v7 = vand.u32 2147483648, %v4011_v19  ;;  %v1567_v63 = vand.u32 2147483647, %v4007_v31 }
 0x3c2   : > { %v1651_v16 = vmul.f32 %v1594_v32, %v3917_v0  ;;  %v1624_v61 = vmul.f32 %v4015_v36, %v1623_v15  ;;  %v1560_v49 = vsub.f32 1.0, %v1559_v30  ;;  %v1597_v20 = vmul.f32 %v3019_v62, %v4011_v19  ;;  %v3021_v57 = vpop.eup %3020 }
 0x3c3   : > { %v1569_v37 = vand.u32 2147483648, %v4007_v31  ;;  %vm1564_vm11 = vweird.f32 %v3017_v45  ;;  %v3023_v12 = vpop.eup %3022  ;;  %v1605_v1 = vand.u32 2147483647, %v4011_v19  ;;  %v1620_v15 = vadd.f32 1.0, %v3021_v57 }
 0x3c4   : > { %v1655_v24 = vadd.f32 %v1653_v28, %v1651_v16  ;;  %v1598_v53 = vsub.f32 1.0, %v1597_v20  ;;  %v1561_v48 = vmul.f32 %v3017_v45, %v1560_v49  ;;  %v1625_v14 = vadd.f32 %v4015_v36, %v1624_v61  ;;  %vm1565_vm1 = vmor %vm1563_vm10, %vm1564_vm11 }
 0x3c5   : > { %vm1602_vm14 = vweird.f32 %v3019_v62  ;;  %v1570_v28 = vor.u32 1.1754944e-38, %v1569_v37  ;;  %vm1568_vm2 = vcmp.eq.f32.partialorder %v1567_v63, 8.507059e+37  ;;  %v1608_v31 = vor.u32 1.1754944e-38, %v1607_v7 }
 0x3c6   : > { %3024 = vtanh.f32 %v1655_v24  ;;  %v1599_v30 = vmul.f32 %v3019_v62, %v1598_v53  ;;  %v1562_v32 = vadd.f32 %v3017_v45, %v1561_v48  ;;  %v4052_v49 = vsel %vm4022_vm4, %v1655_v24, %v3917_v0  ;;  %vm1603_vm3 = vmor %vm1601_vm15, %vm1602_vm14 }
 0x3c7   : > { %3026 = vrcp.f32 %v1620_v15  ;;  %v1629_v60 = vsel %vm4045_vm12, %v4015_v36, %v1625_v14  ;;  %v1633_v20 = vor.u32 1.1754944e-38, %v1632_v5  ;;  %vm1606_vm6 = vcmp.eq.f32.partialorder %v1605_v1, 8.507059e+37 }
 0x3c8   : > { %v1566_v57 = vsel %vm1565_vm1, %v3017_v45, %v1562_v32  ;;  %v1600_v61 = vadd.f32 %v3019_v62, %v1599_v30  ;;  %v1645_v16 = vand.u32 2147483647, %v1620_v15  ;;  %vm1641_vm5 = vweird.f32 %v1620_v15 }
 0x3c9   : > { %v1571_v19 = vsel %vm1568_vm2, %v1570_v28, %v1566_v57  ;;  %v1634_v24 = vsel %vm1631_vm0, %v1633_v20, %v1629_v60  ;;  %v4448_v28 = vstv %s3995_s17  ;;  %s2365_s17 = scalar_lea.vmem %s3518_s8, %s2843_s16 }
 0x3ca   : > { %v1604_v37 = vsel %vm1603_vm3, %v3019_v62, %v1600_v61  ;;  %v1654_v45 = vmul.f32 %v3023_v12, %v1571_v19  ;;  %vm4063_vm7 = vcmp.lt.s32.totalorder %v4448_v28, %v3512_v40  ;;  %v1647_v12 = vand.u32 2147483648, %v1620_v15 }
 0x3cb   : > { %v1609_v63 = vsel %vm1606_vm6, %v1608_v31, %v1604_v37  ;;  %vm1646_vm11 = vcmp.eq.f32.partialorder %v1645_v16, 8.507059e+37  ;;  %vm1664_vm13 = vmpackc.low %vm4063_vm7, %vm4063_vm7 }
 0x3cc   : > { %v3025_v53 = vpop.eup %3024  ;;  %v1652_v0 = vmul.f32 %v1609_v63, %v3938_v56  ;;  %v1648_v61 = vor.u32 1.1754944e-38, %v1647_v12 }
 0x3cd   : > { %v3027_v48 = vpop.eup %3026  ;;  %v1659_v7 = vmul.f32 %v3025_v53, %v1634_v24 }
 0x3ce   : > { %v1656_v30 = vadd.f32 %v1654_v45, %v1652_v0  ;;  %v1637_v32 = vmul.f32 %v3027_v48, %v1620_v15  ;;  %vm1642_vm9 = vweird.f32 %v3027_v48 }
 0x3cf   : > { %v1661_v62 = vpack.c.bf16 %v1659_v7, %v1659_v7  ;;  %vm1643_vm10 = vmor %vm1641_vm5, %vm1642_vm9 }
 0x3d0   : > { %3028 = vtanh.f32 %v1656_v30  ;;  %v1638_v6 = vsub.f32 1.0, %v1637_v32  ;;  %v4073_v5 = vsel %vm4063_vm7, %v1656_v30, %v3938_v56 }
 0x3d1   : > { %v1665_v14 = vsel %vm1663_vm8, %v1661_v62, 0  ;;  %v4086_v37 = vsel %vm1663_vm8, %v1661_v62, %v3951_v25 }
 0x3d2   : > { %v1639_v1 = vmul.f32 %v3027_v48, %v1638_v6  ;;  %1670 = vst [vmem:[%s1669_s21] sm:$0xf] %v1665_v14  ;;  %v1692_v63 = vunpack.c.l.b16 %v4086_v37 }
 0x3d4   : > { %v1640_v57 = vadd.f32 %v3027_v48, %v1639_v1 }
 0x3d6   : > { %v3029_v31 = vpop.eup %3028  ;;  %v1644_v19 = vsel %vm1643_vm10, %v3027_v48, %v1640_v57 }
 0x3d7   : > { %v1649_v56 = vsel %vm1646_vm11, %v1648_v61, %v1644_v19 }
 0x3d8   : > { %v1660_v60 = vmul.f32 %v3029_v31, %v1649_v56 }
 0x3da   : > { %v1662_v20 = vpack.c.bf16 %v1660_v60, %v1660_v60 }
 0x3dc   : > { %v1666_v15 = vsel %vm1664_vm13, %v1662_v20, 0  ;;  %v4092_v45 = vsel %vm1664_vm13, %v1662_v20, %v3957_v51 }
 0x3dd   : > { %1671 = vst [vmem:[%s1669_s21 + $0x4] sm:$0xf] %v1666_v15  ;;  %v1693_v53 = vunpack.c.l.b16 %v4092_v45  ;;  %v1687_v15 = vstv %s4130_s24 }
 0x3df   : > { %v1694_v0 = vpack.c.b16 %v1693_v53, %v1692_v63 }
 0x3e1   : > { %1704 = vmatmul.bf16.vlgmr.msrb.gmra.mxu0 %v1694_v0  ;;  %1718 = vmatmul.bf16.vlgmr.msrb.gmra.mxu1 %v1694_v0 }
 0x3e2   : > { %1732 = vmatmul.bf16.vlgmr.msrb.gmra.mxu2 %v1694_v0  ;;  %1746 = vmatmul.bf16.vlgmr.msrb.gmra.mxu3 %v1694_v0 }
 0x3e3   : > { %2159 = vmatpush.bf16.msrb.mxu0 %v3206_v4  ;;  %2173 = vmatpush.bf16.msrb.mxu1 %v3211_v8  ;;  %v1682_v4 = vld [vmem:[%s4134_s26] sm:$0xff] }
 0x3e4   : > { %2187 = vmatpush.bf16.msrb.mxu2 %v3233_v22  ;;  %2201 = vmatpush.bf16.msrb.mxu3 %v3213_v9  ;;  %v1752_v8 = vunpack.c.l.bf16 %v1682_v4  ;;  %v1753_v9 = vunpack.c.h.bf16 %v1682_v4 }
 0x3e7   : > { %2160 = vmatpush.bf16.msrb.mxu0 %v3219_v13  ;;  %2174 = vmatpush.bf16.msrb.mxu1 %v3226_v17 }
 0x3e8   : > { %2188 = vmatpush.bf16.msrb.mxu2 %v3254_v35  ;;  %2202 = vmatpush.bf16.msrb.mxu3 %v3228_v18 }
 0x3eb   : > { %2161 = vmatpush.bf16.msrb.mxu0 %v3243_v29  ;;  %2175 = vmatpush.bf16.msrb.mxu1 %v3250_v33  ;;  %v1683_v29 = vld [vmem:[%s4134_s26 + $0x8] sm:$0xff]  ;;  %v1684_v33 = vld [vmem:[%s4134_s26 + $0x10] sm:$0xff] }
 0x3ec   : > { %2189 = vmatpush.bf16.msrb.mxu2 %v3266_v43  ;;  %2203 = vmatpush.bf16.msrb.mxu3 %v3252_v34  ;;  %v1756_v43 = vunpack.c.l.bf16 %v1684_v33 }
 0x3ef   : > { %2162 = vmatpush.bf16.msrb.mxu0 %v3264_v42  ;;  %2176 = vmatpush.bf16.msrb.mxu1 %v3272_v46  ;;  %v1755_v42 = vunpack.c.h.bf16 %v1683_v29  ;;  %v1757_v46 = vunpack.c.h.bf16 %v1684_v33 }
 0x3f0   : > { %2190 = vmatpush.bf16.msrb.mxu2 %v3286_v55  ;;  %2204 = vmatpush.bf16.msrb.mxu3 %v3274_v47 }
 0x3f3   : > { %2163 = vmatpush.bf16.msrb.mxu0 %v3284_v54  ;;  %2177 = vmatpush.bf16.msrb.mxu1 %v3292_v58 }
 0x3f4   : > { %2191 = vmatpush.bf16.msrb.mxu2 %v3306_v3  ;;  %2205 = vmatpush.bf16.msrb.mxu3 %v3294_v59 }
 0x3f7   : > { %2164 = vmatpush.bf16.msrb.mxu0 %v3304_v2  ;;  %2178 = vmatpush.bf16.msrb.mxu1 %v3313_v10 }
 0x3f8   : > { %2192 = vmatpush.bf16.msrb.mxu2 %v3329_v23  ;;  %2206 = vmatpush.bf16.msrb.mxu3 %v3315_v11 }
 0x3fb   : > { %2165 = vmatpush.bf16.msrb.mxu0 %v3327_v21  ;;  %2179 = vmatpush.bf16.msrb.mxu1 %v3335_v26 }
 0x3fc   : > { %2193 = vmatpush.bf16.msrb.mxu2 %v3349_v39  ;;  %2207 = vmatpush.bf16.msrb.mxu3 %v3337_v27 }
 0x3ff   : > { %2166 = vmatpush.bf16.msrb.mxu0 %v3347_v38  ;;  %2180 = vmatpush.bf16.msrb.mxu1 %v3356_v41  ;;  %v1685_v38 = vld [vmem:[%s4134_s26 + $0x18] sm:$0xff]  ;;  %v1754_v41 = vunpack.c.l.bf16 %v1683_v29  ;;  %v4451_v29 = vld [vmem:[#allocation4_spill] sm:$0xff] }
 0x400   : > { %2194 = vmatpush.bf16.msrb.mxu2 %v3366_v50  ;;  %2208 = vmatpush.bf16.msrb.mxu3 %v3358_v44  ;;  %v1759_v44 = vunpack.c.h.bf16 %v1685_v38  ;;  %v1758_v36 = vunpack.c.l.bf16 %v1685_v38  ;;  %vm4157_vm0 = vcmp.lt.s32.totalorder %v1687_v15, %v4451_v29 }
 0x45e   : > { %v1705_v13 = vpop.f32.mrf.mxu0  ;;  %v1719_v17 = vpop.f32.mrf.mxu1 }
 0x45f   : > { %v1760_v18 = vadd.f32 %v1752_v8, %v1705_v13  ;;  %v1761_v22 = vadd.f32 %v1753_v9, %v1719_v17 }
 0x461   : > { %v2762_v34 = vmul.f32 -1.442695, %v1760_v18  ;;  %v2764_v35 = vmul.f32 -1.442695, %v1761_v22 }
 0x463   : > { %3030 = vpow2.f32 %v2762_v34 }
 0x464   : > { %3032 = vpow2.f32 %v2764_v35 }
 0x465   : > { %v1747_v47 = vpop.f32.mrf.mxu3  ;;  %v1733_v26 = vpop.f32.mrf.mxu2 }
 0x466   : > { %v1763_v54 = vadd.f32 %v1755_v42, %v1747_v47  ;;  %v1707_v55 = vpop.f32.mrf.mxu0  ;;  %v1721_v58 = vpop.f32.mrf.mxu1  ;;  %v1762_v51 = vadd.f32 %v1754_v41, %v1733_v26 }
 0x467   : > { %v1764_v59 = vadd.f32 %v1756_v43, %v1707_v55  ;;  %v1765_v2 = vadd.f32 %v1757_v46, %v1721_v58 }
 0x468   : > { %v2766_v3 = vmul.f32 -1.442695, %v1763_v54 }
 0x469   : > { %v3031_v10 = vpop.eup %3030  ;;  %v2763_v11 = vmul.f32 -1.442695, %v1764_v59  ;;  %v2765_v27 = vmul.f32 -1.442695, %v1765_v2 }
 0x46a   : > { %v3033_v21 = vpop.eup %3032  ;;  %v1774_v23 = vadd.f32 1.0, %v3031_v10  ;;  %3034 = vpow2.f32 %v2766_v3 }
 0x46b   : > { %v1812_v39 = vadd.f32 1.0, %v3033_v21  ;;  %3036 = vpow2.f32 %v2763_v11 }
 0x46c   : > { %3038 = vrcp.f32 %v1774_v23  ;;  %v1785_v12 = vand.u32 2147483647, %v1774_v23  ;;  %v1787_v19 = vand.u32 2147483648, %v1774_v23  ;;  %vm1781_vm1 = vweird.f32 %v1774_v23 }
 0x46d   : > { %3040 = vrcp.f32 %v1812_v39  ;;  %v1749_v50 = vpop.f32.mrf.mxu3  ;;  %v1735_v14 = vpop.f32.mrf.mxu2  ;;  %v1825_v31 = vand.u32 2147483648, %v1812_v39  ;;  %v1823_v56 = vand.u32 2147483647, %v1812_v39  ;;  %vm1819_vm15 = vweird.f32 %v1812_v39 }
 0x46e   : > { %3042 = vpow2.f32 %v2765_v27  ;;  %v1767_v48 = vadd.f32 %v1759_v44, %v1749_v50  ;;  %v1766_v20 = vadd.f32 %v1758_v36, %v1735_v14  ;;  %vm1786_vm2 = vcmp.eq.f32.partialorder %v1785_v12, 8.507059e+37 }
 0x46f   : > { %v1788_v8 = vor.u32 1.1754944e-38, %v1787_v19  ;;  %v1826_v18 = vor.u32 1.1754944e-38, %v1825_v31  ;;  %vm1824_vm6 = vcmp.eq.f32.partialorder %v1823_v56, 8.507059e+37 }
 0x470   : > { %v3035_v25 = vpop.eup %3034  ;;  %v2767_v57 = vmul.f32 -1.442695, %v1767_v48 }
 0x471   : > { %v3037_v52 = vpop.eup %3036  ;;  %v4140_v24 = vadd.f32 1.0, %v3035_v25 }
 0x472   : > { %v3039_v7 = vpop.eup %3038  ;;  %v4142_v30 = vadd.f32 1.0, %v3037_v52 }
 0x473   : > { %v3041_v32 = vpop.eup %3040  ;;  %v1777_v28 = vmul.f32 %v3039_v7, %v1774_v23  ;;  %3044 = vrcp.f32 %v4140_v24  ;;  %vm1782_vm4 = vweird.f32 %v3039_v7  ;;  %vm1859_vm7 = vweird.f32 %v4140_v24 }
 0x474   : > { %v3043_v62 = vpop.eup %3042  ;;  %v1815_v6 = vmul.f32 %v3041_v32, %v1812_v39  ;;  %3046 = vtanh.f32 %v1762_v51  ;;  %vm1820_vm14 = vweird.f32 %v3041_v32  ;;  %vm1783_vm12 = vmor %vm1781_vm1, %vm1782_vm4  ;;  %v1865_v55 = vand.u32 2147483648, %v4140_v24 }
 0x475   : > { %v1778_v1 = vsub.f32 1.0, %v1777_v28  ;;  %3048 = vrcp.f32 %v4142_v30  ;;  %v4146_v16 = vadd.f32 1.0, %v3043_v62  ;;  %vm1821_vm3 = vmor %vm1819_vm15, %vm1820_vm14  ;;  %vm1796_vm8 = vweird.f32 %v4142_v30 }
 0x476   : > { %v1816_v61 = vsub.f32 1.0, %v1815_v6  ;;  %v1800_v21 = vand.u32 2147483647, %v4142_v30  ;;  %v1802_v23 = vand.u32 2147483648, %v4142_v30  ;;  %v1863_v52 = vand.u32 2147483647, %v4140_v24 }
 0x477   : > { %v1779_v60 = vmul.f32 %v3039_v7, %v1778_v1  ;;  %3050 = vrcp.f32 %v4146_v16  ;;  %v1840_v11 = vand.u32 2147483648, %v4146_v16  ;;  %v1838_v44 = vand.u32 2147483647, %v4146_v16 }
 0x478   : > { %v1817_v63 = vmul.f32 %v3041_v32, %v1816_v61  ;;  %3052 = vpow2.f32 %v2767_v57  ;;  %vm1834_vm11 = vweird.f32 %v4146_v16  ;;  %v1803_v48 = vor.u32 1.1754944e-38, %v1802_v23 }
 0x479   : > { %v4150_v53 = vpop.eup %3044  ;;  %v1780_v0 = vadd.f32 %v3039_v7, %v1779_v60  ;;  %3054 = vtanh.f32 %v1766_v20  ;;  %vm1801_vm14 = vcmp.eq.f32.partialorder %v1800_v21, 8.507059e+37  ;;  %v1866_v6 = vor.u32 1.1754944e-38, %v1865_v55 }
 0x47a   : > { %v3047_v4 = vpop.eup %3046  ;;  %v1818_v9 = vadd.f32 %v3041_v32, %v1817_v63  ;;  %v1855_v13 = vmul.f32 %v4150_v53, %v4140_v24  ;;  %vm1860_vm5 = vweird.f32 %v4150_v53  ;;  %vm1839_vm1 = vcmp.eq.f32.partialorder %v1838_v44, 8.507059e+37 }
 0x47b   : > { %v3049_v17 = vpop.eup %3048  ;;  %v1784_v22 = vsel %vm1783_vm12, %v3039_v7, %v1780_v0  ;;  %vm4180_vm4 = vmor %vm1859_vm7, %vm1860_vm5  ;;  %vm1864_vm12 = vcmp.eq.f32.partialorder %v1863_v52, 8.507059e+37 }
 0x47c   : > { %v1789_v34 = vsel %vm1786_vm2, %v1788_v8, %v1784_v22  ;;  %v1822_v35 = vsel %vm1821_vm3, %v3041_v32, %v1818_v9  ;;  %v1856_v42 = vsub.f32 1.0, %v1855_v13  ;;  %v1792_v43 = vmul.f32 %v3049_v17, %v4142_v30  ;;  %vm1896_vm3 = vmpackc.low %vm4157_vm0, %vm4157_vm0 }
 0x47d   : > { %v3051_v46 = vpop.eup %3050  ;;  %v1827_v47 = vsel %vm1824_vm6, %v1826_v18, %v1822_v35  ;;  %v1886_v54 = vmul.f32 %v3047_v4, %v1789_v34  ;;  %vm1797_vm9 = vweird.f32 %v3049_v17  ;;  %v1841_v30 = vor.u32 1.1754944e-38, %v1840_v11 }
 0x47e   : > { %v1884_v58 = vmul.f32 %v1827_v47, %v4052_v49  ;;  %v1857_v59 = vmul.f32 %v4150_v53, %v1856_v42  ;;  %v1793_v2 = vsub.f32 1.0, %v1792_v43  ;;  %v1830_v3 = vmul.f32 %v3051_v46, %v4146_v16  ;;  %v3053_v10 = vpop.eup %3052  ;;  %vm1798_vm13 = vmor %vm1796_vm8, %vm1797_vm9 }
 0x47f   : > { %v3055_v39 = vpop.eup %3054  ;;  %v1853_v50 = vadd.f32 1.0, %v3053_v10  ;;  %vm1835_vm10 = vweird.f32 %v3051_v46  ;;  %vm4198_vm2 = vcmp.lt.s32.totalorder %v1687_v15, %v3512_v40  ;;  %v1916_v10 = vld [vmem:[%s4237_s6 + $0x10] sm:$0xff] }
 0x480   : > { %v1888_v26 = vadd.f32 %v1886_v54, %v1884_v58  ;;  %v1831_v27 = vsub.f32 1.0, %v1830_v3  ;;  %v1794_v38 = vmul.f32 %v3049_v17, %v1793_v2  ;;  %v1858_v41 = vadd.f32 %v4150_v53, %v1857_v59  ;;  %vm1836_vm15 = vmor %vm1834_vm11, %vm1835_vm10  ;;  %v1915_v3 = vld [vmem:[%s4237_s6 + $0x8] sm:$0xff] }
 0x481   : > { %v1880_v0 = vand.u32 2147483648, %v1853_v50  ;;  %v1878_v8 = vand.u32 2147483647, %v1853_v50  ;;  %vm1874_vm7 = vweird.f32 %v1853_v50  ;;  %vm1897_vm5 = vmpackc.low %vm4198_vm2, %vm4198_vm2  ;;  %v1987_v23 = vunpack.c.h.bf16 %v1915_v3 }
 0x482   : > { %3056 = vtanh.f32 %v1888_v26  ;;  %v1832_v25 = vmul.f32 %v3051_v46, %v1831_v27  ;;  %v1795_v51 = vadd.f32 %v3049_v17, %v1794_v38  ;;  %v4187_v36 = vsel %vm4157_vm0, %v1888_v26, %v4052_v49 }
 0x483   : > { %3058 = vrcp.f32 %v1853_v50  ;;  %v1862_v24 = vsel %vm4180_vm4, %v4150_v53, %v1858_v41  ;;  %v1881_v13 = vor.u32 1.1754944e-38, %v1880_v0  ;;  %vm1879_vm9 = vcmp.eq.f32.partialorder %v1878_v8, 8.507059e+37 }
 0x484   : > { %v1799_v32 = vsel %vm1798_vm13, %v3049_v17, %v1795_v51  ;;  %v1833_v28 = vadd.f32 %v3051_v46, %v1832_v25  ;;  %v1867_v57 = vsel %vm1864_vm12, %v1866_v6, %v1862_v24  ;;  %v1988_v26 = vunpack.c.l.bf16 %v1916_v10 }
 0x485   : > { %v1804_v62 = vsel %vm1801_vm14, %v1803_v48, %v1799_v32  ;;  %v1989_v27 = vunpack.c.h.bf16 %v1916_v10  ;;  %v1986_v6 = vunpack.c.l.bf16 %v1915_v3 }
 0x486   : > { %v1837_v12 = vsel %vm1836_vm15, %v3051_v46, %v1833_v28  ;;  %v1887_v14 = vmul.f32 %v3055_v39, %v1804_v62  ;;  %v1917_v62 = vld [vmem:[%s4237_s6 + $0x18] sm:$0xff] }
 0x487   : > { %v1842_v1 = vsel %vm1839_vm1, %v1841_v30, %v1837_v12  ;;  %v1991_v12 = vunpack.c.h.bf16 %v1917_v62 }
 0x488   : > { %v3057_v16 = vpop.eup %3056  ;;  %v1885_v49 = vmul.f32 %v1842_v1, %v4073_v5 }
 0x489   : > { %v3059_v61 = vpop.eup %3058  ;;  %v1892_v31 = vmul.f32 %v3057_v16, %v1867_v57 }
 0x48a   : > { %v1889_v19 = vadd.f32 %v1887_v14, %v1885_v49  ;;  %v1870_v56 = vmul.f32 %v3059_v61, %v1853_v50  ;;  %vm1875_vm6 = vweird.f32 %v3059_v61 }
 0x48b   : > { %v1894_v20 = vpack.c.bf16 %v1892_v31, %v1892_v31  ;;  %vm1876_vm8 = vmor %vm1874_vm7, %vm1875_vm6 }
 0x48c   : > { %3060 = vtanh.f32 %v1889_v19  ;;  %v1871_v63 = vsub.f32 1.0, %v1870_v56  ;;  %v4208_v53 = vsel %vm4198_vm2, %v1889_v19, %v4073_v5 }
 0x48d   : > { %v1898_v15 = vsel %vm1896_vm3, %v1894_v20, 0  ;;  %v4221_v35 = vsel %vm1896_vm3, %v1894_v20, %v4086_v37  ;;  %v1914_v37 = vld [vmem:[%s4237_s6] sm:$0xff]  ;;  %v1990_v20 = vunpack.c.l.bf16 %v1917_v62 }
 0x48e   : > { %v1872_v4 = vmul.f32 %v3059_v61, %v1871_v63  ;;  %1903 = vst [vmem:[%s1902_s29] sm:$0xf] %v1898_v15  ;;  %v1924_v46 = vunpack.c.l.b16 %v4221_v35  ;;  %v1985_v33 = vunpack.c.h.bf16 %v1914_v37 }
 0x490   : > { %v1873_v9 = vadd.f32 %v3059_v61, %v1872_v4 }
 0x492   : > { %v3061_v17 = vpop.eup %3060  ;;  %v1877_v18 = vsel %vm1876_vm8, %v3059_v61, %v1873_v9 }
 0x493   : > { %v1882_v5 = vsel %vm1879_vm9, %v1881_v13, %v1877_v18 }
 0x494   : > { %v1893_v22 = vmul.f32 %v3061_v17, %v1882_v5 }
 0x496   : > { %v1895_v34 = vpack.c.bf16 %v1893_v22, %v1893_v22 }
 0x498   : > { %v1899_v42 = vsel %vm1897_vm5, %v1895_v34, 0  ;;  %v4227_v43 = vsel %vm1897_vm5, %v1895_v34, %v4092_v45  ;;  %v1984_v45 = vunpack.c.l.bf16 %v1914_v37 }
 0x499   : > { %1904 = vst [vmem:[%s1902_s29 + $0x4] sm:$0xf] %v1899_v42  ;;  %v1925_v47 = vunpack.c.l.b16 %v4227_v43 }
 0x49b   : > { %v1926_v54 = vpack.c.b16 %v1925_v47, %v1924_v46  ;;  %v1919_v46 = vstv %s4233_s4 }
 0x49c   : > { %vm4260_vm12 = vcmp.lt.s32.totalorder %v1919_v46, %v4451_v29 }
 0x49d   : > { %1936 = vmatmul.bf16.vlgmr.msra.gmra.mxu0 %v1926_v54  ;;  %1950 = vmatmul.bf16.vlgmr.msra.gmra.mxu1 %v1926_v54 }
 0x49e   : > { %1964 = vmatmul.bf16.vlgmr.msra.gmra.mxu2 %v1926_v54  ;;  %1978 = vmatmul.bf16.vlgmr.msra.gmra.mxu3 %v1926_v54 }
 0x51a   : > { %v1937_v55 = vpop.f32.mrf.mxu0  ;;  %v1951_v58 = vpop.f32.mrf.mxu1 }
 0x51b   : > { %v1992_v59 = vadd.f32 %v1984_v45, %v1937_v55  ;;  %v1993_v2 = vadd.f32 %v1985_v33, %v1951_v58 }
 0x51d   : > { %v2772_v11 = vmul.f32 -1.442695, %v1992_v59  ;;  %v2774_v21 = vmul.f32 -1.442695, %v1993_v2 }
 0x51f   : > { %3062 = vpow2.f32 %v2772_v11 }
 0x520   : > { %3064 = vpow2.f32 %v2774_v21 }
 0x521   : > { %v1979_v38 = vpop.f32.mrf.mxu3  ;;  %v1965_v28 = vpop.f32.mrf.mxu2 }
 0x522   : > { %v1995_v39 = vadd.f32 %v1987_v23, %v1979_v38  ;;  %v1939_v41 = vpop.f32.mrf.mxu0  ;;  %v1953_v44 = vpop.f32.mrf.mxu1  ;;  %v1994_v16 = vadd.f32 %v1986_v6, %v1965_v28 }
 0x523   : > { %v1996_v50 = vadd.f32 %v1988_v26, %v1939_v41  ;;  %v1997_v25 = vadd.f32 %v1989_v27, %v1953_v44 }
 0x524   : > { %v2776_v51 = vmul.f32 -1.442695, %v1995_v39 }
 0x525   : > { %v3063_v52 = vpop.eup %3062  ;;  %v2773_v48 = vmul.f32 -1.442695, %v1996_v50  ;;  %v2775_v30 = vmul.f32 -1.442695, %v1997_v25 }
 0x526   : > { %v3065_v7 = vpop.eup %3064  ;;  %v2006_v32 = vadd.f32 1.0, %v3063_v52  ;;  %3066 = vpow2.f32 %v2776_v51 }
 0x527   : > { %v2044_v24 = vadd.f32 1.0, %v3065_v7  ;;  %3068 = vpow2.f32 %v2773_v48 }
 0x528   : > { %3070 = vrcp.f32 %v2006_v32  ;;  %v2017_v15 = vand.u32 2147483647, %v2006_v32  ;;  %v2019_v5 = vand.u32 2147483648, %v2006_v32  ;;  %vm2013_vm13 = vweird.f32 %v2006_v32 }
 0x529   : > { %3072 = vrcp.f32 %v2044_v24  ;;  %v1981_v14 = vpop.f32.mrf.mxu3  ;;  %v1967_v4 = vpop.f32.mrf.mxu2  ;;  %v2057_v18 = vand.u32 2147483648, %v2044_v24  ;;  %v2055_v22 = vand.u32 2147483647, %v2044_v24  ;;  %vm2051_vm11 = vweird.f32 %v2044_v24 }
 0x52a   : > { %3074 = vpow2.f32 %v2775_v30  ;;  %v1999_v61 = vadd.f32 %v1991_v12, %v1981_v14  ;;  %v1998_v42 = vadd.f32 %v1990_v20, %v1967_v4  ;;  %vm2018_vm14 = vcmp.eq.f32.partialorder %v2017_v15, 8.507059e+37 }
 0x52b   : > { %v2020_v33 = vor.u32 1.1754944e-38, %v2019_v5  ;;  %v2058_v2 = vor.u32 1.1754944e-38, %v2057_v18  ;;  %vm2056_vm1 = vcmp.eq.f32.partialorder %v2055_v22, 8.507059e+37 }
 0x52c   : > { %v3067_v1 = vpop.eup %3066  ;;  %v2777_v13 = vmul.f32 -1.442695, %v1999_v61 }
 0x52d   : > { %v3069_v49 = vpop.eup %3068  ;;  %v4243_v57 = vadd.f32 1.0, %v3067_v1 }
 0x52e   : > { %v3071_v31 = vpop.eup %3070  ;;  %v4245_v19 = vadd.f32 1.0, %v3069_v49 }
 0x52f   : > { %v3073_v56 = vpop.eup %3072  ;;  %v2009_v60 = vmul.f32 %v3071_v31, %v2006_v32  ;;  %3076 = vrcp.f32 %v4243_v57  ;;  %vm2014_vm0 = vweird.f32 %v3071_v31  ;;  %vm2091_vm2 = vweird.f32 %v4243_v57 }
 0x530   : > { %v3075_v63 = vpop.eup %3074  ;;  %v2047_v0 = vmul.f32 %v3073_v56, %v2044_v24  ;;  %3078 = vtanh.f32 %v1994_v16  ;;  %vm2052_vm10 = vweird.f32 %v3073_v56  ;;  %vm2015_vm4 = vmor %vm2013_vm13, %vm2014_vm0  ;;  %v2097_v41 = vand.u32 2147483648, %v4243_v57 }
 0x531   : > { %v2010_v8 = vsub.f32 1.0, %v2009_v60  ;;  %3080 = vrcp.f32 %v4245_v19  ;;  %v4249_v9 = vadd.f32 1.0, %v3075_v63  ;;  %vm2053_vm15 = vmor %vm2051_vm11, %vm2052_vm10  ;;  %vm2028_vm3 = vweird.f32 %v4245_v19 }
 0x532   : > { %v2048_v17 = vsub.f32 1.0, %v2047_v0  ;;  %v2032_v7 = vand.u32 2147483647, %v4245_v19  ;;  %v2034_v32 = vand.u32 2147483648, %v4245_v19  ;;  %v2095_v49 = vand.u32 2147483647, %v4243_v57 }
 0x533   : > { %v2011_v34 = vmul.f32 %v3071_v31, %v2010_v8  ;;  %3082 = vrcp.f32 %v4249_v9  ;;  %v2072_v48 = vand.u32 2147483648, %v4249_v9  ;;  %v2070_v12 = vand.u32 2147483647, %v4249_v9 }
 0x534   : > { %v2049_v47 = vmul.f32 %v3073_v56, %v2048_v17  ;;  %3084 = vpow2.f32 %v2777_v13  ;;  %vm2066_vm9 = vweird.f32 %v4249_v9  ;;  %v2035_v61 = vor.u32 1.1754944e-38, %v2034_v32  ;;  %v2147_v32 = vld [vmem:[%s2144_s10 + $0x10] sm:$0xff] }
 0x535   : > { %v4253_v54 = vpop.eup %3076  ;;  %v2012_v37 = vadd.f32 %v3071_v31, %v2011_v34  ;;  %3086 = vtanh.f32 %v1998_v42  ;;  %vm2033_vm10 = vcmp.eq.f32.partialorder %v2032_v7, 8.507059e+37  ;;  %v2098_v0 = vor.u32 1.1754944e-38, %v2097_v41  ;;  %v2146_v7 = vld [vmem:[%s2144_s10 + $0x8] sm:$0xff] }
 0x536   : > { %v3079_v45 = vpop.eup %3078  ;;  %v2050_v55 = vadd.f32 %v3073_v56, %v2049_v47  ;;  %v2087_v58 = vmul.f32 %v4253_v54, %v4243_v57  ;;  %vm2092_vm7 = vweird.f32 %v4253_v54  ;;  %vm2071_vm13 = vcmp.eq.f32.partialorder %v2070_v12, 8.507059e+37 }
 0x537   : > { %v3081_v59 = vpop.eup %3080  ;;  %v2016_v3 = vsel %vm2015_vm4, %v3071_v31, %v2012_v37  ;;  %vm4286_vm0 = vmor %vm2091_vm2, %vm2092_vm7  ;;  %vm2096_vm4 = vcmp.eq.f32.partialorder %v2095_v49, 8.507059e+37  ;;  %v2220_v12 = vunpack.c.h.bf16 %v2147_v32 }
 0x538   : > { %v2021_v11 = vsel %vm2018_vm14, %v2020_v33, %v2016_v3  ;;  %v2054_v21 = vsel %vm2053_vm15, %v3073_v56, %v2050_v55  ;;  %v2088_v23 = vsub.f32 1.0, %v2087_v58  ;;  %v2024_v26 = vmul.f32 %v3081_v59, %v4245_v19  ;;  %vm2128_vm15 = vmpackc.low %vm4260_vm12, %vm4260_vm12 }
 0x539   : > { %v3083_v27 = vpop.eup %3082  ;;  %v2059_v38 = vsel %vm2056_vm1, %v2058_v2, %v2054_v21  ;;  %v2118_v39 = vmul.f32 %v3079_v45, %v2021_v11  ;;  %vm2029_vm6 = vweird.f32 %v3081_v59  ;;  %v2073_v19 = vor.u32 1.1754944e-38, %v2072_v48 }
 0x53a   : > { %v2116_v44 = vmul.f32 %v2059_v38, %v4187_v36  ;;  %v2089_v50 = vmul.f32 %v4253_v54, %v2088_v23  ;;  %v2025_v25 = vsub.f32 1.0, %v2024_v26  ;;  %v2062_v51 = vmul.f32 %v3083_v27, %v4249_v9  ;;  %v3085_v52 = vpop.eup %3084  ;;  %vm2030_vm5 = vmor %vm2028_vm3, %vm2029_vm6 }
 0x53b   : > { %v3087_v24 = vpop.eup %3086  ;;  %v2085_v14 = vadd.f32 1.0, %v3085_v52  ;;  %vm2067_vm8 = vweird.f32 %v3083_v27  ;;  %vm4305_vm14 = vcmp.lt.s32.totalorder %v1919_v46, %v3512_v40 }
 0x53c   : > { %v4274_v28 = vadd.f32 %v2118_v39, %v2116_v44  ;;  %v2063_v30 = vsub.f32 1.0, %v2062_v51  ;;  %v2026_v62 = vmul.f32 %v3081_v59, %v2025_v25  ;;  %v2090_v6 = vadd.f32 %v4253_v54, %v2089_v50  ;;  %vm2068_vm11 = vmor %vm2066_vm9, %vm2067_vm8 }
 0x53d   : > { %v2112_v45 = vand.u32 2147483648, %v2085_v14  ;;  %v2110_v55 = vand.u32 2147483647, %v2085_v14  ;;  %vm2106_vm2 = vweird.f32 %v2085_v14  ;;  %vm2129_vm7 = vmpackc.low %vm4305_vm14, %vm4305_vm14 }
 0x53e   : > { %3088 = vtanh.f32 %v4274_v28  ;;  %v2064_v1 = vmul.f32 %v3083_v27, %v2063_v30  ;;  %v2027_v16 = vadd.f32 %v3081_v59, %v2026_v62  ;;  %v2139_v20 = vsel %vm4260_vm12, %v4274_v28, %v4187_v36 }
 0x53f   : > { %3090 = vrcp.f32 %v2085_v14  ;;  %v2094_v57 = vsel %vm4286_vm0, %v4253_v54, %v2090_v6  ;;  %vm2111_vm6 = vcmp.eq.f32.partialorder %v2110_v55, 8.507059e+37  ;;  %v2219_v6 = vunpack.c.l.bf16 %v2147_v32 }
 0x540   : > { %v2031_v56 = vsel %vm2030_vm5, %v3081_v59, %v2027_v16  ;;  %v2065_v60 = vadd.f32 %v3083_v27, %v2064_v1  ;;  %v2099_v17 = vsel %vm2096_vm4, %v2098_v0, %v2094_v57  ;;  %v2113_v59 = vor.u32 1.1754944e-38, %v2112_v45 }
 0x541   : > { %v2036_v63 = vsel %vm2033_vm10, %v2035_v61, %v2031_v56 }
 0x542   : > { %v2069_v15 = vsel %vm2068_vm11, %v3083_v27, %v2065_v60  ;;  %v2119_v4 = vmul.f32 %v3087_v24, %v2036_v63  ;;  %v2218_v24 = vunpack.c.h.bf16 %v2146_v7 }
 0x543   : > { %v2074_v8 = vsel %vm2071_vm13, %v2073_v19, %v2069_v15  ;;  %v2148_v15 = vld [vmem:[%s2144_s10 + $0x18] sm:$0xff] }
 0x544   : > { %v3089_v9 = vpop.eup %3088  ;;  %v2117_v13 = vmul.f32 %v2074_v8, %v4208_v53 }
 0x545   : > { %v3091_v18 = vpop.eup %3090  ;;  %v2124_v5 = vmul.f32 %v3089_v9, %v2099_v17  ;;  %v2217_v9 = vunpack.c.l.bf16 %v2146_v7 }
 0x546   : > { %v4299_v22 = vadd.f32 %v2119_v4, %v2117_v13  ;;  %v2102_v34 = vmul.f32 %v3091_v18, %v2085_v14  ;;  %vm2107_vm1 = vweird.f32 %v3091_v18  ;;  %v2222_v13 = vunpack.c.h.bf16 %v2148_v15 }
 0x547   : > { %v2126_v47 = vpack.c.bf16 %v2124_v5, %v2124_v5  ;;  %vm2108_vm3 = vmor %vm2106_vm2, %vm2107_vm1 }
 0x548   : > { %3092 = vtanh.f32 %v4299_v22  ;;  %v2103_v54 = vsub.f32 1.0, %v2102_v34  ;;  %v2140_v37 = vsel %vm4305_vm14, %v4299_v22, %v4208_v53 }
 0x549   : > { %v2130_v46 = vsel %vm2128_vm15, %v2126_v47, 0  ;;  %v4328_v26 = vsel %vm2128_vm15, %v2126_v47, %v4221_v35  ;;  %v2145_v35 = vld [vmem:[%s2144_s10] sm:$0xff] }
 0x54a   : > { %v2104_v33 = vmul.f32 %v3091_v18, %v2103_v54  ;;  %2135 = vst [vmem:[%s2134_s7] sm:$0xf] %v2130_v46  ;;  %v2155_v39 = vunpack.c.l.b16 %v4328_v26  ;;  %v2215_v50 = vunpack.c.l.bf16 %v2145_v35  ;;  %v2216_v25 = vunpack.c.h.bf16 %v2145_v35 }
 0x54c   : > { %v2105_v58 = vadd.f32 %v3091_v18, %v2104_v33 }
 0x54e   : > { %v3093_v2 = vpop.eup %3092  ;;  %v2109_v3 = vsel %vm2108_vm3, %v3091_v18, %v2105_v58 }
 0x54f   : > { %v2114_v11 = vsel %vm2111_vm6, %v2113_v59, %v2109_v3 }
 0x550   : > { %v2125_v21 = vmul.f32 %v3093_v2, %v2114_v11  ;;  %v2221_v2 = vunpack.c.l.bf16 %v2148_v15 }
 0x552   : > { %v2127_v23 = vpack.c.bf16 %v2125_v21, %v2125_v21 }
 0x554   : > { %v2131_v27 = vsel %vm2129_vm7, %v2127_v23, 0  ;;  %v4334_v38 = vsel %vm2129_vm7, %v2127_v23, %v4227_v43 }
 0x555   : > { %2136 = vst [vmem:[%s2134_s7 + $0x4] sm:$0xf] %v2131_v27  ;;  %v2156_v41 = vunpack.c.l.b16 %v4334_v38 }
 0x557   : > { %v2157_v44 = vpack.c.b16 %v2156_v41, %v2155_v39 }
 0x559   : > { %2167 = vmatmul.bf16.vlgmr.msrb.gmra.mxu0 %v2157_v44  ;;  %2181 = vmatmul.bf16.vlgmr.msrb.gmra.mxu1 %v2157_v44 }
 0x55a   : > { %2195 = vmatmul.bf16.vlgmr.msrb.gmra.mxu2 %v2157_v44  ;;  %2209 = vmatmul.bf16.vlgmr.msrb.gmra.mxu3 %v2157_v44 }
 0x5d6   : > { %v2168_v51 = vpop.f32.mrf.mxu0  ;;  %v2182_v52 = vpop.f32.mrf.mxu1 }
 0x5d7   : > { %v2223_v48 = vadd.f32 %v2215_v50, %v2168_v51  ;;  %v2224_v43 = vadd.f32 %v2216_v25, %v2182_v52 }
 0x5d9   : > { %v2782_v30 = vmul.f32 -1.442695, %v2223_v48  ;;  %v2784_v62 = vmul.f32 -1.442695, %v2224_v43 }
 0x5db   : > { %3094 = vpow2.f32 %v2782_v30 }
 0x5dc   : > { %3096 = vpow2.f32 %v2784_v62 }
 0x5dd   : > { %v2210_v14 = vpop.f32.mrf.mxu3  ;;  %v2196_v8 = vpop.f32.mrf.mxu2 }
 0x5de   : > { %v2226_v1 = vadd.f32 %v2218_v24, %v2210_v14  ;;  %v2170_v16 = vpop.f32.mrf.mxu0  ;;  %v2184_v49 = vpop.f32.mrf.mxu1  ;;  %v2225_v5 = vadd.f32 %v2217_v9, %v2196_v8 }
 0x5df   : > { %v2227_v61 = vadd.f32 %v2219_v6, %v2170_v16  ;;  %v2228_v31 = vadd.f32 %v2220_v12, %v2184_v49 }
 0x5e0   : > { %v2786_v56 = vmul.f32 -1.442695, %v2226_v1 }
 0x5e1   : > { %v3095_v60 = vpop.eup %3094  ;;  %v2783_v19 = vmul.f32 -1.442695, %v2227_v61  ;;  %v2785_v0 = vmul.f32 -1.442695, %v2228_v31 }
 0x5e2   : > { %v3097_v63 = vpop.eup %3096  ;;  %v2237_v57 = vadd.f32 1.0, %v3095_v60  ;;  %3098 = vpow2.f32 %v2786_v56 }
 0x5e3   : > { %v2275_v4 = vadd.f32 1.0, %v3097_v63  ;;  %3100 = vpow2.f32 %v2783_v19 }
 0x5e4   : > { %3102 = vrcp.f32 %v2237_v57  ;;  %v2248_v39 = vand.u32 2147483647, %v2237_v57  ;;  %v2250_v41 = vand.u32 2147483648, %v2237_v57  ;;  %vm2244_vm5 = vweird.f32 %v2237_v57 }
 0x5e5   : > { %3104 = vrcp.f32 %v2275_v4  ;;  %v2212_v17 = vpop.f32.mrf.mxu3  ;;  %v2288_v27 = vand.u32 2147483648, %v2275_v4  ;;  %v2198_v44 = vpop.f32.mrf.mxu2  ;;  %v2286_v50 = vand.u32 2147483647, %v2275_v4  ;;  %vm2282_vm0 = vweird.f32 %v2275_v4 }
 0x5e6   : > { %3106 = vpow2.f32 %v2785_v0  ;;  %v2230_v54 = vadd.f32 %v2222_v13, %v2212_v17  ;;  %v2229_v48 = vadd.f32 %v2221_v2, %v2198_v44  ;;  %v2251_v7 = vor.u32 1.1754944e-38, %v2250_v41 }
 0x5e7   : > { %v2289_v24 = vor.u32 1.1754944e-38, %v2288_v27  ;;  %vm2249_vm13 = vcmp.eq.f32.partialorder %v2248_v39, 8.507059e+37  ;;  %vm2287_vm4 = vcmp.eq.f32.partialorder %v2286_v50, 8.507059e+37 }
 0x5e8   : > { %v3099_v18 = vpop.eup %3098  ;;  %v2787_v21 = vmul.f32 -1.442695, %v2230_v54 }
 0x5e9   : > { %v3101_v34 = vpop.eup %3100  ;;  %v4340_v47 = vadd.f32 1.0, %v3099_v18 }
 0x5ea   : > { %v3103_v45 = vpop.eup %3102  ;;  %v4342_v46 = vadd.f32 1.0, %v3101_v34 }
 0x5eb   : > { %v3105_v33 = vpop.eup %3104  ;;  %v2240_v55 = vmul.f32 %v3103_v45, %v2237_v57  ;;  %3108 = vrcp.f32 %v4340_v47  ;;  %vm2245_vm8 = vweird.f32 %v3103_v45  ;;  %v2328_v56 = vand.u32 2147483648, %v4340_v47 }
 0x5ec   : > { %v3107_v58 = vpop.eup %3106  ;;  %v2278_v59 = vmul.f32 %v3105_v33, %v2275_v4  ;;  %3110 = vtanh.f32 %v2225_v5  ;;  %vm2283_vm9 = vweird.f32 %v3105_v33  ;;  %vm2246_vm10 = vmor %vm2244_vm5, %vm2245_vm8  ;;  %vm2259_vm15 = vweird.f32 %v4342_v46 }
 0x5ed   : > { %v2241_v3 = vsub.f32 1.0, %v2240_v55  ;;  %3112 = vrcp.f32 %v4342_v46  ;;  %v4346_v11 = vadd.f32 1.0, %v3107_v58  ;;  %vm2284_vm11 = vmor %vm2282_vm0, %vm2283_vm9  ;;  %v2263_v4 = vand.u32 2147483647, %v4342_v46 }
 0x5ee   : > { %v2279_v23 = vsub.f32 1.0, %v2278_v59  ;;  %v2265_v8 = vand.u32 2147483648, %v4342_v46  ;;  %vm2322_vm3 = vweird.f32 %v4340_v47  ;;  %v2326_v34 = vand.u32 2147483647, %v4340_v47 }
 0x5ef   : > { %v2242_v35 = vmul.f32 %v3103_v45, %v2241_v3  ;;  %3114 = vrcp.f32 %v4346_v11  ;;  %v2303_v15 = vand.u32 2147483648, %v4346_v11  ;;  %v2301_v28 = vand.u32 2147483647, %v4346_v11 }
 0x5f0   : > { %v2280_v25 = vmul.f32 %v3105_v33, %v2279_v23  ;;  %3116 = vpow2.f32 %v2787_v21  ;;  %v2266_v54 = vor.u32 1.1754944e-38, %v2265_v8  ;;  %vm2297_vm8 = vweird.f32 %v4346_v11 }
 0x5f1   : > { %v4349_v51 = vpop.eup %3108  ;;  %v2243_v52 = vadd.f32 %v3103_v45, %v2242_v35  ;;  %3118 = vtanh.f32 %v2229_v48  ;;  %vm2264_vm9 = vcmp.eq.f32.partialorder %v2263_v4, 8.507059e+37  ;;  %v2150_v58 = vstv %s2141_s28 }
 0x5f2   : > { %v3111_v43 = vpop.eup %3110  ;;  %v2281_v32 = vadd.f32 %v3105_v33, %v2280_v25  ;;  %v2318_v30 = vmul.f32 %v4349_v51, %v4340_v47  ;;  %vm2323_vm12 = vweird.f32 %v4349_v51  ;;  %v2329_v2 = vor.u32 1.1754944e-38, %v2328_v56 }
 0x5f3   : > { %v3113_v62 = vpop.eup %3112  ;;  %v2247_v6 = vsel %vm2246_vm10, %v3103_v45, %v2243_v52  ;;  %vm4374_vm7 = vmor %vm2322_vm3, %vm2323_vm12  ;;  %vm2302_vm0 = vcmp.eq.f32.partialorder %v2301_v28, 8.507059e+37  ;;  %vm2327_vm10 = vcmp.eq.f32.partialorder %v2326_v34, 8.507059e+37  ;;  %vm2152_vm12 = vcmp.lt.s32.totalorder %v2150_v58, %v3512_v40 }
 0x5f4   : > { %v2252_v12 = vsel %vm2249_vm13, %v2251_v7, %v2247_v6  ;;  %v2285_v14 = vsel %vm2284_vm11, %v3105_v33, %v2281_v32  ;;  %v2319_v1 = vsub.f32 1.0, %v2318_v30  ;;  %v2255_v16 = vmul.f32 %v3113_v62, %v4342_v46 }
 0x5f5   : > { %v3115_v49 = vpop.eup %3114  ;;  %v2290_v61 = vsel %vm2287_vm4, %v2289_v24, %v2285_v14  ;;  %v2349_v31 = vmul.f32 %v3111_v43, %v2252_v12  ;;  %vm2260_vm1 = vweird.f32 %v3113_v62  ;;  %v2304_v46 = vor.u32 1.1754944e-38, %v2303_v15 }
 0x5f6   : > { %v2347_v60 = vmul.f32 %v2290_v61, %v2139_v20  ;;  %v2320_v19 = vmul.f32 %v4349_v51, %v2319_v1  ;;  %v2256_v63 = vsub.f32 1.0, %v2255_v16  ;;  %v2293_v57 = vmul.f32 %v3115_v49, %v4346_v11  ;;  %v3117_v0 = vpop.eup %3116  ;;  %vm2261_vm6 = vmor %vm2259_vm15, %vm2260_vm1 }
 0x5f7   : > { %v2316_v20 = vadd.f32 1.0, %v3117_v0  ;;  %vm2298_vm2 = vweird.f32 %v3115_v49  ;;  %v3119_v5 = vpop.eup %3118  ;;  %vm2151_vm11 = vcmp.lt.s32.totalorder %v2150_v58, %v4451_v29 }
 0x5f8   : > { %v2351_v9 = vadd.f32 %v2349_v31, %v2347_v60  ;;  %v2294_v10 = vsub.f32 1.0, %v2293_v57  ;;  %v2257_v13 = vmul.f32 %v3113_v62, %v2256_v63  ;;  %v2321_v36 = vadd.f32 %v4349_v51, %v2320_v19  ;;  %vm2299_vm5 = vmor %vm2297_vm8, %vm2298_vm2 }
 0x5f9   : > { %vm2359_vm13 = vmpackc.low %vm2151_vm11, %vm2151_vm11  ;;  %v2343_v43 = vand.u32 2147483648, %v2316_v20  ;;  %v2341_v53 = vand.u32 2147483647, %v2316_v20  ;;  %vm2337_vm14 = vweird.f32 %v2316_v20 }
 0x5fa   : > { %3120 = vtanh.f32 %v2351_v9  ;;  %v2295_v17 = vmul.f32 %v3115_v49, %v2294_v10  ;;  %v2258_v18 = vadd.f32 %v3113_v62, %v2257_v13  ;;  %v2325_v47 = vsel %vm4374_vm7, %v4349_v51, %v2321_v36  ;;  %vm2360_vm2 = vmpackc.low %vm2152_vm12, %vm2152_vm12 }
 0x5fb   : > { %3122 = vrcp.f32 %v2316_v20  ;;  %v2330_v27 = vsel %vm2327_vm10, %v2329_v2, %v2325_v47  ;;  %v2344_v29 = vor.u32 1.1754944e-38, %v2343_v43  ;;  %vm2342_vm1 = vcmp.eq.f32.partialorder %v2341_v53, 8.507059e+37 }
 0x5fc   : > { %v2262_v33 = vsel %vm2261_vm6, %v3113_v62, %v2258_v18  ;;  %v2296_v55 = vadd.f32 %v3115_v49, %v2295_v17 }
 0x5fd   : > { %v2267_v59 = vsel %vm2264_vm9, %v2266_v54, %v2262_v33 }
 0x5fe   : > { %v2300_v3 = vsel %vm2299_vm5, %v3115_v49, %v2296_v55  ;;  %v2350_v21 = vmul.f32 %v3119_v5, %v2267_v59 }
 0x5ff   : > { %v2305_v11 = vsel %vm2302_vm0, %v2304_v46, %v2300_v3 }
 0x600   : > { %v3121_v23 = vpop.eup %3120  ;;  %v2348_v39 = vmul.f32 %v2305_v11, %v2140_v37 }
 0x601   : > { %v3123_v41 = vpop.eup %3122  ;;  %v2355_v44 = vmul.f32 %v3121_v23, %v2330_v27 }
 0x602   : > { %v2352_v35 = vadd.f32 %v2350_v21, %v2348_v39  ;;  %v2333_v50 = vmul.f32 %v3123_v41, %v2316_v20  ;;  %vm2338_vm4 = vweird.f32 %v3123_v41 }
 0x603   : > { %v2357_v25 = vpack.c.bf16 %v2355_v44, %v2355_v44  ;;  %vm2339_vm15 = vmor %vm2337_vm14, %vm2338_vm4 }
 0x604   : > { %3124 = vtanh.f32 %v2352_v35  ;;  %v2334_v51 = vsub.f32 1.0, %v2333_v50 }
 0x605   : > { %v2361_v52 = vsel %vm2359_vm13, %v2357_v25, 0  ;;  %v2368_v48 = vsel %vm2359_vm13, %v2357_v25, %v4328_v26 }
 0x606   : > { %2366 = vst [vmem:[%s2365_s17] sm:$0xf] %v2361_v52  ;;  %v2335_v42 = vmul.f32 %v3123_v41, %v2334_v51 }
 0x607   : > { %2372 = vst [vmem:[#allocation2] sm:$0xf] %v2368_v48 }
 0x608   : > { %v2336_v22 = vadd.f32 %v3123_v41, %v2335_v42 }
 0x60a   : > { %v3125_v37 = vpop.eup %3124  ;;  %v2340_v7 = vsel %vm2339_vm15, %v3123_v41, %v2336_v22 }
 0x60b   : > { %v2345_v32 = vsel %vm2342_vm1, %v2344_v29, %v2340_v7 }
 0x60c   : > { %v2356_v30 = vmul.f32 %v3125_v37, %v2345_v32 }
 0x60e   : > { %v2358_v62 = vpack.c.bf16 %v2356_v30, %v2356_v30 }
 0x610   : > { %v2362_v26 = vsel %vm2360_vm2, %v2358_v62, 0  ;;  %v2369_v24 = vsel %vm2360_vm2, %v2358_v62, %v4334_v38 }
 0x611   : > { %2367 = vst [vmem:[%s2365_s17 + $0x4] sm:$0xf] %v2362_v26 }
 0x612   : > { %2373 = vst [vmem:[#allocation2 + $0x4] sm:$0xf] %v2369_v24 }
 0x613 PF: > { %s13_s14 = sadd.s32 1, %s3148_s14   ;;  %s4466_s12 = smov %s3144_s13 }
 0x614   : > { %p10_p5 = scmp.ge.s32.totalorder %s13_s14, 4   ;;  %s4467_s13 = smov %s4469_s15 }
 0x616   :  { %12 = sbr.rel (!%p10_p5) target bundleno = 2 (0x2), region = 85 }

</bundles_post_ra>
